<compile_context>
chip_gen: v6e
topology: v6e:2x2x1
jax: 0.10.0
libtpu: 0.0.40
codegen_flags: <defaults>
</compile_context>

<pallas_src>
import functools

import jax
import jax.numpy as jnp
from jax import lax
from jax.experimental import pallas as pl
from jax.experimental.pallas import tpu as pltpu

_LANE = 128


def _sigmoid(x):
    # sigmoid(x) = 0.5*tanh(0.5*x) + 0.5 : one EUP transcendental instead of exp+divide.
    return 0.5 * jnp.tanh(0.5 * x) + 0.5


def _bilstm_recurrence_kernel(pre_f_ref, pre_b_ref,          # (Tc, B, 4Hp) bf16, time-major
                              whh_f_hbm, whh_b_hbm,          # (Hp, 4Hp) raw HBM refs
                              fcw_ref, fcb_ref,              # (1, 2Hp) VMEM f32, (1,1) SMEM f32
                              out_ref, hn_ref,               # (B, 1), (2, B, Hp) f32 outputs
                              whh_f_buf, whh_b_buf,          # (Hp, 4Hp) VMEM weight scratch
                              h_f, c_f, h_b, c_b, hb_first,  # (B, Hp) f32 state scratch
                              *, hidden_p, t_chunk, n_chunks):
    Hp = hidden_p
    chunk = pl.program_id(0)

    @pl.when(chunk == 0)
    def _init():
        # Single-buffered weight residency: DMA the recurrent weights into VMEM exactly
        # once instead of letting the BlockSpec pipeliner double-buffer them.
        pltpu.sync_copy(whh_f_hbm, whh_f_buf)
        pltpu.sync_copy(whh_b_hbm, whh_b_buf)
        h_f[...] = jnp.zeros_like(h_f)
        c_f[...] = jnp.zeros_like(c_f)
        h_b[...] = jnp.zeros_like(h_b)
        c_b[...] = jnp.zeros_like(c_b)

    w_f = whh_f_buf[...]
    w_b = whh_b_buf[...]

    def step(h, c_state, whh, pre_t):
        # Only the recurrent matmul is on the critical path; the x-projection arrives
        # precomputed in bf16 and is promoted into the f32 accumulator here.
        g = jnp.dot(h.astype(whh.dtype), whh,
                    preferred_element_type=jnp.float32) + pre_t.astype(jnp.float32)
        # Gate columns ordered [i | f | o | g], each block lane-aligned (Hp % 128 == 0):
        # one tanh-based sigmoid over a contiguous 3Hp slice, one tanh over the last Hp.
        ifo = _sigmoid(g[:, 0:3 * Hp])
        g_t = jnp.tanh(g[:, 3 * Hp:4 * Hp])
        i_g = ifo[:, 0:Hp]
        f_g = ifo[:, Hp:2 * Hp]
        o_g = ifo[:, 2 * Hp:3 * Hp]
        c_new = f_g * c_state + i_g * g_t
        h_new = o_g * jnp.tanh(c_new)
        return h_new, c_new

    def loop_body(s, carry):
        h_f_v, c_f_v, h_b_v, c_b_v, hb_last = carry
        # Time-major pre blocks: one contiguous (B, 4Hp) tile per step per direction.
        h_f_v, c_f_v = step(h_f_v, c_f_v, w_f, pre_f_ref[s])
        h_b_v, c_b_v = step(h_b_v, c_b_v, w_b, pre_b_ref[t_chunk - 1 - s])
        # Backward hidden aligned with global t = T-1 is produced by the very first
        # backward step of chunk 0 (it feeds lstm_out[:, -1, H:2H]).
        hb_last = jnp.where(s == 0, h_b_v, hb_last)
        return h_f_v, c_f_v, h_b_v, c_b_v, hb_last

    init = (h_f[...], c_f[...], h_b[...], c_b[...], h_b[...])
    # Bounded unroll: the two independent direction chains still overlap each other's
    # MXU / VPU / EUP latency, without the vreg blow-up of a fully unrolled Python loop.
    h_f_v, c_f_v, h_b_v, c_b_v, hb_last = lax.fori_loop(
        0, t_chunk, loop_body, init, unroll=min(t_chunk, 8))

    # Carry state to the next time chunk.
    h_f[...] = h_f_v
    c_f[...] = c_f_v
    h_b[...] = h_b_v
    c_b[...] = c_b_v

    @pl.when(chunk == 0)
    def _capture():
        hb_first[...] = hb_last

    @pl.when(chunk == n_chunks - 1)
    def _finish():
        # fc head: (B, 2Hp) x (2Hp, 1) is too skinny for the MXU -> VPU multiply + reduce.
        w_head_f = fcw_ref[:, 0:Hp]
        w_head_b = fcw_ref[:, Hp:2 * Hp]
        logits = (jnp.sum(h_f_v * w_head_f, axis=-1, keepdims=True)
                  + jnp.sum(hb_first[...] * w_head_b, axis=-1, keepdims=True)
                  + fcb_ref[0, 0])
        out_ref[...] = _sigmoid(logits)
        hn_ref[0] = h_f_v        # forward final hidden  (t = T-1)
        hn_ref[1] = h_b_v        # backward final hidden (t = 0)


def _round_up(x, m):
    return ((x + m - 1) // m) * m


def _pad_gate_axis(w, H, Hp):
    """Pad trailing gate axis 4H (gates [i|f|o|g]) to 4Hp, zero-filling each gate block."""
    if Hp == H:
        return w
    zeros = jnp.zeros(w.shape[:-1] + (Hp - H,), w.dtype)
    parts = []
    for k in range(4):
        parts.append(w[..., k * H:(k + 1) * H])
        parts.append(zeros)
    return jnp.concatenate(parts, axis=-1)


def _pick_time_chunk(T, B, Hp, vmem_limit, pre_itemsize):
    """Largest divisor of T whose double-buffered pre blocks fit ~65% of the VMEM limit."""
    per_step = 2 * 2 * B * (4 * Hp) * pre_itemsize            # dirs x bufs x (B, 4Hp) row
    resident = (2 * Hp * (4 * Hp) * 2                         # whh_f / whh_b scratch (bf16)
                + 5 * B * Hp * 4                              # h/c/hb_first state (f32)
                + 2 * B * Hp * 4                              # resident hn output block
                + 2 * 2 * Hp * 4 * 2)                         # fc_w (double-buffered)
    budget = int(0.65 * vmem_limit) - resident
    cap = max(1, budget // per_step)
    if T <= cap:
        return T
    best = 1
    for d in range(1, min(cap, T) + 1):
        if T % d == 0:
            best = d
    return best


@functools.partial(jax.jit, static_argnames=("time_chunk", "compute_dtype"))
def default_lstm_forward(x, params, *, time_chunk=None, compute_dtype=jnp.bfloat16):
    """x: (B, T, I) batch-first (like PyTorch). Returns (output (B,1), hn (2,B,H))."""
    B, T, I = x.shape
    H = params["whh_f"].shape[0]
    cd = compute_dtype
    f32 = jnp.float32

    # Lane-align the hidden size so every gate slice (i/f/o/g) starts on an (8,128) tile
    # boundary. Padded hidden units have zero weights/biases and provably stay at 0, so
    # results are unchanged.  (A multiple of 256 additionally avoids MXU pass padding on
    # v6e/v7x; 128 is the correctness/layout requirement.)
    Hp = _round_up(H, _LANE)

    # Generation-aware VMEM budget (128 MiB on v5e/v6e, 64 MiB per TC on v7x).
    try:
        vmem_cap = pltpu.get_tpu_info().vmem_capacity_bytes
    except Exception:          # interpret mode / older jax: fall back to the v7x-safe size
        vmem_cap = 64 * 1024 * 1024
    vmem_limit = max(32 * 1024 * 1024, int(0.75 * vmem_cap))

    if time_chunk is None:
        Tc = _pick_time_chunk(T, B, Hp, vmem_limit, jnp.dtype(cd).itemsize)
    else:
        Tc = int(time_chunk)
    assert T % Tc == 0, "time_chunk must divide T"
    nc = T // Tc

    # ---- parameter layout: pad each gate block from H to Hp lanes ----
    wih_f = _pad_gate_axis(params["wih_f"], H, Hp)                    # (I, 4Hp)
    wih_b = _pad_gate_axis(params["wih_b"], H, Hp)
    b_f = _pad_gate_axis(params["b_f"], H, Hp)                        # (1, 4Hp)
    b_b = _pad_gate_axis(params["b_b"], H, Hp)

    def pad_rows(w):   # (H, 4Hp) -> (Hp, 4Hp): zero rows for padded hidden units
        if Hp == H:
            return w
        return jnp.concatenate([w, jnp.zeros((Hp - H, w.shape[1]), w.dtype)], axis=0)

    whh_f = pad_rows(_pad_gate_axis(params["whh_f"], H, Hp)).astype(cd)   # (Hp, 4Hp)
    whh_b = pad_rows(_pad_gate_axis(params["whh_b"], H, Hp)).astype(cd)

    if Hp == H:
        fc_w = params["fc_w"]
    else:
        zpad = jnp.zeros((1, Hp - H), params["fc_w"].dtype)
        fc_w = jnp.concatenate([params["fc_w"][:, :H], zpad,
                                params["fc_w"][:, H:], zpad], axis=1)     # (1, 2Hp)

    # ---- Phase 1 (plain XLA): hoisted input projection as ONE MXU-friendly GEMM ----
    # Time-major so each recurrence step reads one contiguous (B, 4Hp) tile.  Bias added
    # in f32, then the streamed pre-activations are cast to bf16: halves the only
    # per-chunk HBM->VMEM DMA and halves the pre-block VMEM footprint.
    w_ih = jnp.concatenate([wih_f, wih_b], axis=1).astype(cd)             # (I, 8Hp)
    b_ih = jnp.concatenate([b_f, b_b], axis=1)                            # (1, 8Hp) f32
    x_tm = jnp.transpose(x, (1, 0, 2)).reshape(T * B, I)
    pre = (jnp.dot(x_tm.astype(cd), w_ih, preferred_element_type=f32) + b_ih).astype(cd)
    pre = pre.reshape(T, B, 8 * Hp)

    grid_spec = pltpu.PrefetchScalarGridSpec(
        num_scalar_prefetch=0,
        grid=(nc,),
        in_specs=[
            # forward gate pre-activations: time chunk c, gate-column block 0 -> [0, 4Hp)
            pl.BlockSpec((Tc, B, 4 * Hp), lambda c: (c, 0, 0)),
            # backward gate pre-activations: time chunk nc-1-c, column block 1 -> [4Hp, 8Hp)
            pl.BlockSpec((Tc, B, 4 * Hp), lambda c: (nc - 1 - c, 0, 1)),
            pl.BlockSpec(memory_space=pl.ANY),                  # whh_f: DMA'd once into scratch
            pl.BlockSpec(memory_space=pl.ANY),                  # whh_b
            pl.BlockSpec((1, 2 * Hp), lambda c: (0, 0)),        # fc_w
            pl.BlockSpec(memory_space=pltpu.MemorySpace.SMEM),  # fc_b scalar
        ],
        out_specs=[
            pl.BlockSpec((B, 1), lambda c: (0, 0)),
            pl.BlockSpec((2, B, Hp), lambda c: (0, 0, 0)),
        ],
        scratch_shapes=[pltpu.VMEM((Hp, 4 * Hp), cd),    # whh_f resident copy
                        pltpu.VMEM((Hp, 4 * Hp), cd),    # whh_b resident copy
                        pltpu.VMEM((B, Hp), f32),        # h_f
                        pltpu.VMEM((B, Hp), f32),        # c_f
                        pltpu.VMEM((B, Hp), f32),        # h_b
                        pltpu.VMEM((B, Hp), f32),        # c_b
                        pltpu.VMEM((B, Hp), f32)],       # hb_first (bwd hidden at t = T-1)
    )

    out, hn = pl.pallas_call(
        functools.partial(_bilstm_recurrence_kernel,
                          hidden_p=Hp, t_chunk=Tc, n_chunks=nc),
        out_shape=(jax.ShapeDtypeStruct((B, 1), f32),
                   jax.ShapeDtypeStruct((2, B, Hp), f32)),
        grid_spec=grid_spec,
        compiler_params=pltpu.CompilerParams(
            dimension_semantics=("arbitrary",),   # recurrence is carried across chunks
            vmem_limit_bytes=vmem_limit,
        ),
    )(pre, pre, whh_f, whh_b, fc_w, params["fc_b"])
    return out, hn[:, :, :H]


def init_params(key, input_size, hidden_size):
    """Random params with nn.LSTM-compatible shapes, pre-laid-out for the kernel.

    Layout vs PyTorch:
      * weight_ih (4H, I) -> stored transposed as (I, 4H); weight_hh (4H, H) -> (H, 4H).
      * gate axis ordered [i|f|o|g] (PyTorch uses [i|f|g|o]); a real checkpoint load must
        permute + transpose or results will be silently wrong.
      * b = b_ih + b_hh folded into one (1, 4H) bias per direction.
      * fc weight stored as a (1, 2H) row vector, fc bias (1, 1).
    """
    ks = jax.random.split(key, 10)
    H, I = hidden_size, input_size
    bound = 1.0 / jnp.sqrt(H)
    u = lambda k, shape: jax.random.uniform(k, shape, jnp.float32, -bound, bound)
    return {
        "wih_f": u(ks[0], (I, 4 * H)),
        "whh_f": u(ks[1], (H, 4 * H)),
        "b_f":   u(ks[2], (1, 4 * H)) + u(ks[3], (1, 4 * H)),
        "wih_b": u(ks[4], (I, 4 * H)),
        "whh_b": u(ks[5], (H, 4 * H)),
        "b_b":   u(ks[6], (1, 4 * H)) + u(ks[7], (1, 4 * H)),
        "fc_w":  u(ks[8], (1, 2 * H)),
        "fc_b":  u(ks[9], (1, 1)),
    }


def _reference_forward(x, params, compute_dtype=jnp.bfloat16):
    """Pure-JAX reference of the same math (bf16 matmul operands, bf16-streamed pre)."""
    B, T, I = x.shape
    H = params["whh_f"].shape[0]
    cd = compute_dtype
    f32 = jnp.float32

    def make_cell(wih, whh, b):
        def cell(carry, x_t):
            h, c = carry
            pre = jnp.dot(x_t.astype(cd), wih.astype(cd), preferred_element_type=f32) + b
            pre = pre.astype(cd).astype(f32)         # model the bf16 streaming of `pre`
            g = pre + jnp.dot(h.astype(cd), whh.astype(cd), preferred_element_type=f32)
            i = jax.nn.sigmoid(g[:, 0:H])
            f = jax.nn.sigmoid(g[:, H:2 * H])
            o = jax.nn.sigmoid(g[:, 2 * H:3 * H])
            gg = jnp.tanh(g[:, 3 * H:4 * H])
            c = f * c + i * gg
            h = o * jnp.tanh(c)
            return (h, c), h
        return cell

    h0 = (jnp.zeros((B, H), f32), jnp.zeros((B, H), f32))
    xs = jnp.transpose(x, (1, 0, 2))
    (_, _), hs_f = lax.scan(make_cell(params["wih_f"], params["whh_f"], params["b_f"]), h0, xs)
    (_, _), hs_b = lax.scan(make_cell(params["wih_b"], params["whh_b"], params["b_b"]), h0, xs[::-1])

    h_f_last = hs_f[-1]
    h_b_at_last_t = hs_b[0]       # backward hidden aligned with t = T-1
    h_b_final = hs_b[-1]
    logits = ((h_f_last * params["fc_w"][:, 0:H]).sum(-1, keepdims=True)
              + (h_b_at_last_t * params["fc_w"][:, H:2 * H]).sum(-1, keepdims=True)
              + params["fc_b"])
    out = jax.nn.sigmoid(logits)
    hn = jnp.stack([h_f_last, h_b_final], axis=0)
    return out, hn


if __name__ == "__main__":
    key = jax.random.PRNGKey(0)
    B, T, I, H = 2, 16, 16, 32
    k_x, k_p = jax.random.split(key)
    x = jax.random.normal(k_x, (B, T, I), jnp.float32)
    params = init_params(k_p, I, H)

    # time_chunk=8 -> grid of 2 time chunks: exercises the carried hidden/cell state and
    # the chunk-streaming (double-buffered DMA) path, not just the degenerate 1-chunk case.
    out, hn = default_lstm_forward(x, params, time_chunk=8)
    out = jax.block_until_ready(out)
    hn = jax.block_until_ready(hn)

    ref_out, ref_hn = _reference_forward(x, params)
    assert out.shape == (B, 1) and hn.shape == (2, B, H)
    # Both sides use bf16 matmul operands / bf16-streamed pre with f32 accumulation;
    # tolerance covers transcendental / rounding-order differences between Mosaic and XLA.
    assert jnp.allclose(out, ref_out, atol=5e-3), "output mismatch vs reference"
    assert jnp.allclose(hn, ref_hn, atol=5e-3), "hn mismatch vs reference"

    print("KERNEL_OK")
</pallas_src>

<mosaic_0001>
module attributes {stable_mosaic.version = 11 : i64} {
  func.func @_bilstm_recurrence_kernel(%arg0: i32, %arg1: memref<8x2x512xbf16, #tpu.memory_space<vmem>>, %arg2: memref<8x2x512xbf16, #tpu.memory_space<vmem>>, %arg3: memref<128x512xbf16, #tpu.memory_space<any>>, %arg4: memref<128x512xbf16, #tpu.memory_space<any>>, %arg5: memref<1x256xf32, #tpu.memory_space<vmem>>, %arg6: memref<1x1xf32, #tpu.memory_space<smem>>, %arg7: memref<2x1xf32, #tpu.memory_space<vmem>>, %arg8: memref<2x2x128xf32, #tpu.memory_space<vmem>>, %arg9: memref<128x512xbf16, #tpu.memory_space<vmem>>, %arg10: memref<128x512xbf16, #tpu.memory_space<vmem>>, %arg11: memref<2x128xf32, #tpu.memory_space<vmem>>, %arg12: memref<2x128xf32, #tpu.memory_space<vmem>>, %arg13: memref<2x128xf32, #tpu.memory_space<vmem>>, %arg14: memref<2x128xf32, #tpu.memory_space<vmem>>, %arg15: memref<2x128xf32, #tpu.memory_space<vmem>>) attributes {dimension_semantics = [#tpu.dimension_semantics<arbitrary>], iteration_bounds = array<i64: 2>, scalar_prefetch = 0 : i64, scratch_operands = 7 : i64, tpu.core_type = #tpu.core_type<tc>, window_params = [{transform_indices = @transform_0, window_bounds = array<i64: 8, 2, 512>}, {transform_indices = @transform_1, window_bounds = array<i64: 8, 2, 512>}, {}, {}, {pipeline_mode = #tpu.pipeline_mode<synchronous>, transform_indices = @transform_4, window_bounds = array<i64: 1, 256>}, {transform_indices = @transform_5, window_bounds = array<i64: 1, 1>}, {pipeline_mode = #tpu.pipeline_mode<synchronous>, transform_indices = @transform_6, window_bounds = array<i64: 2, 1>}, {pipeline_mode = #tpu.pipeline_mode<synchronous>, transform_indices = @transform_7, window_bounds = array<i64: 2, 2, 128>}]} {
    %c0_i32 = arith.constant 0 : i32
    %0 = arith.cmpi eq, %arg0, %c0_i32 : i32
    %1 = arith.extui %0 : i1 to i32
    %c0_i32_0 = arith.constant 0 : i32
    %2 = arith.cmpi ne, %1, %c0_i32_0 : i32
    scf.if %2 {
      "tpu.region"() ({
        %452 = tpu.sem_alloc : memref<!tpu.dma_semaphore, #tpu.memory_space<semaphore_mem>>
        tpu.enqueue_dma source(%arg3 : memref<128x512xbf16, #tpu.memory_space<any>>) target(%arg9 : memref<128x512xbf16, #tpu.memory_space<vmem>>) target_semaphore(%452 : memref<!tpu.dma_semaphore, #tpu.memory_space<semaphore_mem>>)
        tpu.wait_dma2 semaphore(%452 : memref<!tpu.dma_semaphore, #tpu.memory_space<semaphore_mem>>) src(%arg3 : memref<128x512xbf16, #tpu.memory_space<any>>) dst(%arg9 : memref<128x512xbf16, #tpu.memory_space<vmem>>)
        tpu.yield
      }) : () -> ()
      "tpu.region"() ({
        %452 = tpu.sem_alloc : memref<!tpu.dma_semaphore, #tpu.memory_space<semaphore_mem>>
        tpu.enqueue_dma source(%arg4 : memref<128x512xbf16, #tpu.memory_space<any>>) target(%arg10 : memref<128x512xbf16, #tpu.memory_space<vmem>>) target_semaphore(%452 : memref<!tpu.dma_semaphore, #tpu.memory_space<semaphore_mem>>)
        tpu.wait_dma2 semaphore(%452 : memref<!tpu.dma_semaphore, #tpu.memory_space<semaphore_mem>>) src(%arg4 : memref<128x512xbf16, #tpu.memory_space<any>>) dst(%arg10 : memref<128x512xbf16, #tpu.memory_space<vmem>>)
        tpu.yield
      }) : () -> ()
      %cst_138 = arith.constant 0.000000e+00 : f32
      %444 = vector.broadcast %cst_138 : f32 to vector<2x128xf32>
      %c0_139 = arith.constant 0 : index
      %c0_140 = arith.constant 0 : index
      %445 = vector.load %arg11[%c0_139, %c0_140] : memref<2x128xf32, #tpu.memory_space<vmem>>, vector<2x128xf32>
      tpu.vector_store %arg11[%c0_139, %c0_140], %444 {strides = array<i32>} : memref<2x128xf32, #tpu.memory_space<vmem>>, vector<2x128xf32>,
      %cst_141 = arith.constant 0.000000e+00 : f32
      %446 = vector.broadcast %cst_141 : f32 to vector<2x128xf32>
      %c0_142 = arith.constant 0 : index
      %c0_143 = arith.constant 0 : index
      %447 = vector.load %arg12[%c0_142, %c0_143] : memref<2x128xf32, #tpu.memory_space<vmem>>, vector<2x128xf32>
      tpu.vector_store %arg12[%c0_142, %c0_143], %446 {strides = array<i32>} : memref<2x128xf32, #tpu.memory_space<vmem>>, vector<2x128xf32>,
      %cst_144 = arith.constant 0.000000e+00 : f32
      %448 = vector.broadcast %cst_144 : f32 to vector<2x128xf32>
      %c0_145 = arith.constant 0 : index
      %c0_146 = arith.constant 0 : index
      %449 = vector.load %arg13[%c0_145, %c0_146] : memref<2x128xf32, #tpu.memory_space<vmem>>, vector<2x128xf32>
      tpu.vector_store %arg13[%c0_145, %c0_146], %448 {strides = array<i32>} : memref<2x128xf32, #tpu.memory_space<vmem>>, vector<2x128xf32>,
      %cst_147 = arith.constant 0.000000e+00 : f32
      %450 = vector.broadcast %cst_147 : f32 to vector<2x128xf32>
      %c0_148 = arith.constant 0 : index
      %c0_149 = arith.constant 0 : index
      %451 = vector.load %arg14[%c0_148, %c0_149] : memref<2x128xf32, #tpu.memory_space<vmem>>, vector<2x128xf32>
      tpu.vector_store %arg14[%c0_148, %c0_149], %450 {strides = array<i32>} : memref<2x128xf32, #tpu.memory_space<vmem>>, vector<2x128xf32>,
    } else {
    }
    %c0 = arith.constant 0 : index
    %c0_1 = arith.constant 0 : index
    %3 = vector.load %arg9[%c0, %c0_1] : memref<128x512xbf16, #tpu.memory_space<vmem>>, vector<128x512xbf16>
    %c0_2 = arith.constant 0 : index
    %c0_3 = arith.constant 0 : index
    %4 = vector.load %arg10[%c0_2, %c0_3] : memref<128x512xbf16, #tpu.memory_space<vmem>>, vector<128x512xbf16>
    %c0_4 = arith.constant 0 : index
    %c0_5 = arith.constant 0 : index
    %5 = vector.load %arg11[%c0_4, %c0_5] : memref<2x128xf32, #tpu.memory_space<vmem>>, vector<2x128xf32>
    %c0_6 = arith.constant 0 : index
    %c0_7 = arith.constant 0 : index
    %6 = vector.load %arg12[%c0_6, %c0_7] : memref<2x128xf32, #tpu.memory_space<vmem>>, vector<2x128xf32>
    %c0_8 = arith.constant 0 : index
    %c0_9 = arith.constant 0 : index
    %7 = vector.load %arg13[%c0_8, %c0_9] : memref<2x128xf32, #tpu.memory_space<vmem>>, vector<2x128xf32>
    %c0_10 = arith.constant 0 : index
    %c0_11 = arith.constant 0 : index
    %8 = vector.load %arg14[%c0_10, %c0_11] : memref<2x128xf32, #tpu.memory_space<vmem>>, vector<2x128xf32>
    %c0_12 = arith.constant 0 : index
    %c0_13 = arith.constant 0 : index
    %9 = vector.load %arg13[%c0_12, %c0_13] : memref<2x128xf32, #tpu.memory_space<vmem>>, vector<2x128xf32>
    %c0_i32_14 = arith.constant 0 : i32
    %10 = arith.index_cast %c0_i32_14 : i32 to index
    %c0_15 = arith.constant 0 : index
    %c0_16 = arith.constant 0 : index
    %11 = vector.load %arg1[%10, %c0_15, %c0_16] : memref<8x2x512xbf16, #tpu.memory_space<vmem>>, vector<1x2x512xbf16>
    %12 = vector.shape_cast %11 : vector<1x2x512xbf16> to vector<2x512xbf16>
    %13 = arith.truncf %5 : vector<2x128xf32> to vector<2x128xbf16>
    %cst = arith.constant dense<0.000000e+00> : vector<2x512xf32>
    %14 = tpu.matmul %13, %3, %cst {dimension_numbers = #tpu.dot_dimension_numbers<[1], [0], [0], [1], [0, 0, 1, 1], [], []>} : vector<2x128xbf16>, vector<128x512xbf16>, vector<2x512xf32> -> vector<2x512xf32>
    %15 = arith.extf %12 : vector<2x512xbf16> to vector<2x512xf32>
    %16 = arith.addf %14, %15 : vector<2x512xf32>
    %17 = vector.extract_strided_slice %16 {offsets = [0, 0], sizes = [2, 384], strides = [1, 1]} : vector<2x512xf32> to vector<2x384xf32>
    %cst_17 = arith.constant 5.000000e-01 : f32
    %18 = vector.broadcast %cst_17 : f32 to vector<2x384xf32>
    %19 = arith.mulf %18, %17 : vector<2x384xf32>
    %20 = math.tanh %19 : vector<2x384xf32>
    %cst_18 = arith.constant 5.000000e-01 : f32
    %21 = vector.broadcast %cst_18 : f32 to vector<2x384xf32>
    %22 = arith.mulf %21, %20 : vector<2x384xf32>
    %cst_19 = arith.constant 5.000000e-01 : f32
    %23 = vector.broadcast %cst_19 : f32 to vector<2x384xf32>
    %24 = arith.addf %22, %23 : vector<2x384xf32>
    %25 = vector.extract_strided_slice %16 {offsets = [0, 384], sizes = [2, 128], strides = [1, 1]} : vector<2x512xf32> to vector<2x128xf32>
    %26 = math.tanh %25 : vector<2x128xf32>
    %27 = vector.extract_strided_slice %24 {offsets = [0, 0], sizes = [2, 128], strides = [1, 1]} : vector<2x384xf32> to vector<2x128xf32>
    %28 = vector.extract_strided_slice %24 {offsets = [0, 128], sizes = [2, 128], strides = [1, 1]} : vector<2x384xf32> to vector<2x128xf32>
    %29 = vector.extract_strided_slice %24 {offsets = [0, 256], sizes = [2, 128], strides = [1, 1]} : vector<2x384xf32> to vector<2x128xf32>
    %30 = arith.mulf %28, %6 : vector<2x128xf32>
    %31 = arith.mulf %27, %26 : vector<2x128xf32>
    %32 = arith.addf %30, %31 : vector<2x128xf32>
    %33 = math.tanh %32 : vector<2x128xf32>
    %34 = arith.mulf %29, %33 : vector<2x128xf32>
    %c7_i32 = arith.constant 7 : i32
    %35 = arith.subi %c7_i32, %c0_i32_14 : i32
    %36 = arith.index_cast %35 : i32 to index
    %c0_20 = arith.constant 0 : index
    %c0_21 = arith.constant 0 : index
    %37 = vector.load %arg2[%36, %c0_20, %c0_21] : memref<8x2x512xbf16, #tpu.memory_space<vmem>>, vector<1x2x512xbf16>
    %38 = vector.shape_cast %37 : vector<1x2x512xbf16> to vector<2x512xbf16>
    %39 = arith.truncf %7 : vector<2x128xf32> to vector<2x128xbf16>
    %cst_22 = arith.constant dense<0.000000e+00> : vector<2x512xf32>
    %40 = tpu.matmul %39, %4, %cst_22 {dimension_numbers = #tpu.dot_dimension_numbers<[1], [0], [0], [1], [0, 0, 1, 1], [], []>} : vector<2x128xbf16>, vector<128x512xbf16>, vector<2x512xf32> -> vector<2x512xf32>
    %41 = arith.extf %38 : vector<2x512xbf16> to vector<2x512xf32>
    %42 = arith.addf %40, %41 : vector<2x512xf32>
    %43 = vector.extract_strided_slice %42 {offsets = [0, 0], sizes = [2, 384], strides = [1, 1]} : vector<2x512xf32> to vector<2x384xf32>
    %cst_23 = arith.constant 5.000000e-01 : f32
    %44 = vector.broadcast %cst_23 : f32 to vector<2x384xf32>
    %45 = arith.mulf %44, %43 : vector<2x384xf32>
    %46 = math.tanh %45 : vector<2x384xf32>
    %cst_24 = arith.constant 5.000000e-01 : f32
    %47 = vector.broadcast %cst_24 : f32 to vector<2x384xf32>
    %48 = arith.mulf %47, %46 : vector<2x384xf32>
    %cst_25 = arith.constant 5.000000e-01 : f32
    %49 = vector.broadcast %cst_25 : f32 to vector<2x384xf32>
    %50 = arith.addf %48, %49 : vector<2x384xf32>
    %51 = vector.extract_strided_slice %42 {offsets = [0, 384], sizes = [2, 128], strides = [1, 1]} : vector<2x512xf32> to vector<2x128xf32>
    %52 = math.tanh %51 : vector<2x128xf32>
    %53 = vector.extract_strided_slice %50 {offsets = [0, 0], sizes = [2, 128], strides = [1, 1]} : vector<2x384xf32> to vector<2x128xf32>
    %54 = vector.extract_strided_slice %50 {offsets = [0, 128], sizes = [2, 128], strides = [1, 1]} : vector<2x384xf32> to vector<2x128xf32>
    %55 = vector.extract_strided_slice %50 {offsets = [0, 256], sizes = [2, 128], strides = [1, 1]} : vector<2x384xf32> to vector<2x128xf32>
    %56 = arith.mulf %54, %8 : vector<2x128xf32>
    %57 = arith.mulf %53, %52 : vector<2x128xf32>
    %58 = arith.addf %56, %57 : vector<2x128xf32>
    %59 = math.tanh %58 : vector<2x128xf32>
    %60 = arith.mulf %55, %59 : vector<2x128xf32>
    %c0_i32_26 = arith.constant 0 : i32
    %61 = arith.cmpi eq, %c0_i32_14, %c0_i32_26 : i32
    %62 = arith.select %61, %60, %9 : vector<2x128xf32>
    %c1_i32 = arith.constant 1 : i32
    %63 = arith.index_cast %c1_i32 : i32 to index
    %c0_27 = arith.constant 0 : index
    %c0_28 = arith.constant 0 : index
    %64 = vector.load %arg1[%63, %c0_27, %c0_28] : memref<8x2x512xbf16, #tpu.memory_space<vmem>>, vector<1x2x512xbf16>
    %65 = vector.shape_cast %64 : vector<1x2x512xbf16> to vector<2x512xbf16>
    %66 = arith.truncf %34 : vector<2x128xf32> to vector<2x128xbf16>
    %cst_29 = arith.constant dense<0.000000e+00> : vector<2x512xf32>
    %67 = tpu.matmul %66, %3, %cst_29 {dimension_numbers = #tpu.dot_dimension_numbers<[1], [0], [0], [1], [0, 0, 1, 1], [], []>} : vector<2x128xbf16>, vector<128x512xbf16>, vector<2x512xf32> -> vector<2x512xf32>
    %68 = arith.extf %65 : vector<2x512xbf16> to vector<2x512xf32>
    %69 = arith.addf %67, %68 : vector<2x512xf32>
    %70 = vector.extract_strided_slice %69 {offsets = [0, 0], sizes = [2, 384], strides = [1, 1]} : vector<2x512xf32> to vector<2x384xf32>
    %cst_30 = arith.constant 5.000000e-01 : f32
    %71 = vector.broadcast %cst_30 : f32 to vector<2x384xf32>
    %72 = arith.mulf %71, %70 : vector<2x384xf32>
    %73 = math.tanh %72 : vector<2x384xf32>
    %cst_31 = arith.constant 5.000000e-01 : f32
    %74 = vector.broadcast %cst_31 : f32 to vector<2x384xf32>
    %75 = arith.mulf %74, %73 : vector<2x384xf32>
    %cst_32 = arith.constant 5.000000e-01 : f32
    %76 = vector.broadcast %cst_32 : f32 to vector<2x384xf32>
    %77 = arith.addf %75, %76 : vector<2x384xf32>
    %78 = vector.extract_strided_slice %69 {offsets = [0, 384], sizes = [2, 128], strides = [1, 1]} : vector<2x512xf32> to vector<2x128xf32>
    %79 = math.tanh %78 : vector<2x128xf32>
    %80 = vector.extract_strided_slice %77 {offsets = [0, 0], sizes = [2, 128], strides = [1, 1]} : vector<2x384xf32> to vector<2x128xf32>
    %81 = vector.extract_strided_slice %77 {offsets = [0, 128], sizes = [2, 128], strides = [1, 1]} : vector<2x384xf32> to vector<2x128xf32>
    %82 = vector.extract_strided_slice %77 {offsets = [0, 256], sizes = [2, 128], strides = [1, 1]} : vector<2x384xf32> to vector<2x128xf32>
    %83 = arith.mulf %81, %32 : vector<2x128xf32>
    %84 = arith.mulf %80, %79 : vector<2x128xf32>
    %85 = arith.addf %83, %84 : vector<2x128xf32>
    %86 = math.tanh %85 : vector<2x128xf32>
    %87 = arith.mulf %82, %86 : vector<2x128xf32>
    %c7_i32_33 = arith.constant 7 : i32
    %88 = arith.subi %c7_i32_33, %c1_i32 : i32
    %89 = arith.index_cast %88 : i32 to index
    %c0_34 = arith.constant 0 : index
    %c0_35 = arith.constant 0 : index
    %90 = vector.load %arg2[%89, %c0_34, %c0_35] : memref<8x2x512xbf16, #tpu.memory_space<vmem>>, vector<1x2x512xbf16>
    %91 = vector.shape_cast %90 : vector<1x2x512xbf16> to vector<2x512xbf16>
    %92 = arith.truncf %60 : vector<2x128xf32> to vector<2x128xbf16>
    %cst_36 = arith.constant dense<0.000000e+00> : vector<2x512xf32>
    %93 = tpu.matmul %92, %4, %cst_36 {dimension_numbers = #tpu.dot_dimension_numbers<[1], [0], [0], [1], [0, 0, 1, 1], [], []>} : vector<2x128xbf16>, vector<128x512xbf16>, vector<2x512xf32> -> vector<2x512xf32>
    %94 = arith.extf %91 : vector<2x512xbf16> to vector<2x512xf32>
    %95 = arith.addf %93, %94 : vector<2x512xf32>
    %96 = vector.extract_strided_slice %95 {offsets = [0, 0], sizes = [2, 384], strides = [1, 1]} : vector<2x512xf32> to vector<2x384xf32>
    %cst_37 = arith.constant 5.000000e-01 : f32
    %97 = vector.broadcast %cst_37 : f32 to vector<2x384xf32>
    %98 = arith.mulf %97, %96 : vector<2x384xf32>
    %99 = math.tanh %98 : vector<2x384xf32>
    %cst_38 = arith.constant 5.000000e-01 : f32
    %100 = vector.broadcast %cst_38 : f32 to vector<2x384xf32>
    %101 = arith.mulf %100, %99 : vector<2x384xf32>
    %cst_39 = arith.constant 5.000000e-01 : f32
    %102 = vector.broadcast %cst_39 : f32 to vector<2x384xf32>
    %103 = arith.addf %101, %102 : vector<2x384xf32>
    %104 = vector.extract_strided_slice %95 {offsets = [0, 384], sizes = [2, 128], strides = [1, 1]} : vector<2x512xf32> to vector<2x128xf32>
    %105 = math.tanh %104 : vector<2x128xf32>
    %106 = vector.extract_strided_slice %103 {offsets = [0, 0], sizes = [2, 128], strides = [1, 1]} : vector<2x384xf32> to vector<2x128xf32>
    %107 = vector.extract_strided_slice %103 {offsets = [0, 128], sizes = [2, 128], strides = [1, 1]} : vector<2x384xf32> to vector<2x128xf32>
    %108 = vector.extract_strided_slice %103 {offsets = [0, 256], sizes = [2, 128], strides = [1, 1]} : vector<2x384xf32> to vector<2x128xf32>
    %109 = arith.mulf %107, %58 : vector<2x128xf32>
    %110 = arith.mulf %106, %105 : vector<2x128xf32>
    %111 = arith.addf %109, %110 : vector<2x128xf32>
    %112 = math.tanh %111 : vector<2x128xf32>
    %113 = arith.mulf %108, %112 : vector<2x128xf32>
    %c0_i32_40 = arith.constant 0 : i32
    %114 = arith.cmpi eq, %c1_i32, %c0_i32_40 : i32
    %115 = arith.select %114, %113, %62 : vector<2x128xf32>
    %c2_i32 = arith.constant 2 : i32
    %116 = arith.index_cast %c2_i32 : i32 to index
    %c0_41 = arith.constant 0 : index
    %c0_42 = arith.constant 0 : index
    %117 = vector.load %arg1[%116, %c0_41, %c0_42] : memref<8x2x512xbf16, #tpu.memory_space<vmem>>, vector<1x2x512xbf16>
    %118 = vector.shape_cast %117 : vector<1x2x512xbf16> to vector<2x512xbf16>
    %119 = arith.truncf %87 : vector<2x128xf32> to vector<2x128xbf16>
    %cst_43 = arith.constant dense<0.000000e+00> : vector<2x512xf32>
    %120 = tpu.matmul %119, %3, %cst_43 {dimension_numbers = #tpu.dot_dimension_numbers<[1], [0], [0], [1], [0, 0, 1, 1], [], []>} : vector<2x128xbf16>, vector<128x512xbf16>, vector<2x512xf32> -> vector<2x512xf32>
    %121 = arith.extf %118 : vector<2x512xbf16> to vector<2x512xf32>
    %122 = arith.addf %120, %121 : vector<2x512xf32>
    %123 = vector.extract_strided_slice %122 {offsets = [0, 0], sizes = [2, 384], strides = [1, 1]} : vector<2x512xf32> to vector<2x384xf32>
    %cst_44 = arith.constant 5.000000e-01 : f32
    %124 = vector.broadcast %cst_44 : f32 to vector<2x384xf32>
    %125 = arith.mulf %124, %123 : vector<2x384xf32>
    %126 = math.tanh %125 : vector<2x384xf32>
    %cst_45 = arith.constant 5.000000e-01 : f32
    %127 = vector.broadcast %cst_45 : f32 to vector<2x384xf32>
    %128 = arith.mulf %127, %126 : vector<2x384xf32>
    %cst_46 = arith.constant 5.000000e-01 : f32
    %129 = vector.broadcast %cst_46 : f32 to vector<2x384xf32>
    %130 = arith.addf %128, %129 : vector<2x384xf32>
    %131 = vector.extract_strided_slice %122 {offsets = [0, 384], sizes = [2, 128], strides = [1, 1]} : vector<2x512xf32> to vector<2x128xf32>
    %132 = math.tanh %131 : vector<2x128xf32>
    %133 = vector.extract_strided_slice %130 {offsets = [0, 0], sizes = [2, 128], strides = [1, 1]} : vector<2x384xf32> to vector<2x128xf32>
    %134 = vector.extract_strided_slice %130 {offsets = [0, 128], sizes = [2, 128], strides = [1, 1]} : vector<2x384xf32> to vector<2x128xf32>
    %135 = vector.extract_strided_slice %130 {offsets = [0, 256], sizes = [2, 128], strides = [1, 1]} : vector<2x384xf32> to vector<2x128xf32>
    %136 = arith.mulf %134, %85 : vector<2x128xf32>
    %137 = arith.mulf %133, %132 : vector<2x128xf32>
    %138 = arith.addf %136, %137 : vector<2x128xf32>
    %139 = math.tanh %138 : vector<2x128xf32>
    %140 = arith.mulf %135, %139 : vector<2x128xf32>
    %c7_i32_47 = arith.constant 7 : i32
    %141 = arith.subi %c7_i32_47, %c2_i32 : i32
    %142 = arith.index_cast %141 : i32 to index
    %c0_48 = arith.constant 0 : index
    %c0_49 = arith.constant 0 : index
    %143 = vector.load %arg2[%142, %c0_48, %c0_49] : memref<8x2x512xbf16, #tpu.memory_space<vmem>>, vector<1x2x512xbf16>
    %144 = vector.shape_cast %143 : vector<1x2x512xbf16> to vector<2x512xbf16>
    %145 = arith.truncf %113 : vector<2x128xf32> to vector<2x128xbf16>
    %cst_50 = arith.constant dense<0.000000e+00> : vector<2x512xf32>
    %146 = tpu.matmul %145, %4, %cst_50 {dimension_numbers = #tpu.dot_dimension_numbers<[1], [0], [0], [1], [0, 0, 1, 1], [], []>} : vector<2x128xbf16>, vector<128x512xbf16>, vector<2x512xf32> -> vector<2x512xf32>
    %147 = arith.extf %144 : vector<2x512xbf16> to vector<2x512xf32>
    %148 = arith.addf %146, %147 : vector<2x512xf32>
    %149 = vector.extract_strided_slice %148 {offsets = [0, 0], sizes = [2, 384], strides = [1, 1]} : vector<2x512xf32> to vector<2x384xf32>
    %cst_51 = arith.constant 5.000000e-01 : f32
    %150 = vector.broadcast %cst_51 : f32 to vector<2x384xf32>
    %151 = arith.mulf %150, %149 : vector<2x384xf32>
    %152 = math.tanh %151 : vector<2x384xf32>
    %cst_52 = arith.constant 5.000000e-01 : f32
    %153 = vector.broadcast %cst_52 : f32 to vector<2x384xf32>
    %154 = arith.mulf %153, %152 : vector<2x384xf32>
    %cst_53 = arith.constant 5.000000e-01 : f32
    %155 = vector.broadcast %cst_53 : f32 to vector<2x384xf32>
    %156 = arith.addf %154, %155 : vector<2x384xf32>
    %157 = vector.extract_strided_slice %148 {offsets = [0, 384], sizes = [2, 128], strides = [1, 1]} : vector<2x512xf32> to vector<2x128xf32>
    %158 = math.tanh %157 : vector<2x128xf32>
    %159 = vector.extract_strided_slice %156 {offsets = [0, 0], sizes = [2, 128], strides = [1, 1]} : vector<2x384xf32> to vector<2x128xf32>
    %160 = vector.extract_strided_slice %156 {offsets = [0, 128], sizes = [2, 128], strides = [1, 1]} : vector<2x384xf32> to vector<2x128xf32>
    %161 = vector.extract_strided_slice %156 {offsets = [0, 256], sizes = [2, 128], strides = [1, 1]} : vector<2x384xf32> to vector<2x128xf32>
    %162 = arith.mulf %160, %111 : vector<2x128xf32>
    %163 = arith.mulf %159, %158 : vector<2x128xf32>
    %164 = arith.addf %162, %163 : vector<2x128xf32>
    %165 = math.tanh %164 : vector<2x128xf32>
    %166 = arith.mulf %161, %165 : vector<2x128xf32>
    %c0_i32_54 = arith.constant 0 : i32
    %167 = arith.cmpi eq, %c2_i32, %c0_i32_54 : i32
    %168 = arith.select %167, %166, %115 : vector<2x128xf32>
    %c3_i32 = arith.constant 3 : i32
    %169 = arith.index_cast %c3_i32 : i32 to index
    %c0_55 = arith.constant 0 : index
    %c0_56 = arith.constant 0 : index
    %170 = vector.load %arg1[%169, %c0_55, %c0_56] : memref<8x2x512xbf16, #tpu.memory_space<vmem>>, vector<1x2x512xbf16>
    %171 = vector.shape_cast %170 : vector<1x2x512xbf16> to vector<2x512xbf16>
    %172 = arith.truncf %140 : vector<2x128xf32> to vector<2x128xbf16>
    %cst_57 = arith.constant dense<0.000000e+00> : vector<2x512xf32>
    %173 = tpu.matmul %172, %3, %cst_57 {dimension_numbers = #tpu.dot_dimension_numbers<[1], [0], [0], [1], [0, 0, 1, 1], [], []>} : vector<2x128xbf16>, vector<128x512xbf16>, vector<2x512xf32> -> vector<2x512xf32>
    %174 = arith.extf %171 : vector<2x512xbf16> to vector<2x512xf32>
    %175 = arith.addf %173, %174 : vector<2x512xf32>
    %176 = vector.extract_strided_slice %175 {offsets = [0, 0], sizes = [2, 384], strides = [1, 1]} : vector<2x512xf32> to vector<2x384xf32>
    %cst_58 = arith.constant 5.000000e-01 : f32
    %177 = vector.broadcast %cst_58 : f32 to vector<2x384xf32>
    %178 = arith.mulf %177, %176 : vector<2x384xf32>
    %179 = math.tanh %178 : vector<2x384xf32>
    %cst_59 = arith.constant 5.000000e-01 : f32
    %180 = vector.broadcast %cst_59 : f32 to vector<2x384xf32>
    %181 = arith.mulf %180, %179 : vector<2x384xf32>
    %cst_60 = arith.constant 5.000000e-01 : f32
    %182 = vector.broadcast %cst_60 : f32 to vector<2x384xf32>
    %183 = arith.addf %181, %182 : vector<2x384xf32>
    %184 = vector.extract_strided_slice %175 {offsets = [0, 384], sizes = [2, 128], strides = [1, 1]} : vector<2x512xf32> to vector<2x128xf32>
    %185 = math.tanh %184 : vector<2x128xf32>
    %186 = vector.extract_strided_slice %183 {offsets = [0, 0], sizes = [2, 128], strides = [1, 1]} : vector<2x384xf32> to vector<2x128xf32>
    %187 = vector.extract_strided_slice %183 {offsets = [0, 128], sizes = [2, 128], strides = [1, 1]} : vector<2x384xf32> to vector<2x128xf32>
    %188 = vector.extract_strided_slice %183 {offsets = [0, 256], sizes = [2, 128], strides = [1, 1]} : vector<2x384xf32> to vector<2x128xf32>
    %189 = arith.mulf %187, %138 : vector<2x128xf32>
    %190 = arith.mulf %186, %185 : vector<2x128xf32>
    %191 = arith.addf %189, %190 : vector<2x128xf32>
    %192 = math.tanh %191 : vector<2x128xf32>
    %193 = arith.mulf %188, %192 : vector<2x128xf32>
    %c7_i32_61 = arith.constant 7 : i32
    %194 = arith.subi %c7_i32_61, %c3_i32 : i32
    %195 = arith.index_cast %194 : i32 to index
    %c0_62 = arith.constant 0 : index
    %c0_63 = arith.constant 0 : index
    %196 = vector.load %arg2[%195, %c0_62, %c0_63] : memref<8x2x512xbf16, #tpu.memory_space<vmem>>, vector<1x2x512xbf16>
    %197 = vector.shape_cast %196 : vector<1x2x512xbf16> to vector<2x512xbf16>
    %198 = arith.truncf %166 : vector<2x128xf32> to vector<2x128xbf16>
    %cst_64 = arith.constant dense<0.000000e+00> : vector<2x512xf32>
    %199 = tpu.matmul %198, %4, %cst_64 {dimension_numbers = #tpu.dot_dimension_numbers<[1], [0], [0], [1], [0, 0, 1, 1], [], []>} : vector<2x128xbf16>, vector<128x512xbf16>, vector<2x512xf32> -> vector<2x512xf32>
    %200 = arith.extf %197 : vector<2x512xbf16> to vector<2x512xf32>
    %201 = arith.addf %199, %200 : vector<2x512xf32>
    %202 = vector.extract_strided_slice %201 {offsets = [0, 0], sizes = [2, 384], strides = [1, 1]} : vector<2x512xf32> to vector<2x384xf32>
    %cst_65 = arith.constant 5.000000e-01 : f32
    %203 = vector.broadcast %cst_65 : f32 to vector<2x384xf32>
    %204 = arith.mulf %203, %202 : vector<2x384xf32>
    %205 = math.tanh %204 : vector<2x384xf32>
    %cst_66 = arith.constant 5.000000e-01 : f32
    %206 = vector.broadcast %cst_66 : f32 to vector<2x384xf32>
    %207 = arith.mulf %206, %205 : vector<2x384xf32>
    %cst_67 = arith.constant 5.000000e-01 : f32
    %208 = vector.broadcast %cst_67 : f32 to vector<2x384xf32>
    %209 = arith.addf %207, %208 : vector<2x384xf32>
    %210 = vector.extract_strided_slice %201 {offsets = [0, 384], sizes = [2, 128], strides = [1, 1]} : vector<2x512xf32> to vector<2x128xf32>
    %211 = math.tanh %210 : vector<2x128xf32>
    %212 = vector.extract_strided_slice %209 {offsets = [0, 0], sizes = [2, 128], strides = [1, 1]} : vector<2x384xf32> to vector<2x128xf32>
    %213 = vector.extract_strided_slice %209 {offsets = [0, 128], sizes = [2, 128], strides = [1, 1]} : vector<2x384xf32> to vector<2x128xf32>
    %214 = vector.extract_strided_slice %209 {offsets = [0, 256], sizes = [2, 128], strides = [1, 1]} : vector<2x384xf32> to vector<2x128xf32>
    %215 = arith.mulf %213, %164 : vector<2x128xf32>
    %216 = arith.mulf %212, %211 : vector<2x128xf32>
    %217 = arith.addf %215, %216 : vector<2x128xf32>
    %218 = math.tanh %217 : vector<2x128xf32>
    %219 = arith.mulf %214, %218 : vector<2x128xf32>
    %c0_i32_68 = arith.constant 0 : i32
    %220 = arith.cmpi eq, %c3_i32, %c0_i32_68 : i32
    %221 = arith.select %220, %219, %168 : vector<2x128xf32>
    %c4_i32 = arith.constant 4 : i32
    %222 = arith.index_cast %c4_i32 : i32 to index
    %c0_69 = arith.constant 0 : index
    %c0_70 = arith.constant 0 : index
    %223 = vector.load %arg1[%222, %c0_69, %c0_70] : memref<8x2x512xbf16, #tpu.memory_space<vmem>>, vector<1x2x512xbf16>
    %224 = vector.shape_cast %223 : vector<1x2x512xbf16> to vector<2x512xbf16>
    %225 = arith.truncf %193 : vector<2x128xf32> to vector<2x128xbf16>
    %cst_71 = arith.constant dense<0.000000e+00> : vector<2x512xf32>
    %226 = tpu.matmul %225, %3, %cst_71 {dimension_numbers = #tpu.dot_dimension_numbers<[1], [0], [0], [1], [0, 0, 1, 1], [], []>} : vector<2x128xbf16>, vector<128x512xbf16>, vector<2x512xf32> -> vector<2x512xf32>
    %227 = arith.extf %224 : vector<2x512xbf16> to vector<2x512xf32>
    %228 = arith.addf %226, %227 : vector<2x512xf32>
    %229 = vector.extract_strided_slice %228 {offsets = [0, 0], sizes = [2, 384], strides = [1, 1]} : vector<2x512xf32> to vector<2x384xf32>
    %cst_72 = arith.constant 5.000000e-01 : f32
    %230 = vector.broadcast %cst_72 : f32 to vector<2x384xf32>
    %231 = arith.mulf %230, %229 : vector<2x384xf32>
    %232 = math.tanh %231 : vector<2x384xf32>
    %cst_73 = arith.constant 5.000000e-01 : f32
    %233 = vector.broadcast %cst_73 : f32 to vector<2x384xf32>
    %234 = arith.mulf %233, %232 : vector<2x384xf32>
    %cst_74 = arith.constant 5.000000e-01 : f32
    %235 = vector.broadcast %cst_74 : f32 to vector<2x384xf32>
    %236 = arith.addf %234, %235 : vector<2x384xf32>
    %237 = vector.extract_strided_slice %228 {offsets = [0, 384], sizes = [2, 128], strides = [1, 1]} : vector<2x512xf32> to vector<2x128xf32>
    %238 = math.tanh %237 : vector<2x128xf32>
    %239 = vector.extract_strided_slice %236 {offsets = [0, 0], sizes = [2, 128], strides = [1, 1]} : vector<2x384xf32> to vector<2x128xf32>
    %240 = vector.extract_strided_slice %236 {offsets = [0, 128], sizes = [2, 128], strides = [1, 1]} : vector<2x384xf32> to vector<2x128xf32>
    %241 = vector.extract_strided_slice %236 {offsets = [0, 256], sizes = [2, 128], strides = [1, 1]} : vector<2x384xf32> to vector<2x128xf32>
    %242 = arith.mulf %240, %191 : vector<2x128xf32>
    %243 = arith.mulf %239, %238 : vector<2x128xf32>
    %244 = arith.addf %242, %243 : vector<2x128xf32>
    %245 = math.tanh %244 : vector<2x128xf32>
    %246 = arith.mulf %241, %245 : vector<2x128xf32>
    %c7_i32_75 = arith.constant 7 : i32
    %247 = arith.subi %c7_i32_75, %c4_i32 : i32
    %248 = arith.index_cast %247 : i32 to index
    %c0_76 = arith.constant 0 : index
    %c0_77 = arith.constant 0 : index
    %249 = vector.load %arg2[%248, %c0_76, %c0_77] : memref<8x2x512xbf16, #tpu.memory_space<vmem>>, vector<1x2x512xbf16>
    %250 = vector.shape_cast %249 : vector<1x2x512xbf16> to vector<2x512xbf16>
    %251 = arith.truncf %219 : vector<2x128xf32> to vector<2x128xbf16>
    %cst_78 = arith.constant dense<0.000000e+00> : vector<2x512xf32>
    %252 = tpu.matmul %251, %4, %cst_78 {dimension_numbers = #tpu.dot_dimension_numbers<[1], [0], [0], [1], [0, 0, 1, 1], [], []>} : vector<2x128xbf16>, vector<128x512xbf16>, vector<2x512xf32> -> vector<2x512xf32>
    %253 = arith.extf %250 : vector<2x512xbf16> to vector<2x512xf32>
    %254 = arith.addf %252, %253 : vector<2x512xf32>
    %255 = vector.extract_strided_slice %254 {offsets = [0, 0], sizes = [2, 384], strides = [1, 1]} : vector<2x512xf32> to vector<2x384xf32>
    %cst_79 = arith.constant 5.000000e-01 : f32
    %256 = vector.broadcast %cst_79 : f32 to vector<2x384xf32>
    %257 = arith.mulf %256, %255 : vector<2x384xf32>
    %258 = math.tanh %257 : vector<2x384xf32>
    %cst_80 = arith.constant 5.000000e-01 : f32
    %259 = vector.broadcast %cst_80 : f32 to vector<2x384xf32>
    %260 = arith.mulf %259, %258 : vector<2x384xf32>
    %cst_81 = arith.constant 5.000000e-01 : f32
    %261 = vector.broadcast %cst_81 : f32 to vector<2x384xf32>
    %262 = arith.addf %260, %261 : vector<2x384xf32>
    %263 = vector.extract_strided_slice %254 {offsets = [0, 384], sizes = [2, 128], strides = [1, 1]} : vector<2x512xf32> to vector<2x128xf32>
    %264 = math.tanh %263 : vector<2x128xf32>
    %265 = vector.extract_strided_slice %262 {offsets = [0, 0], sizes = [2, 128], strides = [1, 1]} : vector<2x384xf32> to vector<2x128xf32>
    %266 = vector.extract_strided_slice %262 {offsets = [0, 128], sizes = [2, 128], strides = [1, 1]} : vector<2x384xf32> to vector<2x128xf32>
    %267 = vector.extract_strided_slice %262 {offsets = [0, 256], sizes = [2, 128], strides = [1, 1]} : vector<2x384xf32> to vector<2x128xf32>
    %268 = arith.mulf %266, %217 : vector<2x128xf32>
    %269 = arith.mulf %265, %264 : vector<2x128xf32>
    %270 = arith.addf %268, %269 : vector<2x128xf32>
    %271 = math.tanh %270 : vector<2x128xf32>
    %272 = arith.mulf %267, %271 : vector<2x128xf32>
    %c0_i32_82 = arith.constant 0 : i32
    %273 = arith.cmpi eq, %c4_i32, %c0_i32_82 : i32
    %274 = arith.select %273, %272, %221 : vector<2x128xf32>
    %c5_i32 = arith.constant 5 : i32
    %275 = arith.index_cast %c5_i32 : i32 to index
    %c0_83 = arith.constant 0 : index
    %c0_84 = arith.constant 0 : index
    %276 = vector.load %arg1[%275, %c0_83, %c0_84] : memref<8x2x512xbf16, #tpu.memory_space<vmem>>, vector<1x2x512xbf16>
    %277 = vector.shape_cast %276 : vector<1x2x512xbf16> to vector<2x512xbf16>
    %278 = arith.truncf %246 : vector<2x128xf32> to vector<2x128xbf16>
    %cst_85 = arith.constant dense<0.000000e+00> : vector<2x512xf32>
    %279 = tpu.matmul %278, %3, %cst_85 {dimension_numbers = #tpu.dot_dimension_numbers<[1], [0], [0], [1], [0, 0, 1, 1], [], []>} : vector<2x128xbf16>, vector<128x512xbf16>, vector<2x512xf32> -> vector<2x512xf32>
    %280 = arith.extf %277 : vector<2x512xbf16> to vector<2x512xf32>
    %281 = arith.addf %279, %280 : vector<2x512xf32>
    %282 = vector.extract_strided_slice %281 {offsets = [0, 0], sizes = [2, 384], strides = [1, 1]} : vector<2x512xf32> to vector<2x384xf32>
    %cst_86 = arith.constant 5.000000e-01 : f32
    %283 = vector.broadcast %cst_86 : f32 to vector<2x384xf32>
    %284 = arith.mulf %283, %282 : vector<2x384xf32>
    %285 = math.tanh %284 : vector<2x384xf32>
    %cst_87 = arith.constant 5.000000e-01 : f32
    %286 = vector.broadcast %cst_87 : f32 to vector<2x384xf32>
    %287 = arith.mulf %286, %285 : vector<2x384xf32>
    %cst_88 = arith.constant 5.000000e-01 : f32
    %288 = vector.broadcast %cst_88 : f32 to vector<2x384xf32>
    %289 = arith.addf %287, %288 : vector<2x384xf32>
    %290 = vector.extract_strided_slice %281 {offsets = [0, 384], sizes = [2, 128], strides = [1, 1]} : vector<2x512xf32> to vector<2x128xf32>
    %291 = math.tanh %290 : vector<2x128xf32>
    %292 = vector.extract_strided_slice %289 {offsets = [0, 0], sizes = [2, 128], strides = [1, 1]} : vector<2x384xf32> to vector<2x128xf32>
    %293 = vector.extract_strided_slice %289 {offsets = [0, 128], sizes = [2, 128], strides = [1, 1]} : vector<2x384xf32> to vector<2x128xf32>
    %294 = vector.extract_strided_slice %289 {offsets = [0, 256], sizes = [2, 128], strides = [1, 1]} : vector<2x384xf32> to vector<2x128xf32>
    %295 = arith.mulf %293, %244 : vector<2x128xf32>
    %296 = arith.mulf %292, %291 : vector<2x128xf32>
    %297 = arith.addf %295, %296 : vector<2x128xf32>
    %298 = math.tanh %297 : vector<2x128xf32>
    %299 = arith.mulf %294, %298 : vector<2x128xf32>
    %c7_i32_89 = arith.constant 7 : i32
    %300 = arith.subi %c7_i32_89, %c5_i32 : i32
    %301 = arith.index_cast %300 : i32 to index
    %c0_90 = arith.constant 0 : index
    %c0_91 = arith.constant 0 : index
    %302 = vector.load %arg2[%301, %c0_90, %c0_91] : memref<8x2x512xbf16, #tpu.memory_space<vmem>>, vector<1x2x512xbf16>
    %303 = vector.shape_cast %302 : vector<1x2x512xbf16> to vector<2x512xbf16>
    %304 = arith.truncf %272 : vector<2x128xf32> to vector<2x128xbf16>
    %cst_92 = arith.constant dense<0.000000e+00> : vector<2x512xf32>
    %305 = tpu.matmul %304, %4, %cst_92 {dimension_numbers = #tpu.dot_dimension_numbers<[1], [0], [0], [1], [0, 0, 1, 1], [], []>} : vector<2x128xbf16>, vector<128x512xbf16>, vector<2x512xf32> -> vector<2x512xf32>
    %306 = arith.extf %303 : vector<2x512xbf16> to vector<2x512xf32>
    %307 = arith.addf %305, %306 : vector<2x512xf32>
    %308 = vector.extract_strided_slice %307 {offsets = [0, 0], sizes = [2, 384], strides = [1, 1]} : vector<2x512xf32> to vector<2x384xf32>
    %cst_93 = arith.constant 5.000000e-01 : f32
    %309 = vector.broadcast %cst_93 : f32 to vector<2x384xf32>
    %310 = arith.mulf %309, %308 : vector<2x384xf32>
    %311 = math.tanh %310 : vector<2x384xf32>
    %cst_94 = arith.constant 5.000000e-01 : f32
    %312 = vector.broadcast %cst_94 : f32 to vector<2x384xf32>
    %313 = arith.mulf %312, %311 : vector<2x384xf32>
    %cst_95 = arith.constant 5.000000e-01 : f32
    %314 = vector.broadcast %cst_95 : f32 to vector<2x384xf32>
    %315 = arith.addf %313, %314 : vector<2x384xf32>
    %316 = vector.extract_strided_slice %307 {offsets = [0, 384], sizes = [2, 128], strides = [1, 1]} : vector<2x512xf32> to vector<2x128xf32>
    %317 = math.tanh %316 : vector<2x128xf32>
    %318 = vector.extract_strided_slice %315 {offsets = [0, 0], sizes = [2, 128], strides = [1, 1]} : vector<2x384xf32> to vector<2x128xf32>
    %319 = vector.extract_strided_slice %315 {offsets = [0, 128], sizes = [2, 128], strides = [1, 1]} : vector<2x384xf32> to vector<2x128xf32>
    %320 = vector.extract_strided_slice %315 {offsets = [0, 256], sizes = [2, 128], strides = [1, 1]} : vector<2x384xf32> to vector<2x128xf32>
    %321 = arith.mulf %319, %270 : vector<2x128xf32>
    %322 = arith.mulf %318, %317 : vector<2x128xf32>
    %323 = arith.addf %321, %322 : vector<2x128xf32>
    %324 = math.tanh %323 : vector<2x128xf32>
    %325 = arith.mulf %320, %324 : vector<2x128xf32>
    %c0_i32_96 = arith.constant 0 : i32
    %326 = arith.cmpi eq, %c5_i32, %c0_i32_96 : i32
    %327 = arith.select %326, %325, %274 : vector<2x128xf32>
    %c6_i32 = arith.constant 6 : i32
    %328 = arith.index_cast %c6_i32 : i32 to index
    %c0_97 = arith.constant 0 : index
    %c0_98 = arith.constant 0 : index
    %329 = vector.load %arg1[%328, %c0_97, %c0_98] : memref<8x2x512xbf16, #tpu.memory_space<vmem>>, vector<1x2x512xbf16>
    %330 = vector.shape_cast %329 : vector<1x2x512xbf16> to vector<2x512xbf16>
    %331 = arith.truncf %299 : vector<2x128xf32> to vector<2x128xbf16>
    %cst_99 = arith.constant dense<0.000000e+00> : vector<2x512xf32>
    %332 = tpu.matmul %331, %3, %cst_99 {dimension_numbers = #tpu.dot_dimension_numbers<[1], [0], [0], [1], [0, 0, 1, 1], [], []>} : vector<2x128xbf16>, vector<128x512xbf16>, vector<2x512xf32> -> vector<2x512xf32>
    %333 = arith.extf %330 : vector<2x512xbf16> to vector<2x512xf32>
    %334 = arith.addf %332, %333 : vector<2x512xf32>
    %335 = vector.extract_strided_slice %334 {offsets = [0, 0], sizes = [2, 384], strides = [1, 1]} : vector<2x512xf32> to vector<2x384xf32>
    %cst_100 = arith.constant 5.000000e-01 : f32
    %336 = vector.broadcast %cst_100 : f32 to vector<2x384xf32>
    %337 = arith.mulf %336, %335 : vector<2x384xf32>
    %338 = math.tanh %337 : vector<2x384xf32>
    %cst_101 = arith.constant 5.000000e-01 : f32
    %339 = vector.broadcast %cst_101 : f32 to vector<2x384xf32>
    %340 = arith.mulf %339, %338 : vector<2x384xf32>
    %cst_102 = arith.constant 5.000000e-01 : f32
    %341 = vector.broadcast %cst_102 : f32 to vector<2x384xf32>
    %342 = arith.addf %340, %341 : vector<2x384xf32>
    %343 = vector.extract_strided_slice %334 {offsets = [0, 384], sizes = [2, 128], strides = [1, 1]} : vector<2x512xf32> to vector<2x128xf32>
    %344 = math.tanh %343 : vector<2x128xf32>
    %345 = vector.extract_strided_slice %342 {offsets = [0, 0], sizes = [2, 128], strides = [1, 1]} : vector<2x384xf32> to vector<2x128xf32>
    %346 = vector.extract_strided_slice %342 {offsets = [0, 128], sizes = [2, 128], strides = [1, 1]} : vector<2x384xf32> to vector<2x128xf32>
    %347 = vector.extract_strided_slice %342 {offsets = [0, 256], sizes = [2, 128], strides = [1, 1]} : vector<2x384xf32> to vector<2x128xf32>
    %348 = arith.mulf %346, %297 : vector<2x128xf32>
    %349 = arith.mulf %345, %344 : vector<2x128xf32>
    %350 = arith.addf %348, %349 : vector<2x128xf32>
    %351 = math.tanh %350 : vector<2x128xf32>
    %352 = arith.mulf %347, %351 : vector<2x128xf32>
    %c7_i32_103 = arith.constant 7 : i32
    %353 = arith.subi %c7_i32_103, %c6_i32 : i32
    %354 = arith.index_cast %353 : i32 to index
    %c0_104 = arith.constant 0 : index
    %c0_105 = arith.constant 0 : index
    %355 = vector.load %arg2[%354, %c0_104, %c0_105] : memref<8x2x512xbf16, #tpu.memory_space<vmem>>, vector<1x2x512xbf16>
    %356 = vector.shape_cast %355 : vector<1x2x512xbf16> to vector<2x512xbf16>
    %357 = arith.truncf %325 : vector<2x128xf32> to vector<2x128xbf16>
    %cst_106 = arith.constant dense<0.000000e+00> : vector<2x512xf32>
    %358 = tpu.matmul %357, %4, %cst_106 {dimension_numbers = #tpu.dot_dimension_numbers<[1], [0], [0], [1], [0, 0, 1, 1], [], []>} : vector<2x128xbf16>, vector<128x512xbf16>, vector<2x512xf32> -> vector<2x512xf32>
    %359 = arith.extf %356 : vector<2x512xbf16> to vector<2x512xf32>
    %360 = arith.addf %358, %359 : vector<2x512xf32>
    %361 = vector.extract_strided_slice %360 {offsets = [0, 0], sizes = [2, 384], strides = [1, 1]} : vector<2x512xf32> to vector<2x384xf32>
    %cst_107 = arith.constant 5.000000e-01 : f32
    %362 = vector.broadcast %cst_107 : f32 to vector<2x384xf32>
    %363 = arith.mulf %362, %361 : vector<2x384xf32>
    %364 = math.tanh %363 : vector<2x384xf32>
    %cst_108 = arith.constant 5.000000e-01 : f32
    %365 = vector.broadcast %cst_108 : f32 to vector<2x384xf32>
    %366 = arith.mulf %365, %364 : vector<2x384xf32>
    %cst_109 = arith.constant 5.000000e-01 : f32
    %367 = vector.broadcast %cst_109 : f32 to vector<2x384xf32>
    %368 = arith.addf %366, %367 : vector<2x384xf32>
    %369 = vector.extract_strided_slice %360 {offsets = [0, 384], sizes = [2, 128], strides = [1, 1]} : vector<2x512xf32> to vector<2x128xf32>
    %370 = math.tanh %369 : vector<2x128xf32>
    %371 = vector.extract_strided_slice %368 {offsets = [0, 0], sizes = [2, 128], strides = [1, 1]} : vector<2x384xf32> to vector<2x128xf32>
    %372 = vector.extract_strided_slice %368 {offsets = [0, 128], sizes = [2, 128], strides = [1, 1]} : vector<2x384xf32> to vector<2x128xf32>
    %373 = vector.extract_strided_slice %368 {offsets = [0, 256], sizes = [2, 128], strides = [1, 1]} : vector<2x384xf32> to vector<2x128xf32>
    %374 = arith.mulf %372, %323 : vector<2x128xf32>
    %375 = arith.mulf %371, %370 : vector<2x128xf32>
    %376 = arith.addf %374, %375 : vector<2x128xf32>
    %377 = math.tanh %376 : vector<2x128xf32>
    %378 = arith.mulf %373, %377 : vector<2x128xf32>
    %c0_i32_110 = arith.constant 0 : i32
    %379 = arith.cmpi eq, %c6_i32, %c0_i32_110 : i32
    %380 = arith.select %379, %378, %327 : vector<2x128xf32>
    %c7_i32_111 = arith.constant 7 : i32
    %381 = arith.index_cast %c7_i32_111 : i32 to index
    %c0_112 = arith.constant 0 : index
    %c0_113 = arith.constant 0 : index
    %382 = vector.load %arg1[%381, %c0_112, %c0_113] : memref<8x2x512xbf16, #tpu.memory_space<vmem>>, vector<1x2x512xbf16>
    %383 = vector.shape_cast %382 : vector<1x2x512xbf16> to vector<2x512xbf16>
    %384 = arith.truncf %352 : vector<2x128xf32> to vector<2x128xbf16>
    %cst_114 = arith.constant dense<0.000000e+00> : vector<2x512xf32>
    %385 = tpu.matmul %384, %3, %cst_114 {dimension_numbers = #tpu.dot_dimension_numbers<[1], [0], [0], [1], [0, 0, 1, 1], [], []>} : vector<2x128xbf16>, vector<128x512xbf16>, vector<2x512xf32> -> vector<2x512xf32>
    %386 = arith.extf %383 : vector<2x512xbf16> to vector<2x512xf32>
    %387 = arith.addf %385, %386 : vector<2x512xf32>
    %388 = vector.extract_strided_slice %387 {offsets = [0, 0], sizes = [2, 384], strides = [1, 1]} : vector<2x512xf32> to vector<2x384xf32>
    %cst_115 = arith.constant 5.000000e-01 : f32
    %389 = vector.broadcast %cst_115 : f32 to vector<2x384xf32>
    %390 = arith.mulf %389, %388 : vector<2x384xf32>
    %391 = math.tanh %390 : vector<2x384xf32>
    %cst_116 = arith.constant 5.000000e-01 : f32
    %392 = vector.broadcast %cst_116 : f32 to vector<2x384xf32>
    %393 = arith.mulf %392, %391 : vector<2x384xf32>
    %cst_117 = arith.constant 5.000000e-01 : f32
    %394 = vector.broadcast %cst_117 : f32 to vector<2x384xf32>
    %395 = arith.addf %393, %394 : vector<2x384xf32>
    %396 = vector.extract_strided_slice %387 {offsets = [0, 384], sizes = [2, 128], strides = [1, 1]} : vector<2x512xf32> to vector<2x128xf32>
    %397 = math.tanh %396 : vector<2x128xf32>
    %398 = vector.extract_strided_slice %395 {offsets = [0, 0], sizes = [2, 128], strides = [1, 1]} : vector<2x384xf32> to vector<2x128xf32>
    %399 = vector.extract_strided_slice %395 {offsets = [0, 128], sizes = [2, 128], strides = [1, 1]} : vector<2x384xf32> to vector<2x128xf32>
    %400 = vector.extract_strided_slice %395 {offsets = [0, 256], sizes = [2, 128], strides = [1, 1]} : vector<2x384xf32> to vector<2x128xf32>
    %401 = arith.mulf %399, %350 : vector<2x128xf32>
    %402 = arith.mulf %398, %397 : vector<2x128xf32>
    %403 = arith.addf %401, %402 : vector<2x128xf32>
    %404 = math.tanh %403 : vector<2x128xf32>
    %405 = arith.mulf %400, %404 : vector<2x128xf32>
    %c7_i32_118 = arith.constant 7 : i32
    %406 = arith.subi %c7_i32_118, %c7_i32_111 : i32
    %407 = arith.index_cast %406 : i32 to index
    %c0_119 = arith.constant 0 : index
    %c0_120 = arith.constant 0 : index
    %408 = vector.load %arg2[%407, %c0_119, %c0_120] : memref<8x2x512xbf16, #tpu.memory_space<vmem>>, vector<1x2x512xbf16>
    %409 = vector.shape_cast %408 : vector<1x2x512xbf16> to vector<2x512xbf16>
    %410 = arith.truncf %378 : vector<2x128xf32> to vector<2x128xbf16>
    %cst_121 = arith.constant dense<0.000000e+00> : vector<2x512xf32>
    %411 = tpu.matmul %410, %4, %cst_121 {dimension_numbers = #tpu.dot_dimension_numbers<[1], [0], [0], [1], [0, 0, 1, 1], [], []>} : vector<2x128xbf16>, vector<128x512xbf16>, vector<2x512xf32> -> vector<2x512xf32>
    %412 = arith.extf %409 : vector<2x512xbf16> to vector<2x512xf32>
    %413 = arith.addf %411, %412 : vector<2x512xf32>
    %414 = vector.extract_strided_slice %413 {offsets = [0, 0], sizes = [2, 384], strides = [1, 1]} : vector<2x512xf32> to vector<2x384xf32>
    %cst_122 = arith.constant 5.000000e-01 : f32
    %415 = vector.broadcast %cst_122 : f32 to vector<2x384xf32>
    %416 = arith.mulf %415, %414 : vector<2x384xf32>
    %417 = math.tanh %416 : vector<2x384xf32>
    %cst_123 = arith.constant 5.000000e-01 : f32
    %418 = vector.broadcast %cst_123 : f32 to vector<2x384xf32>
    %419 = arith.mulf %418, %417 : vector<2x384xf32>
    %cst_124 = arith.constant 5.000000e-01 : f32
    %420 = vector.broadcast %cst_124 : f32 to vector<2x384xf32>
    %421 = arith.addf %419, %420 : vector<2x384xf32>
    %422 = vector.extract_strided_slice %413 {offsets = [0, 384], sizes = [2, 128], strides = [1, 1]} : vector<2x512xf32> to vector<2x128xf32>
    %423 = math.tanh %422 : vector<2x128xf32>
    %424 = vector.extract_strided_slice %421 {offsets = [0, 0], sizes = [2, 128], strides = [1, 1]} : vector<2x384xf32> to vector<2x128xf32>
    %425 = vector.extract_strided_slice %421 {offsets = [0, 128], sizes = [2, 128], strides = [1, 1]} : vector<2x384xf32> to vector<2x128xf32>
    %426 = vector.extract_strided_slice %421 {offsets = [0, 256], sizes = [2, 128], strides = [1, 1]} : vector<2x384xf32> to vector<2x128xf32>
    %427 = arith.mulf %425, %376 : vector<2x128xf32>
    %428 = arith.mulf %424, %423 : vector<2x128xf32>
    %429 = arith.addf %427, %428 : vector<2x128xf32>
    %430 = math.tanh %429 : vector<2x128xf32>
    %431 = arith.mulf %426, %430 : vector<2x128xf32>
    %c0_i32_125 = arith.constant 0 : i32
    %432 = arith.cmpi eq, %c7_i32_111, %c0_i32_125 : i32
    %433 = arith.select %432, %431, %380 : vector<2x128xf32>
    %c8_i32 = arith.constant 8 : i32
    %c0_126 = arith.constant 0 : index
    %c0_127 = arith.constant 0 : index
    %434 = vector.load %arg11[%c0_126, %c0_127] : memref<2x128xf32, #tpu.memory_space<vmem>>, vector<2x128xf32>
    tpu.vector_store %arg11[%c0_126, %c0_127], %405 {strides = array<i32>} : memref<2x128xf32, #tpu.memory_space<vmem>>, vector<2x128xf32>,
    %c0_128 = arith.constant 0 : index
    %c0_129 = arith.constant 0 : index
    %435 = vector.load %arg12[%c0_128, %c0_129] : memref<2x128xf32, #tpu.memory_space<vmem>>, vector<2x128xf32>
    tpu.vector_store %arg12[%c0_128, %c0_129], %403 {strides = array<i32>} : memref<2x128xf32, #tpu.memory_space<vmem>>, vector<2x128xf32>,
    %c0_130 = arith.constant 0 : index
    %c0_131 = arith.constant 0 : index
    %436 = vector.load %arg13[%c0_130, %c0_131] : memref<2x128xf32, #tpu.memory_space<vmem>>, vector<2x128xf32>
    tpu.vector_store %arg13[%c0_130, %c0_131], %431 {strides = array<i32>} : memref<2x128xf32, #tpu.memory_space<vmem>>, vector<2x128xf32>,
    %c0_132 = arith.constant 0 : index
    %c0_133 = arith.constant 0 : index
    %437 = vector.load %arg14[%c0_132, %c0_133] : memref<2x128xf32, #tpu.memory_space<vmem>>, vector<2x128xf32>
    tpu.vector_store %arg14[%c0_132, %c0_133], %429 {strides = array<i32>} : memref<2x128xf32, #tpu.memory_space<vmem>>, vector<2x128xf32>,
    %c0_i32_134 = arith.constant 0 : i32
    %438 = arith.cmpi eq, %arg0, %c0_i32_134 : i32
    %439 = arith.extui %438 : i1 to i32
    %c0_i32_135 = arith.constant 0 : i32
    %440 = arith.cmpi ne, %439, %c0_i32_135 : i32
    scf.if %440 {
      %c0_138 = arith.constant 0 : index
      %c0_139 = arith.constant 0 : index
      %444 = vector.load %arg15[%c0_138, %c0_139] : memref<2x128xf32, #tpu.memory_space<vmem>>, vector<2x128xf32>
      tpu.vector_store %arg15[%c0_138, %c0_139], %433 {strides = array<i32>} : memref<2x128xf32, #tpu.memory_space<vmem>>, vector<2x128xf32>,
    } else {
    }
    %c1_i32_136 = arith.constant 1 : i32
    %441 = arith.cmpi eq, %arg0, %c1_i32_136 : i32
    %442 = arith.extui %441 : i1 to i32
    %c0_i32_137 = arith.constant 0 : i32
    %443 = arith.cmpi ne, %442, %c0_i32_137 : i32
    scf.if %443 {
      %c0_138 = arith.constant 0 : index
      %c0_139 = arith.constant 0 : index
      %444 = vector.load %arg5[%c0_138, %c0_139] : memref<1x256xf32, #tpu.memory_space<vmem>>, vector<1x128xf32>
      %c0_140 = arith.constant 0 : index
      %c128 = arith.constant 128 : index
      %445 = vector.load %arg5[%c0_140, %c128] : memref<1x256xf32, #tpu.memory_space<vmem>>, vector<1x128xf32>
      %446 = vector.broadcast %444 : vector<1x128xf32> to vector<2x128xf32>
      %447 = arith.mulf %405, %446 : vector<2x128xf32>
      %cst_141 = arith.constant dense<0.000000e+00> : vector<2xf32>
      %448 = vector.multi_reduction <add>, %447, %cst_141 [1] : vector<2x128xf32> to vector<2xf32>
      %449 = vector.shape_cast %448 : vector<2xf32> to vector<2x1xf32>
      %c0_142 = arith.constant 0 : index
      %c0_143 = arith.constant 0 : index
      %450 = vector.load %arg15[%c0_142, %c0_143] : memref<2x128xf32, #tpu.memory_space<vmem>>, vector<2x128xf32>
      %451 = vector.broadcast %445 : vector<1x128xf32> to vector<2x128xf32>
      %452 = arith.mulf %450, %451 : vector<2x128xf32>
      %cst_144 = arith.constant dense<0.000000e+00> : vector<2xf32>
      %453 = vector.multi_reduction <add>, %452, %cst_144 [1] : vector<2x128xf32> to vector<2xf32>
      %454 = vector.shape_cast %453 : vector<2xf32> to vector<2x1xf32>
      %455 = arith.addf %449, %454 : vector<2x1xf32>
      %c0_145 = arith.constant 0 : index
      %c0_146 = arith.constant 0 : index
      %456 = memref.load %arg6[%c0_145, %c0_146] : memref<1x1xf32, #tpu.memory_space<smem>>
      %457 = vector.broadcast %456 : f32 to vector<2x1xf32>
      %458 = arith.addf %455, %457 : vector<2x1xf32>
      %cst_147 = arith.constant 5.000000e-01 : f32
      %459 = vector.broadcast %cst_147 : f32 to vector<2x1xf32>
      %460 = arith.mulf %459, %458 : vector<2x1xf32>
      %461 = math.tanh %460 : vector<2x1xf32>
      %cst_148 = arith.constant 5.000000e-01 : f32
      %462 = vector.broadcast %cst_148 : f32 to vector<2x1xf32>
      %463 = arith.mulf %462, %461 : vector<2x1xf32>
      %cst_149 = arith.constant 5.000000e-01 : f32
      %464 = vector.broadcast %cst_149 : f32 to vector<2x1xf32>
      %465 = arith.addf %463, %464 : vector<2x1xf32>
      %c0_150 = arith.constant 0 : index
      %c0_151 = arith.constant 0 : index
      %466 = vector.load %arg7[%c0_150, %c0_151] : memref<2x1xf32, #tpu.memory_space<vmem>>, vector<2x1xf32>
      tpu.vector_store %arg7[%c0_150, %c0_151], %465 {strides = array<i32>} : memref<2x1xf32, #tpu.memory_space<vmem>>, vector<2x1xf32>,
      %c0_152 = arith.constant 0 : index
      %c0_153 = arith.constant 0 : index
      %c0_154 = arith.constant 0 : index
      %467 = vector.load %arg8[%c0_152, %c0_153, %c0_154] : memref<2x2x128xf32, #tpu.memory_space<vmem>>, vector<1x2x128xf32>
      %468 = vector.shape_cast %467 : vector<1x2x128xf32> to vector<2x128xf32>
      %469 = vector.shape_cast %405 : vector<2x128xf32> to vector<1x2x128xf32>
      tpu.vector_store %arg8[%c0_152, %c0_153, %c0_154], %469 {strides = array<i32>} : memref<2x2x128xf32, #tpu.memory_space<vmem>>, vector<1x2x128xf32>,
      %c1 = arith.constant 1 : index
      %c0_155 = arith.constant 0 : index
      %c0_156 = arith.constant 0 : index
      %470 = vector.load %arg8[%c1, %c0_155, %c0_156] : memref<2x2x128xf32, #tpu.memory_space<vmem>>, vector<1x2x128xf32>
      %471 = vector.shape_cast %470 : vector<1x2x128xf32> to vector<2x128xf32>
      %472 = vector.shape_cast %431 : vector<2x128xf32> to vector<1x2x128xf32>
      tpu.vector_store %arg8[%c1, %c0_155, %c0_156], %472 {strides = array<i32>} : memref<2x2x128xf32, #tpu.memory_space<vmem>>, vector<1x2x128xf32>,
    } else {
    }
    return
  }
  func.func @transform_0(%arg0: i32) -> (i32, i32, i32) {
    %c0_i32 = arith.constant 0 : i32
    %c0_i32_0 = arith.constant 0 : i32
    %c0_i32_1 = arith.constant 0 : i32
    return %arg0, %c0_i32, %c0_i32_0 : i32, i32, i32
  }
  func.func @transform_1(%arg0: i32) -> (i32, i32, i32) {
    %c1_i32 = arith.constant 1 : i32
    %0 = arith.subi %c1_i32, %arg0 : i32
    %c0_i32 = arith.constant 0 : i32
    %c1_i32_0 = arith.constant 1 : i32
    %c0_i32_1 = arith.constant 0 : i32
    return %0, %c0_i32, %c1_i32_0 : i32, i32, i32
  }
  func.func @transform_4(%arg0: i32) -> (i32, i32) {
    %c0_i32 = arith.constant 0 : i32
    %c0_i32_0 = arith.constant 0 : i32
    %c0_i32_1 = arith.constant 0 : i32
    return %c0_i32, %c0_i32_0 : i32, i32
  }
  func.func @transform_5(%arg0: i32) -> (i32, i32) {
    %c0_i32 = arith.constant 0 : i32
    %c0_i32_0 = arith.constant 0 : i32
    %c0_i32_1 = arith.constant 0 : i32
    return %c0_i32, %c0_i32_0 : i32, i32
  }
  func.func @transform_6(%arg0: i32) -> (i32, i32) {
    %c0_i32 = arith.constant 0 : i32
    %c0_i32_0 = arith.constant 0 : i32
    %c0_i32_1 = arith.constant 0 : i32
    return %c0_i32, %c0_i32_0 : i32, i32
  }
  func.func @transform_7(%arg0: i32) -> (i32, i32, i32) {
    %c0_i32 = arith.constant 0 : i32
    %c0_i32_0 = arith.constant 0 : i32
    %c0_i32_1 = arith.constant 0 : i32
    %c0_i32_2 = arith.constant 0 : i32
    return %c0_i32, %c0_i32_0, %c0_i32_1 : i32, i32, i32
  }
}

</mosaic_0001>

<bundles_post_ra>
// kernel: default_lstm_forward.1
= control target key start
LH: loop header
LB: loop body
LE: loop exit
PB: predicated region body
PF: predicated region fallthrough
CT: control target
= control target key end

     0   :  { %s4950_s0 = inlined_call_operand.vmem [shape: bf16[16,2,1024], index: 0, kind: input, shape index: {}, may-alias: {0,1}]   ;;  %s4951_s1 = inlined_call_operand.vmem [shape: bf16[16,2,1024], index: 1, kind: input, shape index: {}, may-alias: {0,1}]   ;;  %s4952_s2 = inlined_call_operand.vmem [shape: bf16[128,512], index: 2, kind: input, shape index: {}]   ;;  %s4953_s3 = inlined_call_operand.vmem [shape: bf16[128,512], index: 3, kind: input, shape index: {}]   ;;  %s4954_s4 = inlined_call_operand.vmem [shape: f32[1,256], index: 4, kind: input, shape index: {}]   ;;  %s4955_s5 = inlined_call_operand.<no memory space> [shape: f32[1,1], index: 5, kind: input, shape index: {}]   ;;  %s4956_s6 = inlined_call_operand.vmem [shape: f32[2,1], index: 6, kind: output, shape index: {0}]   ;;  %s4957_s7 = inlined_call_operand.hbm [shape: f32[2,2,128], index: 7, kind: output, shape index: {1}]  }
   0x1   :  { %13 = sst [smem:[#allocation9]] %s4955_s5 }
   0x2   :  { %14 = vsyncpa [#allocation13], 0  ;;  %s3735_s26 = smov 0   ;;  %s3737_s27 = smov 0  }
   0x3   :  { %s3739_s28 = smov 0   ;;  %s3741_s29 = smov 0  }
   0x4   :  { %s3743_s30 = smov 0  }
   0x5 LB: > { %s3761_s5 = sadd.s32 4294967295, %s3684_s30   ;;  %s3764_s8 = sadd.s32 1, %s3684_s30   ;;  %s3684_s30 = sphi %s3743_s30, %s5242_s30   ;;  %s3680_s29 = sphi %s3741_s29, %s5241_s29   ;;  %s3676_s28 = sphi %s3739_s28, %s5240_s28   ;;  %s3672_s27 = sphi %s3737_s27, %s5239_s27   ;;  %s3668_s26 = sphi %s3735_s26, %s5238_s26  }
   0x6   : > { %s24_s9 = ssub.s32 %s3684_s30, %s3764_s8  ;;  %s27_s10 = sadd.s32 1, %s3680_s29 }
   0x7   : > { %p25_p0 = scmp.eq.s32.totalorder %s24_s9, 0  ;;  %p34_p1 = scmp.ne.s32.totalorder %s3680_s29, %s3676_s28 }
   0x8   : > { %p35_p2 = scmp.eq.s32.totalorder %s3684_s30, 0  ;;  %s50_s11 = ssub.s32 1, %s3684_s30 }
   0x9   : > { %s3774_s12 = scalar_select %p25_p0, %s3680_s29, %s27_s10  }
   0xa   : > { %p36_p3 = por %p35_p2, %p34_p1  ;;  %s51_s13 = ssub.s32 1, %s3764_s8 }
   0xb   : > { %s52_s14 = ssub.s32 %s50_s11, %s51_s13  ;;  %s55_s15 = sadd.s32 1, %s3672_s27 }
   0xc   : > { %p53_p4 = scmp.eq.s32.totalorder %s52_s14, 0  ;;  %p62_p5 = scmp.ne.s32.totalorder %s3672_s27, %s3668_s26 }
   0xd   : > { %p3158_p7 = scmp.ge.s32.totalorder %s3684_s30, 2 }
   0xe   : > { %s3783_s16 = scalar_select %p53_p4, %s3672_s27, %s55_s15  }
   0xf   : > { %p3785_p6 = por %p62_p5, %p35_p2  ;;  %178 = sbr.rel (%p3158_p7) target bundleno = 38 (0x26), region = 24 }
  0x14   : > { %181 = sbr.rel (!%p36_p3) target bundleno = 29 (0x1d), region = 28  ;;  %s183_s18 = sand.u32 (%p36_p3), 1, %s3680_s29  }
  0x15   : > { %s3262_s19 = sshll.u32 (%p36_p3), %s3684_s30, 6  ;;  %s3159_s20 = sshll.u32 (%p36_p3), %s183_s18, 5 }
  0x16   : > { %s188_s23 = scalar_lea.vmem (%p36_p3), %s4950_s0, %s3262_s19  ;;  %s185_s24 = scalar_lea.vmem (%p36_p3), [#allocation10], %s3159_s20 }
  0x17   : > { %v205_v0 = vld [vmem:[%s188_s23] sm:$0xf] (%p36_p3)  ;;  %v207_v1 = vld [vmem:[%s188_s23 + $0x8] sm:$0xf] (%p36_p3)  ;;  %v209_v2 = vld [vmem:[%s188_s23 + $0x10] sm:$0xf] (%p36_p3) }
  0x18   : > { %206 = vst [vmem:[%s185_s24] sm:$0xf] (%p36_p3), %v205_v0  ;;  %208 = vst [vmem:[%s185_s24 + $0x4] sm:$0xf] (%p36_p3), %v207_v1  ;;  %v211_v3 = vld [vmem:[%s188_s23 + $0x18] sm:$0xf] (%p36_p3) }
  0x19   : > { %v213_v4 = vld [vmem:[%s188_s23 + $0x20] sm:$0xf]  ;;  %210 = vst [vmem:[%s185_s24 + $0x8] sm:$0xf] %v209_v2  ;;  %212 = vst [vmem:[%s185_s24 + $0xc] sm:$0xf] %v211_v3 }
  0x1a   : > { %214 = vst [vmem:[%s185_s24 + $0x10] sm:$0xf] %v213_v4  ;;  %v215_v5 = vld [vmem:[%s188_s23 + $0x28] sm:$0xf]  ;;  %v217_v6 = vld [vmem:[%s188_s23 + $0x30] sm:$0xf] }
  0x1b   : > { %v219_v7 = vld [vmem:[%s188_s23 + $0x38] sm:$0xf]  ;;  %216 = vst [vmem:[%s185_s24 + $0x14] sm:$0xf] %v215_v5  ;;  %218 = vst [vmem:[%s185_s24 + $0x18] sm:$0xf] %v217_v6 }
  0x1c   : > { %220 = vst [vmem:[%s185_s24 + $0x1c] sm:$0xf] %v219_v7 }
  0x1d PF: > { %260 = sbr.rel (!%p3785_p6) target bundleno = 38 (0x26), region = 69  ;;  %s262_s25 = sand.u32 (%p3785_p6), 1, %s3672_s27  }
  0x1e   : > { %s3163_s9 = sshll.u32 (%p3785_p6), %s50_s11, 6  ;;  %s3162_s10 = sshll.u32 (%p3785_p6), %s262_s25, 5 }
  0x1f   : > { %s3099_s15 = scalar_lea.vmem (%p3785_p6), %s4951_s1, %s3163_s9  ;;  %s264_s18 = scalar_lea.vmem (%p3785_p6), [#allocation11], %s3162_s10 }
  0x20   : > { %v3164_v8 = vld [vmem:[%s3099_s15 + $0x4] sm:$0xf] (%p3785_p6)  ;;  %v3165_v9 = vld [vmem:[%s3099_s15 + $0xc] sm:$0xf] (%p3785_p6)  ;;  %v3166_v10 = vld [vmem:[%s3099_s15 + $0x14] sm:$0xf] (%p3785_p6) }
  0x21   : > { %287 = vst [vmem:[%s264_s18] sm:$0xf] (%p3785_p6), %v3164_v8  ;;  %289 = vst [vmem:[%s264_s18 + $0x4] sm:$0xf] (%p3785_p6), %v3165_v9  ;;  %v3167_v11 = vld [vmem:[%s3099_s15 + $0x1c] sm:$0xf] (%p3785_p6) }
  0x22   : > { %v3168_v12 = vld [vmem:[%s3099_s15 + $0x24] sm:$0xf]  ;;  %291 = vst [vmem:[%s264_s18 + $0x8] sm:$0xf] %v3166_v10  ;;  %293 = vst [vmem:[%s264_s18 + $0xc] sm:$0xf] %v3167_v11 }
  0x23   : > { %295 = vst [vmem:[%s264_s18 + $0x10] sm:$0xf] %v3168_v12  ;;  %v3169_v13 = vld [vmem:[%s3099_s15 + $0x2c] sm:$0xf]  ;;  %v3170_v14 = vld [vmem:[%s3099_s15 + $0x34] sm:$0xf] }
  0x24   : > { %v3171_v15 = vld [vmem:[%s3099_s15 + $0x3c] sm:$0xf]  ;;  %297 = vst [vmem:[%s264_s18 + $0x14] sm:$0xf] %v3169_v13  ;;  %299 = vst [vmem:[%s264_s18 + $0x18] sm:$0xf] %v3170_v14 }
  0x25   : > { %301 = vst [vmem:[%s264_s18 + $0x1c] sm:$0xf] %v3171_v15 }
  0x26 PF: > { %p3172_p8 = scmp.ge.s32.totalorder %s3684_s30, 1  ;;  %p340_p9 = scmp.lt.s32.totalorder %s3684_s30, 3 }
  0x28   : > { %p341_p10 = pnand %p3172_p8, %p340_p9 }
  0x2a   : > { %344 = sbr.rel (%p341_p10) target bundleno = 2274 (0x8e2), region = 110 }
  0x2f   : > { %s347_s11 = sand.u32 1, %s3676_s28   ;;  %s354_s17 = sand.u32 1, %s3668_s26  }
  0x30   : > { %s3173_s19 = sshll.u32 %s347_s11, 5  ;;  %s3174_s20 = sshll.u32 %s354_s17, 5 }
  0x31   : > { %s3807_s21 = scalar_lea.vmem [#allocation10], %s3173_s19  ;;  %s3809_s22 = scalar_lea.vmem [#allocation11], %s3174_s20 }
  0x32   : > { %p3175_p11 = scmp.ne.s32.totalorder %s3761_s5, 0 }
  0x34   : > { %387 = sbr.rel (%p3175_p11) target bundleno = 99 (0x63), region = 122 }
  0x39   : > { %v421_v16 = vld [vmem:[%s4952_s2] sm:$0xff]  ;;  %v423_v17 = vld [vmem:[%s4952_s2 + $0x8] sm:$0xff]  ;;  %v425_v18 = vld [vmem:[%s4952_s2 + $0x10] sm:$0xff] }
  0x3a   : > { %422 = vst [vmem:[#allocation2 + $0xb0] sm:$0xff] %v421_v16  ;;  %424 = vst [vmem:[#allocation2] sm:$0xff] %v423_v17  ;;  %v427_v19 = vld [vmem:[%s4952_s2 + $0x18] sm:$0xff]  ;;  %v429_v20 = vld [vmem:[%s4952_s2 + $0x20] sm:$0xff] }
  0x3b   : > { %426 = vst [vmem:[#allocation2 + $0xd8] sm:$0xff] %v425_v18  ;;  %v431_v21 = vld [vmem:[%s4952_s2 + $0x28] sm:$0xff]  ;;  %428 = vst [vmem:[#allocation2 + $0x18] sm:$0xff] %v427_v19  ;;  %v433_v22 = vld [vmem:[%s4952_s2 + $0x30] sm:$0xff] }
  0x3c   : > { %430 = vst [vmem:[#allocation2 + $0x50] sm:$0xff] %v429_v20  ;;  %432 = vst [vmem:[#allocation2 + $0x68] sm:$0xff] %v431_v21  ;;  %v435_v23 = vld [vmem:[%s4952_s2 + $0x38] sm:$0xff]  ;;  %v437_v24 = vld [vmem:[%s4952_s2 + $0x40] sm:$0xff] }
  0x3d   : > { %434 = vst [vmem:[#allocation2 + $0x30] sm:$0xff] %v433_v22  ;;  %436 = vst [vmem:[#allocation2 + $0x48] sm:$0xff] %v435_v23  ;;  %v439_v25 = vld [vmem:[%s4952_s2 + $0x48] sm:$0xff]  ;;  %v441_v26 = vld [vmem:[%s4952_s2 + $0x50] sm:$0xff] }
  0x3e   : > { %438 = vst [vmem:[#allocation2 + $0x80] sm:$0xff] %v437_v24  ;;  %v443_v27 = vld [vmem:[%s4952_s2 + $0x58] sm:$0xff]  ;;  %440 = vst [vmem:[#allocation2 + $0x88] sm:$0xff] %v439_v25  ;;  %v445_v28 = vld [vmem:[%s4952_s2 + $0x60] sm:$0xff] }
  0x3f   : > { %442 = vst [vmem:[#allocation2 + $0xe8] sm:$0xff] %v441_v26  ;;  %444 = vst [vmem:[#allocation2 + $0xb8] sm:$0xff] %v443_v27  ;;  %v447_v29 = vld [vmem:[%s4952_s2 + $0x68] sm:$0xff]  ;;  %v449_v30 = vld [vmem:[%s4952_s2 + $0x70] sm:$0xff] }
  0x40   : > { %446 = vst [vmem:[#allocation2 + $0x60] sm:$0xff] %v445_v28  ;;  %448 = vst [vmem:[#allocation2 + $0xf0] sm:$0xff] %v447_v29  ;;  %v451_v31 = vld [vmem:[%s4952_s2 + $0x78] sm:$0xff]  ;;  %v453_v32 = vld [vmem:[%s4952_s2 + $0x80] sm:$0xff] }
  0x41   : > { %450 = vst [vmem:[#allocation2 + $0x8] sm:$0xff] %v449_v30  ;;  %v455_v33 = vld [vmem:[%s4952_s2 + $0x88] sm:$0xff]  ;;  %452 = vst [vmem:[#allocation2 + $0x78] sm:$0xff] %v451_v31  ;;  %v457_v34 = vld [vmem:[%s4952_s2 + $0x90] sm:$0xff] }
  0x42   : > { %454 = vst [vmem:[#allocation2 + $0x38] sm:$0xff] %v453_v32  ;;  %456 = vst [vmem:[#allocation2 + $0x58] sm:$0xff] %v455_v33  ;;  %v459_v35 = vld [vmem:[%s4952_s2 + $0x98] sm:$0xff]  ;;  %v461_v36 = vld [vmem:[%s4952_s2 + $0xa0] sm:$0xff] }
  0x43   : > { %458 = vst [vmem:[#allocation2 + $0x40] sm:$0xff] %v457_v34  ;;  %460 = vst [vmem:[#allocation2 + $0xc8] sm:$0xff] %v459_v35  ;;  %v463_v37 = vld [vmem:[%s4952_s2 + $0xa8] sm:$0xff]  ;;  %v465_v38 = vld [vmem:[%s4952_s2 + $0xb0] sm:$0xff] }
  0x44   : > { %462 = vst [vmem:[#allocation2 + $0xe0] sm:$0xff] %v461_v36  ;;  %v467_v39 = vld [vmem:[%s4952_s2 + $0xb8] sm:$0xff]  ;;  %464 = vst [vmem:[#allocation2 + $0x90] sm:$0xff] %v463_v37  ;;  %v469_v40 = vld [vmem:[%s4952_s2 + $0xc0] sm:$0xff] }
  0x45   : > { %466 = vst [vmem:[#allocation2 + $0x70] sm:$0xff] %v465_v38  ;;  %468 = vst [vmem:[#allocation2 + $0xc0] sm:$0xff] %v467_v39  ;;  %v471_v41 = vld [vmem:[%s4952_s2 + $0xc8] sm:$0xff]  ;;  %v473_v42 = vld [vmem:[%s4952_s2 + $0xd0] sm:$0xff] }
  0x46   : > { %470 = vst [vmem:[#allocation2 + $0xa8] sm:$0xff] %v469_v40  ;;  %472 = vst [vmem:[#allocation2 + $0xd0] sm:$0xff] %v471_v41  ;;  %v475_v43 = vld [vmem:[%s4952_s2 + $0xd8] sm:$0xff]  ;;  %v477_v44 = vld [vmem:[%s4952_s2 + $0xe0] sm:$0xff] }
  0x47   : > { %474 = vst [vmem:[#allocation2 + $0x10] sm:$0xff] %v473_v42  ;;  %v479_v45 = vld [vmem:[%s4952_s2 + $0xe8] sm:$0xff]  ;;  %476 = vst [vmem:[#allocation2 + $0x28] sm:$0xff] %v475_v43  ;;  %v481_v46 = vld [vmem:[%s4952_s2 + $0xf0] sm:$0xff] }
  0x48   : > { %478 = vst [vmem:[#allocation2 + $0xa0] sm:$0xff] %v477_v44  ;;  %480 = vst [vmem:[#allocation2 + $0xf8] sm:$0xff] %v479_v45  ;;  %v483_v47 = vld [vmem:[%s4952_s2 + $0xf8] sm:$0xff] }
  0x49   : > { %482 = vst [vmem:[#allocation2 + $0x20] sm:$0xff] %v481_v46  ;;  %484 = vst [vmem:[#allocation2 + $0x98] sm:$0xff] %v483_v47 }
  0x4a   : > { %492 = vsyncadd [#allocation14], 4096 }
  0x4b   : > { %3658 = dma.done.wait [#allocation14], 4096 }
  0x4c   : > { %3659 = vsyncadd [#allocation14], 4294963200 }
  0x4d   : > { %v530_v48 = vld [vmem:[%s4953_s3] sm:$0xff]  ;;  %v532_v49 = vld [vmem:[%s4953_s3 + $0x8] sm:$0xff]  ;;  %v534_v50 = vld [vmem:[%s4953_s3 + $0x10] sm:$0xff] }
  0x4e   : > { %531 = vst [vmem:[#allocation3 + $0x80] sm:$0xff] %v530_v48  ;;  %533 = vst [vmem:[#allocation3 + $0xc8] sm:$0xff] %v532_v49  ;;  %v536_v51 = vld [vmem:[%s4953_s3 + $0x18] sm:$0xff]  ;;  %v538_v52 = vld [vmem:[%s4953_s3 + $0x20] sm:$0xff] }
  0x4f   : > { %535 = vst [vmem:[#allocation3 + $0xe8] sm:$0xff] %v534_v50  ;;  %v540_v53 = vld [vmem:[%s4953_s3 + $0x28] sm:$0xff]  ;;  %537 = vst [vmem:[#allocation3 + $0x78] sm:$0xff] %v536_v51  ;;  %v542_v54 = vld [vmem:[%s4953_s3 + $0x30] sm:$0xff] }
  0x50   : > { %539 = vst [vmem:[#allocation3 + $0x8] sm:$0xff] %v538_v52  ;;  %541 = vst [vmem:[#allocation3 + $0x90] sm:$0xff] %v540_v53  ;;  %v544_v55 = vld [vmem:[%s4953_s3 + $0x38] sm:$0xff]  ;;  %v546_v56 = vld [vmem:[%s4953_s3 + $0x40] sm:$0xff] }
  0x51   : > { %543 = vst [vmem:[#allocation3 + $0x58] sm:$0xff] %v542_v54  ;;  %545 = vst [vmem:[#allocation3 + $0xa8] sm:$0xff] %v544_v55  ;;  %v548_v57 = vld [vmem:[%s4953_s3 + $0x48] sm:$0xff]  ;;  %v550_v58 = vld [vmem:[%s4953_s3 + $0x50] sm:$0xff] }
  0x52   : > { %547 = vst [vmem:[#allocation3 + $0xd0] sm:$0xff] %v546_v56  ;;  %v552_v59 = vld [vmem:[%s4953_s3 + $0x58] sm:$0xff]  ;;  %549 = vst [vmem:[#allocation3 + $0xb0] sm:$0xff] %v548_v57  ;;  %v554_v60 = vld [vmem:[%s4953_s3 + $0x60] sm:$0xff] }
  0x53   : > { %551 = vst [vmem:[#allocation3 + $0x38] sm:$0xff] %v550_v58  ;;  %553 = vst [vmem:[#allocation3 + $0x40] sm:$0xff] %v552_v59  ;;  %v556_v61 = vld [vmem:[%s4953_s3 + $0x68] sm:$0xff]  ;;  %v558_v62 = vld [vmem:[%s4953_s3 + $0x70] sm:$0xff] }
  0x54   : > { %555 = vst [vmem:[#allocation3 + $0xe0] sm:$0xff] %v554_v60  ;;  %557 = vst [vmem:[#allocation3 + $0x60] sm:$0xff] %v556_v61  ;;  %v560_v63 = vld [vmem:[%s4953_s3 + $0x78] sm:$0xff]  ;;  %v562_v0 = vld [vmem:[%s4953_s3 + $0x80] sm:$0xff] }
  0x55   : > { %559 = vst [vmem:[#allocation3 + $0x18] sm:$0xff] %v558_v62  ;;  %v564_v1 = vld [vmem:[%s4953_s3 + $0x88] sm:$0xff]  ;;  %561 = vst [vmem:[#allocation3 + $0x68] sm:$0xff] %v560_v63  ;;  %v566_v2 = vld [vmem:[%s4953_s3 + $0x90] sm:$0xff] }
  0x56   : > { %563 = vst [vmem:[#allocation3 + $0x10] sm:$0xff] %v562_v0  ;;  %565 = vst [vmem:[#allocation3 + $0x70] sm:$0xff] %v564_v1  ;;  %v568_v3 = vld [vmem:[%s4953_s3 + $0x98] sm:$0xff]  ;;  %v570_v4 = vld [vmem:[%s4953_s3 + $0xa0] sm:$0xff] }
  0x57   : > { %567 = vst [vmem:[#allocation3 + $0x50] sm:$0xff] %v566_v2  ;;  %569 = vst [vmem:[#allocation3 + $0xa0] sm:$0xff] %v568_v3  ;;  %v572_v5 = vld [vmem:[%s4953_s3 + $0xa8] sm:$0xff]  ;;  %v574_v6 = vld [vmem:[%s4953_s3 + $0xb0] sm:$0xff] }
  0x58   : > { %571 = vst [vmem:[#allocation3 + $0xd8] sm:$0xff] %v570_v4  ;;  %v576_v7 = vld [vmem:[%s4953_s3 + $0xb8] sm:$0xff]  ;;  %573 = vst [vmem:[#allocation3 + $0x30] sm:$0xff] %v572_v5  ;;  %v578_v8 = vld [vmem:[%s4953_s3 + $0xc0] sm:$0xff] }
  0x59   : > { %575 = vst [vmem:[#allocation3 + $0x20] sm:$0xff] %v574_v6  ;;  %577 = vst [vmem:[#allocation3 + $0xf0] sm:$0xff] %v576_v7  ;;  %v580_v9 = vld [vmem:[%s4953_s3 + $0xc8] sm:$0xff]  ;;  %v582_v10 = vld [vmem:[%s4953_s3 + $0xd0] sm:$0xff] }
  0x5a   : > { %579 = vst [vmem:[#allocation3 + $0x88] sm:$0xff] %v578_v8  ;;  %581 = vst [vmem:[#allocation3 + $0x48] sm:$0xff] %v580_v9  ;;  %v584_v11 = vld [vmem:[%s4953_s3 + $0xd8] sm:$0xff]  ;;  %v586_v12 = vld [vmem:[%s4953_s3 + $0xe0] sm:$0xff] }
  0x5b   : > { %583 = vst [vmem:[#allocation3 + $0xf8] sm:$0xff] %v582_v10  ;;  %v588_v13 = vld [vmem:[%s4953_s3 + $0xe8] sm:$0xff]  ;;  %585 = vst [vmem:[#allocation3 + $0xc0] sm:$0xff] %v584_v11  ;;  %v590_v14 = vld [vmem:[%s4953_s3 + $0xf0] sm:$0xff] }
  0x5c   : > { %587 = vst [vmem:[#allocation3 + $0xb8] sm:$0xff] %v586_v12  ;;  %589 = vst [vmem:[#allocation3] sm:$0xff] %v588_v13  ;;  %v592_v15 = vld [vmem:[%s4953_s3 + $0xf8] sm:$0xff] }
  0x5d   : > { %591 = vst [vmem:[#allocation3 + $0x28] sm:$0xff] %v590_v14  ;;  %593 = vst [vmem:[#allocation3 + $0x98] sm:$0xff] %v592_v15 }
  0x5e   : > { %601 = vsyncadd [#allocation16], 4096 }
  0x5f   : > { %3660 = dma.done.wait [#allocation16], 4096 }
  0x60   : > { %3661 = vsyncadd [#allocation16], 4294963200  ;;  %v3686_v16 = vmov 0.0  }
  0x61   : > { %606 = vst [vmem:[#allocation4] sm:$0x3] %v3686_v16  ;;  %607 = vst [vmem:[#allocation5] sm:$0x3] %v3686_v16 }
  0x62   : > { %608 = vst [vmem:[#allocation6] sm:$0x3] %v3686_v16  ;;  %609 = vst [vmem:[#allocation7] sm:$0x3] %v3686_v16 }
  0x63 PF: > { %v638_v17 = vld [vmem:[#allocation2 + $0xa0] sm:$0xff]  ;;  %v639_v19 = vld [vmem:[#allocation2 + $0xf8] sm:$0xff]  ;;  %v4958_v23 = vmov 0   ;;  %v4016_v26 = vld [vmem:[#allocation2 + $0xac] ss:$-152 sps:$4 sm:$0xff]  }
  0x64   : > { %v640_v18 = vld [vmem:[#allocation2 + $0x20] sm:$0xff]  ;;  %v641_v21 = vld [vmem:[#allocation2 + $0x98] sm:$0xff]  ;;  %895 = vmatprep.mubr.bf16.mxu0 %v4958_v23  ;;  %936 = vmatprep.mubr.bf16.mxu1 %v4958_v23  ;;  %v4019_v27 = vld [vmem:[#allocation2 + $0xd4] ss:$-168 sps:$4 sm:$0xff]  }
  0x65   : > { %v4006_v20 = vcombine.high %v638_v17, %v640_v18  ;;  %v4008_v22 = vcombine.low %v638_v17, %v640_v18  ;;  %v4012_v24 = vcombine.high %v639_v19, %v641_v21  ;;  %v4014_v25 = vcombine.low %v639_v19, %v641_v21  ;;  %v4021_v28 = vld [vmem:[#allocation2 + $0xa8] ss:$-152 sps:$4 sm:$0xff]   ;;  %v4029_v30 = vld [vmem:[#allocation2 + $0xe4] ss:$-112 sps:$4 sm:$0xff]   ;;  %v4044_v35 = vld [vmem:[#allocation2 + $0x5c] ss:$112 sps:$4 sm:$0xff]  }
  0x66   : > { %v4025_v29 = vld [vmem:[#allocation2 + $0xd0] ss:$-168 sps:$4 sm:$0xff]   ;;  %v4032_v31 = vld [vmem:[#allocation2 + $0x94] ss:$48 sps:$4 sm:$0xff]   ;;  %5071 = vst [vmem:[#allocation21_spill] sm:$0xff] %v4044_v35 }
  0x67   : > { %863 = vmatprep.subr.bf16.mxu0 %v4006_v20  ;;  %904 = vmatprep.subr.bf16.mxu1 %v4012_v24  ;;  %v4035_v32 = vld [vmem:[#allocation2 + $0xe0] ss:$-112 sps:$4 sm:$0xff]   ;;  %v4041_v34 = vld [vmem:[#allocation2 + $0x3c] ss:$8 sps:$4 sm:$0xff]   ;;  %v4049_v37 = vld [vmem:[#allocation2 + $0x58] ss:$112 sps:$4 sm:$0xff]  }
  0x68   : > { %864 = vmatpush1.bf16.msra.mxu0 %v4008_v22  ;;  %905 = vmatpush1.bf16.msra.mxu1 %v4014_v25  ;;  %v4037_v33 = vld [vmem:[#allocation2 + $0x90] ss:$48 sps:$4 sm:$0xff]   ;;  %5073 = vst [vmem:[#allocation23_spill] sm:$0xff] %v4049_v37  ;;  %v4053_v38 = vld [vmem:[#allocation2 + $0x64] ss:$-88 sps:$4 sm:$0xff]  }
  0x69   : > { %865 = vmatprep.subr.bf16.mxu0 %v4016_v26  ;;  %906 = vmatprep.subr.bf16.mxu1 %v4019_v27  ;;  %v4046_v36 = vld [vmem:[#allocation2 + $0x38] ss:$8 sps:$4 sm:$0xff]   ;;  %5074 = vst [vmem:[#allocation24_spill] sm:$0xff] %v4053_v38  ;;  %v4056_v39 = vld [vmem:[#allocation2 + $0xf4] ss:$-120 sps:$4 sm:$0xff]   ;;  %v615_v46 = vld [vmem:[#allocation2 + $0x68] sm:$0xff] }
  0x6a   : > { %5072 = vst [vmem:[#allocation22_spill] sm:$0xff] %v4046_v36  ;;  %5075 = vst [vmem:[#allocation25_spill] sm:$0xff] %v4056_v39  ;;  %v4058_v40 = vld [vmem:[#allocation2 + $0x60] ss:$-88 sps:$4 sm:$0xff]   ;;  %v4060_v41 = vld [vmem:[#allocation2 + $0xf0] ss:$-120 sps:$4 sm:$0xff]  }
  0x6b   : > { %5076 = vst [vmem:[#allocation26_spill] sm:$0xff] %v4058_v40  ;;  %5077 = vst [vmem:[#allocation27_spill] sm:$0xff] %v4060_v41  ;;  %v4063_v42 = vld [vmem:[#allocation2 + $0x84] ss:$104 sps:$4 sm:$0xff]   ;;  %v614_v44 = vld [vmem:[#allocation2 + $0x50] sm:$0xff] }
  0x6c   : > { %866 = vmatpush1.bf16.msra.mxu0 %v4021_v28  ;;  %907 = vmatpush1.bf16.msra.mxu1 %v4025_v29  ;;  %5078 = vst [vmem:[#allocation28_spill] sm:$0xff] %v4063_v42  ;;  %v4067_v43 = vld [vmem:[#allocation2 + $0x8c] ss:$48 sps:$4 sm:$0xff]   ;;  %v616_v45 = vld [vmem:[#allocation2 + $0x30] sm:$0xff]  ;;  %v4071_v48 = vld [vmem:[#allocation2 + $0x80] ss:$104 sps:$4 sm:$0xff]  }
  0x6d   : > { %867 = vmatprep.subr.bf16.mxu0 %v4029_v30  ;;  %908 = vmatprep.subr.bf16.mxu1 %v4032_v31  ;;  %5079 = vst [vmem:[#allocation29_spill] sm:$0xff] %v4067_v43  ;;  %v617_v47 = vld [vmem:[#allocation2 + $0x48] sm:$0xff]  ;;  %5080 = vst [vmem:[#allocation30_spill] sm:$0xff] %v4071_v48  ;;  %v4077_v50 = vcombine.high %v614_v44, %v616_v45  ;;  %v4083_v52 = vcombine.low %v614_v44, %v616_v45  ;;  %v4089_v54 = vld [vmem:[#allocation2 + $0xb4] ss:$40 sps:$4 sm:$0xff]  }
  0x6e   : > { %v4075_v49 = vld [vmem:[#allocation2 + $0x88] ss:$48 sps:$4 sm:$0xff]   ;;  %v4080_v51 = vcombine.high %v615_v46, %v617_v47  ;;  %v4087_v53 = vcombine.low %v615_v46, %v617_v47  ;;  %5086 = vst [vmem:[#allocation36_spill] sm:$0xff] %v4089_v54  ;;  %v4092_v55 = vld [vmem:[#allocation2 + $0x4] ss:$24 sps:$4 sm:$0xff]   ;;  %v663_v3 = vld [vmem:[#allocation3 + $0x30] sm:$0xff] }
  0x6f   : > { %5081 = vst [vmem:[#allocation31_spill] sm:$0xff] %v4075_v49  ;;  %5082 = vst [vmem:[#allocation32_spill] sm:$0xff] %v4077_v50  ;;  %v4094_v56 = vld [vmem:[#allocation2 + $0xb0] ss:$40 sps:$4 sm:$0xff]   ;;  %v674_v58 = vld [vmem:[#allocation4] sm:$0x3] }
  0x70   : > { %868 = vmatpush1.bf16.msra.mxu0 %v4035_v32  ;;  %909 = vmatpush1.bf16.msra.mxu1 %v4037_v33  ;;  %5083 = vst [vmem:[#allocation33_spill] sm:$0xff] %v4080_v51  ;;  %5084 = vst [vmem:[#allocation34_spill] sm:$0xff] %v4083_v52  ;;  %v4096_v57 = vld [vmem:[#allocation2] ss:$24 sps:$4 sm:$0xff]   ;;  %v4101_v59 = vld [vmem:[#allocation3 + $0xbc] ss:$-144 sps:$4 sm:$0xff]   ;;  %v679_v61 = vpack.c.bf16 %v674_v58, %v674_v58 }
  0x71   : > { %869 = vmatprep.subr.bf16.mxu0 %v4041_v34  ;;  %910 = vmatprep.subr.bf16.mxu1 %v4044_v35  ;;  %5085 = vst [vmem:[#allocation35_spill] sm:$0xff] %v4087_v53  ;;  %5087 = vst [vmem:[#allocation37_spill] sm:$0xff] %v4092_v55  ;;  %v4104_v60 = vld [vmem:[#allocation3 + $0x4] ss:$152 sps:$4 sm:$0xff]   ;;  %v4106_v62 = vld [vmem:[#allocation3 + $0xb8] ss:$-144 sps:$4 sm:$0xff]  }
  0x72   : > { %5088 = vst [vmem:[#allocation38_spill] sm:$0xff] %v4094_v56  ;;  %5089 = vst [vmem:[#allocation39_spill] sm:$0xff] %v4096_v57  ;;  %v4109_v63 = vld [vmem:[#allocation3] ss:$152 sps:$4 sm:$0xff]   ;;  %v4113_v0 = vld [vmem:[#allocation3 + $0x8c] ss:$112 sps:$4 sm:$0xff]  }
  0x73   : > { %5090 = vst [vmem:[#allocation40_spill] sm:$0xff] %v4101_v59  ;;  %5091 = vst [vmem:[#allocation41_spill] sm:$0xff] %v4104_v60  ;;  %v4115_v1 = vld [vmem:[#allocation3 + $0x4c] ss:$120 sps:$4 sm:$0xff]   ;;  %v4118_v2 = vld [vmem:[#allocation3 + $0x88] ss:$112 sps:$4 sm:$0xff]  }
  0x74   : > { %870 = vmatpush1.bf16.msra.mxu0 %v4046_v36  ;;  %911 = vmatpush1.bf16.msra.mxu1 %v4049_v37  ;;  %v665_v4 = vld [vmem:[#allocation3 + $0xf0] sm:$0xff]  ;;  %v4121_v5 = vld [vmem:[#allocation3 + $0x48] ss:$120 sps:$4 sm:$0xff]   ;;  %v4125_v6 = vld [vmem:[#allocation3 + $0xdc] ss:$-184 sps:$4 sm:$0xff]  }
  0x75   : > { %871 = vmatprep.subr.bf16.mxu0 %v4053_v38  ;;  %912 = vmatprep.subr.bf16.mxu1 %v4056_v39  ;;  %v4128_v7 = vcombine.high %v663_v3, %v665_v4  ;;  %v658_v8 = vld [vmem:[#allocation3 + $0x10] sm:$0xff]  ;;  %v4133_v10 = vld [vmem:[#allocation3 + $0xd8] ss:$-184 sps:$4 sm:$0xff]   ;;  %v4137_v11 = vcombine.low %v663_v3, %v665_v4  ;;  %v4151_v16 = vld [vmem:[#allocation3 + $0xe4] ss:$-200 sps:$4 sm:$0xff]  }
  0x76   : > { %v660_v9 = vld [vmem:[#allocation3 + $0x50] sm:$0xff]  ;;  %v4154_v17 = vld [vmem:[#allocation3 + $0x64] ss:$8 sps:$4 sm:$0xff]   ;;  %v4157_v18 = vld [vmem:[#allocation3 + $0xe0] ss:$-200 sps:$4 sm:$0xff]  }
  0x77   : > { %v4139_v12 = vcombine.high %v658_v8, %v660_v9  ;;  %v4142_v13 = vld [vmem:[#allocation3 + $0x74] ss:$48 sps:$4 sm:$0xff]   ;;  %v4145_v14 = vcombine.low %v658_v8, %v660_v9  ;;  %v4149_v15 = vld [vmem:[#allocation3 + $0x70] ss:$48 sps:$4 sm:$0xff]   ;;  %v4175_v47 = vld [vmem:[#allocation3 + $0xc] ss:$80 sps:$4 sm:$0xff]  }
  0x78   : > { %872 = vmatpush1.bf16.msra.mxu0 %v4058_v40  ;;  %913 = vmatpush1.bf16.msra.mxu1 %v4060_v41  ;;  %v4161_v19 = vld [vmem:[#allocation3 + $0x60] ss:$8 sps:$4 sm:$0xff]   ;;  %v4163_v21 = vld [vmem:[#allocation3 + $0xd4] ss:$-152 sps:$4 sm:$0xff]   ;;  %v4169_v45 = vld [vmem:[#allocation3 + $0xd0] ss:$-152 sps:$4 sm:$0xff]  }
  0x79   : > { %873 = vmatprep.subr.bf16.mxu0 %v4063_v42  ;;  %914 = vmatprep.subr.bf16.mxu1 %v4067_v43  ;;  %v4166_v44 = vld [vmem:[#allocation3 + $0xb4] ss:$-112 sps:$4 sm:$0xff]   ;;  %v4173_v46 = vld [vmem:[#allocation3 + $0xb0] ss:$-112 sps:$4 sm:$0xff]   ;;  %5093 = vst [vmem:[#allocation43_spill] sm:$0xff] %v4175_v47 }
  0x7a   : > { %5092 = vst [vmem:[#allocation42_spill] sm:$0xff] %v4173_v46  ;;  %v4178_v58 = vld [vmem:[#allocation3 + $0x94] ss:$24 sps:$4 sm:$0xff]   ;;  %v4185_v3 = vld [vmem:[#allocation3 + $0x90] ss:$24 sps:$4 sm:$0xff]  }
  0x7b   : > { %v4187_v4 = vld [vmem:[#allocation3 + $0x84] ss:$104 sps:$4 sm:$0xff]   ;;  %v4193_v9 = vld [vmem:[#allocation3 + $0x80] ss:$104 sps:$4 sm:$0xff]  }
  0x7c   : > { %874 = vmatpush1.bf16.msra.mxu0 %v4071_v48  ;;  %915 = vmatpush1.bf16.msra.mxu1 %v4075_v49  ;;  %v4190_v8 = vld [vmem:[#allocation3 + $0xcc] ss:$-80 sps:$4 sm:$0xff]  }
  0x7d   : > { %875 = vmatprep.subr.bf16.mxu0 %v4077_v50  ;;  %916 = vmatprep.subr.bf16.mxu1 %v4080_v51  ;;  %5094 = vst [vmem:[#allocation44_spill] sm:$0xff] %v4190_v8 }
  0x80   : > { %876 = vmatpush1.bf16.msra.mxu0 %v4083_v52  ;;  %917 = vmatpush1.bf16.msra.mxu1 %v4087_v53 }
  0x81   : > { %877 = vmatprep.subr.bf16.mxu0 %v4089_v54  ;;  %918 = vmatprep.subr.bf16.mxu1 %v4092_v55 }
  0x84   : > { %878 = vmatpush1.bf16.msra.mxu0 %v4094_v56  ;;  %919 = vmatpush1.bf16.msra.mxu1 %v4096_v57 }
  0x85   : > { %1149 = vmatprep.subr.bf16.mxu0 %v4101_v59  ;;  %1190 = vmatprep.subr.bf16.mxu1 %v4104_v60 }
  0x87   : > { %896 = vmatmul.mubr.bf16.vlgmr.msra.gmra.mxu0 %v679_v61  ;;  %937 = vmatmul.mubr.bf16.vlgmr.msra.gmra.mxu1 %v679_v61  ;;  %v4181_v61 = vld [vmem:[#allocation3 + $0x8] ss:$80 sps:$4 sm:$0xff]  }
  0x88   : > { %1150 = vmatpush1.bf16.msra.mxu0 %v4106_v62  ;;  %1191 = vmatpush1.bf16.msra.mxu1 %v4109_v63 }
  0x89   : > { %1151 = vmatprep.subr.bf16.mxu0 %v4113_v0  ;;  %1192 = vmatprep.subr.bf16.mxu1 %v4115_v1 }
  0x8a   : > { %1181 = vmatprep.mubr.bf16.mxu0 %v4958_v23  ;;  %1222 = vmatprep.mubr.bf16.mxu1 %v4958_v23  ;;  %v676_v23 = vld [vmem:[#allocation6] sm:$0x3] }
  0x8c   : > { %1152 = vmatpush1.bf16.msra.mxu0 %v4118_v2  ;;  %1193 = vmatpush1.bf16.msra.mxu1 %v4121_v5 }
  0x8d   : > { %1153 = vmatprep.subr.bf16.mxu0 %v4125_v6  ;;  %1194 = vmatprep.subr.bf16.mxu1 %v4128_v7 }
  0x90   : > { %1154 = vmatpush1.bf16.msra.mxu0 %v4133_v10  ;;  %1195 = vmatpush1.bf16.msra.mxu1 %v4137_v11 }
  0x91   : > { %1155 = vmatprep.subr.bf16.mxu0 %v4139_v12  ;;  %1196 = vmatprep.subr.bf16.mxu1 %v4142_v13 }
  0x94   : > { %1156 = vmatpush1.bf16.msra.mxu0 %v4145_v14  ;;  %1197 = vmatpush1.bf16.msra.mxu1 %v4149_v15 }
  0x95   : > { %1157 = vmatprep.subr.bf16.mxu0 %v4151_v16  ;;  %1198 = vmatprep.subr.bf16.mxu1 %v4154_v17 }
  0x98   : > { %1158 = vmatpush1.bf16.msra.mxu0 %v4157_v18  ;;  %1199 = vmatpush1.bf16.msra.mxu1 %v4161_v19 }
  0x99   : > { %1159 = vmatprep.subr.bf16.mxu0 %v4163_v21  ;;  %1200 = vmatprep.subr.bf16.mxu1 %v4166_v44 }
  0x9c   : > { %1160 = vmatpush1.bf16.msra.mxu0 %v4169_v45  ;;  %1201 = vmatpush1.bf16.msra.mxu1 %v4173_v46  ;;  %v4197_v46 = vld [vmem:[#allocation3 + $0xc8] ss:$-80 sps:$4 sm:$0xff]  }
  0x9d   : > { %1161 = vmatprep.subr.bf16.mxu0 %v4175_v47  ;;  %1202 = vmatprep.subr.bf16.mxu1 %v4178_v58  ;;  %v965_v47 = vpack.c.bf16 %v676_v23, %v676_v23  ;;  %v3688_v23 = vmov 1983009808  }
  0xa0   : > { %1162 = vmatpush1.bf16.msra.mxu0 %v4181_v61  ;;  %1203 = vmatpush1.bf16.msra.mxu1 %v4185_v3 }
  0xa1   : > { %1163 = vmatprep.subr.bf16.mxu0 %v4187_v4  ;;  %1204 = vmatprep.subr.bf16.mxu1 %v4190_v8  ;;  %v5095_v8 = vmov 0  }
  0xa4   : > { %1164 = vmatpush1.bf16.msra.mxu0 %v4193_v9  ;;  %1205 = vmatpush1.bf16.msra.mxu1 %v4197_v46 }
  0xa5   : > { %1275 = vmatprep.subr.bf16.mxu0 %v4006_v20  ;;  %1316 = vmatprep.subr.bf16.mxu1 %v4012_v24 }
  0xa7   : > { %1182 = vmatmul.mubr.bf16.vlgmr.msra.gmra.mxu0 %v965_v47  ;;  %1223 = vmatmul.mubr.bf16.vlgmr.msra.gmra.mxu1 %v965_v47  ;;  %v844_v47 = vunpack.c.l.s4 %v3688_v23 }
  0xa8   : > { %1276 = vmatpush1.bf16.msra.mxu0 %v4008_v22  ;;  %1317 = vmatpush1.bf16.msra.mxu1 %v4014_v25 }
  0xa9   : > { %1277 = vmatprep.subr.bf16.mxu0 %v4016_v26  ;;  %1318 = vmatprep.subr.bf16.mxu1 %v4019_v27 }
  0xaa   : > { %1307 = vmatprep.mubr.bf16.mxu0 %v5095_v8  ;;  %1348 = vmatprep.mubr.bf16.mxu1 %v5095_v8 }
  0xac   : > { %1278 = vmatpush1.bf16.msra.mxu0 %v4021_v28  ;;  %1319 = vmatpush1.bf16.msra.mxu1 %v4025_v29 }
  0xad   : > { %1279 = vmatprep.subr.bf16.mxu0 %v4029_v30  ;;  %1320 = vmatprep.subr.bf16.mxu1 %v4032_v31 }
  0xb0   : > { %1280 = vmatpush1.bf16.msra.mxu0 %v4035_v32  ;;  %1321 = vmatpush1.bf16.msra.mxu1 %v4037_v33 }
  0xb1   : > { %1281 = vmatprep.subr.bf16.mxu0 %v4041_v34  ;;  %1322 = vmatprep.subr.bf16.mxu1 %v4044_v35 }
  0xb4   : > { %1282 = vmatpush1.bf16.msra.mxu0 %v4046_v36  ;;  %1323 = vmatpush1.bf16.msra.mxu1 %v4049_v37 }
  0xb5   : > { %1283 = vmatprep.subr.bf16.mxu0 %v4053_v38  ;;  %1324 = vmatprep.subr.bf16.mxu1 %v4056_v39 }
  0xb8   : > { %1284 = vmatpush1.bf16.msra.mxu0 %v4058_v40  ;;  %1325 = vmatpush1.bf16.msra.mxu1 %v4060_v41 }
  0xb9   : > { %1285 = vmatprep.subr.bf16.mxu0 %v4063_v42  ;;  %1326 = vmatprep.subr.bf16.mxu1 %v4067_v43 }
  0xbc   : > { %1286 = vmatpush1.bf16.msra.mxu0 %v4071_v48  ;;  %1327 = vmatpush1.bf16.msra.mxu1 %v4075_v49 }
  0xbd   : > { %1287 = vmatprep.subr.bf16.mxu0 %v4077_v50  ;;  %1328 = vmatprep.subr.bf16.mxu1 %v4080_v51  ;;  %v846_v50 = vlaneseq  ;;  %v4239_v51 = vld [vmem:[%s3807_s21] sm:$0xff]  }
  0xbe   : > { %5096 = vst [vmem:[#allocation45_spill] sm:$0xff] %v4239_v51 }
  0xbf   : > { %v847_v49 = vshrl.u32 %v846_v50, 7 }
  0xc0   : > { %1288 = vmatpush1.bf16.msra.mxu0 %v4083_v52  ;;  %1329 = vmatpush1.bf16.msra.mxu1 %v4087_v53  ;;  %v845_v52 = vunpack.c.0.s8 %v844_v47  ;;  %v680_v53 = vunpack.c.l.bf16 %v4239_v51 }
  0xc1   : > { %1289 = vmatprep.subr.bf16.mxu0 %v4089_v54  ;;  %1330 = vmatprep.subr.bf16.mxu1 %v4092_v55 }
  0xc2   : > { %v4242_v54 = vsub.s32 %v845_v52, %v847_v49  ;;  %v842_v55 = vcombine.high %v680_v53, %v680_v53 }
  0xc4   : > { %1290 = vmatpush1.bf16.msra.mxu0 %v4094_v56  ;;  %1331 = vmatpush1.bf16.msra.mxu1 %v4096_v57  ;;  %5097 = vst [vmem:[#allocation46_spill] sm:$0xff] %v4242_v54  ;;  %v849_v56 = vrot.slane %v680_v53, %v4242_v54  ;;  %v856_v57 = vrot.slane %v842_v55, %v4242_v54 }
  0xc5   : > { %1401 = vmatprep.subr.bf16.mxu0 %v4101_v59  ;;  %1442 = vmatprep.subr.bf16.mxu1 %v4104_v60 }
  0xc6   : > { %v857_v48 = vcombine.high %v849_v56, %v849_v56  ;;  %v858_v43 = vcombine.high %v856_v57, %v856_v57 }
 0x147   : > { %v897_v59 = vpop.f32.mrf.mxu0  ;;  %v938_v42 = vpop.f32.mrf.mxu1 }
 0x148   : > { %v898_v60 = vadd.f32 %v897_v59, %v849_v56  ;;  %v939_v55 = vadd.f32 %v938_v42, %v856_v57  ;;  %v4247_v59 = vld [vmem:[%s3809_s22 + $0x18] sm:$0xff]  }
 0x149   : > { %v899_v23 = vpop.f32.mrf.mxu0  ;;  %v940_v47 = vpop.f32.mrf.mxu1  ;;  %5098 = vst [vmem:[#allocation47_spill] sm:$0xff] %v4247_v59 }
 0x14a   : > { %v945_v41 = vmul.f32 0.5, %v898_v60  ;;  %v900_v40 = vadd.f32 %v899_v23, %v857_v48  ;;  %v941_v50 = vadd.f32 %v940_v47, %v858_v43  ;;  %v947_v38 = vmul.f32 0.5, %v939_v55  ;;  %v675_v43 = vld [vmem:[#allocation5] sm:$0x3] }
 0x14b   : > { %v901_v39 = vpop.f32.mrf.mxu0  ;;  %v942_v52 = vpop.f32.mrf.mxu1 }
 0x14c   : > { %3393 = vtanh.f32 %v945_v41  ;;  %v946_v49 = vmul.f32 0.5, %v900_v40  ;;  %v966_v40 = vunpack.c.h.bf16 %v4247_v59 }
 0x14d   : > { %v902_v51 = vpop.f32.mrf.mxu0  ;;  %v943_v53 = vpop.f32.mrf.mxu1 }
 0x14e   : > { %3395 = vtanh.f32 %v946_v49  ;;  %v1128_v47 = vcombine.high %v966_v40, %v966_v40  ;;  %v1135_v42 = vrot.slane %v966_v40, %v4242_v54 }
 0x14f   : > { %3397 = vtanh.f32 %v941_v50 }
 0x150   : > { %3399 = vtanh.f32 %v947_v38  ;;  %v1143_v57 = vcombine.high %v1135_v42, %v1135_v42 }
 0x159   : > { %v3394_v37 = vpop.eup %3393 }
 0x15a   : > { %v951_v36 = vmul.f32 0.5, %v3394_v37  ;;  %v1142_v37 = vrot.slane %v1128_v47, %v4242_v54 }
 0x15b   : > { %v3396_v56 = vpop.eup %3395 }
 0x15c   : > { %v3398_v60 = vpop.eup %3397  ;;  %v954_v48 = vadd.f32 0.5, %v951_v36  ;;  %v952_v23 = vmul.f32 0.5, %v3396_v56  ;;  %v1144_v52 = vcombine.high %v1142_v37, %v1142_v37 }
 0x15d   : > { %v3400_v53 = vpop.eup %3399 }
 0x15e   : > { %v955_v39 = vadd.f32 0.5, %v952_v23  ;;  %v959_v41 = vmul.f32 %v3398_v60, %v954_v48 }
 0x160   : > { %v958_v51 = vmul.f32 %v955_v39, %v675_v43  ;;  %v953_v43 = vmul.f32 0.5, %v3400_v53 }
 0x162   : > { %v4250_v49 = vadd.f32 %v959_v41, %v958_v51  ;;  %v956_v47 = vadd.f32 0.5, %v953_v43 }
 0x164   : > { %5099 = vst [vmem:[#allocation48_spill] sm:$0xff] %v4250_v49  ;;  %3401 = vtanh.f32 %v4250_v49 }
 0x167   : > { %v1183_v50 = vpop.f32.mrf.mxu0  ;;  %v1224_v38 = vpop.f32.mrf.mxu1 }
 0x168   : > { %v1184_v36 = vadd.f32 %v1183_v50, %v1135_v42  ;;  %v1225_v50 = vadd.f32 %v1224_v38, %v1142_v37 }
 0x169   : > { %v1185_v55 = vpop.f32.mrf.mxu0  ;;  %v1226_v48 = vpop.f32.mrf.mxu1 }
 0x16a   : > { %v1231_v56 = vmul.f32 0.5, %v1184_v36  ;;  %v1186_v60 = vadd.f32 %v1185_v55, %v1143_v57  ;;  %v1227_v41 = vadd.f32 %v1226_v48, %v1144_v52  ;;  %v1233_v57 = vmul.f32 0.5, %v1225_v50  ;;  %v677_v52 = vld [vmem:[#allocation7] sm:$0x3] }
 0x16b   : > { %v1187_v23 = vpop.f32.mrf.mxu0  ;;  %v1228_v40 = vpop.f32.mrf.mxu1  ;;  %v5106_v50 = vld [vmem:[#allocation24_spill] sm:$0xff] }
 0x16c   : > { %3403 = vtanh.f32 %v1231_v56  ;;  %v1232_v39 = vmul.f32 0.5, %v1186_v60  ;;  %v5100_v23 = vld [vmem:[#allocation42_spill] sm:$0xff]  ;;  %v5102_v40 = vld [vmem:[#allocation44_spill] sm:$0xff] }
 0x16d   : > { %v1188_v51 = vpop.f32.mrf.mxu0  ;;  %v1229_v49 = vpop.f32.mrf.mxu1 }
 0x16e   : > { %3405 = vtanh.f32 %v1232_v39  ;;  %v5101_v39 = vld [vmem:[#allocation43_spill] sm:$0xff] }
 0x16f   : > { %3407 = vtanh.f32 %v1227_v41 }
 0x170   : > { %3409 = vtanh.f32 %v1233_v57  ;;  %v5109_v57 = vld [vmem:[#allocation27_spill] sm:$0xff] }
 0x171   : > { %v3402_v59 = vpop.eup %3401 }
 0x172   : > { %v962_v42 = vmul.f32 %v3402_v59, %v956_v47 }
 0x174   : > { %v1251_v54 = vpack.c.bf16 %v962_v42, %v962_v42 }
 0x176   : > { %1308 = vmatmul.mubr.bf16.vlgmr.msra.gmra.mxu0 %v1251_v54  ;;  %1349 = vmatmul.mubr.bf16.vlgmr.msra.gmra.mxu1 %v1251_v54 }
 0x177   : > { %1402 = vmatpush1.bf16.msra.mxu0 %v4106_v62  ;;  %1443 = vmatpush1.bf16.msra.mxu1 %v4109_v63 }
 0x178   : > { %1403 = vmatprep.subr.bf16.mxu0 %v4113_v0  ;;  %1444 = vmatprep.subr.bf16.mxu1 %v4115_v1 }
 0x179   : > { %v3404_v36 = vpop.eup %3403  ;;  %1433 = vmatprep.mubr.bf16.mxu0 %v5095_v8  ;;  %1474 = vmatprep.mubr.bf16.mxu1 %v5095_v8 }
 0x17a   : > { %v1237_v49 = vmul.f32 0.5, %v3404_v36  ;;  %v5110_v36 = vld [vmem:[#allocation28_spill] sm:$0xff] }
 0x17b   : > { %v3406_v59 = vpop.eup %3405  ;;  %1404 = vmatpush1.bf16.msra.mxu0 %v4118_v2  ;;  %1445 = vmatpush1.bf16.msra.mxu1 %v4121_v5 }
 0x17c   : > { %v1240_v54 = vadd.f32 0.5, %v1237_v49  ;;  %v1238_v37 = vmul.f32 0.5, %v3406_v59  ;;  %1405 = vmatprep.subr.bf16.mxu0 %v4125_v6  ;;  %1446 = vmatprep.subr.bf16.mxu1 %v4128_v7  ;;  %v3408_v38 = vpop.eup %3407  ;;  %v5111_v49 = vld [vmem:[#allocation29_spill] sm:$0xff]  ;;  %v5112_v59 = vld [vmem:[#allocation30_spill] sm:$0xff] }
 0x17d   : > { %v3410_v48 = vpop.eup %3409 }
 0x17e   : > { %v1241_v53 = vadd.f32 0.5, %v1238_v37  ;;  %v1245_v56 = vmul.f32 %v3408_v38, %v1240_v54  ;;  %v1239_v43 = vmul.f32 0.5, %v3410_v48  ;;  %v5113_v54 = vld [vmem:[#allocation31_spill] sm:$0xff]  ;;  %v5114_v37 = vld [vmem:[#allocation32_spill] sm:$0xff]  ;;  %v5115_v38 = vld [vmem:[#allocation33_spill] sm:$0xff] }
 0x17f   : > { %1406 = vmatpush1.bf16.msra.mxu0 %v4133_v10  ;;  %1447 = vmatpush1.bf16.msra.mxu1 %v4137_v11  ;;  %v5120_v48 = vld [vmem:[#allocation38_spill] sm:$0xff] }
 0x180   : > { %v1244_v55 = vmul.f32 %v1241_v53, %v677_v52  ;;  %1407 = vmatprep.subr.bf16.mxu0 %v4139_v12  ;;  %1448 = vmatprep.subr.bf16.mxu1 %v4142_v13  ;;  %v1242_v41 = vadd.f32 0.5, %v1239_v43  ;;  %v5116_v52 = vld [vmem:[#allocation34_spill] sm:$0xff]  ;;  %v5117_v53 = vld [vmem:[#allocation35_spill] sm:$0xff] }
 0x181   : > { %v5121_v43 = vld [vmem:[#allocation39_spill] sm:$0xff] }
 0x182   : > { %v4269_v60 = vadd.f32 %v1245_v56, %v1244_v55  ;;  %v5118_v55 = vld [vmem:[#allocation36_spill] sm:$0xff]  ;;  %v5119_v56 = vld [vmem:[#allocation37_spill] sm:$0xff] }
 0x183   : > { %1408 = vmatpush1.bf16.msra.mxu0 %v4145_v14  ;;  %1449 = vmatpush1.bf16.msra.mxu1 %v4149_v15 }
 0x184   : > { %3411 = vtanh.f32 %v4269_v60  ;;  %1409 = vmatprep.subr.bf16.mxu0 %v4151_v16  ;;  %1450 = vmatprep.subr.bf16.mxu1 %v4154_v17 }
 0x187   : > { %1410 = vmatpush1.bf16.msra.mxu0 %v4157_v18  ;;  %1451 = vmatpush1.bf16.msra.mxu1 %v4161_v19 }
 0x188   : > { %1411 = vmatprep.subr.bf16.mxu0 %v4163_v21  ;;  %1452 = vmatprep.subr.bf16.mxu1 %v4166_v44 }
 0x18b   : > { %1412 = vmatpush1.bf16.msra.mxu0 %v4169_v45  ;;  %1453 = vmatpush1.bf16.msra.mxu1 %v5100_v23 }
 0x18c   : > { %1413 = vmatprep.subr.bf16.mxu0 %v5101_v39  ;;  %1454 = vmatprep.subr.bf16.mxu1 %v4178_v58 }
 0x18f   : > { %1414 = vmatpush1.bf16.msra.mxu0 %v4181_v61  ;;  %1455 = vmatpush1.bf16.msra.mxu1 %v4185_v3 }
 0x190   : > { %1415 = vmatprep.subr.bf16.mxu0 %v4187_v4  ;;  %1456 = vmatprep.subr.bf16.mxu1 %v5102_v40 }
 0x191   : > { %v3412_v51 = vpop.eup %3411 }
 0x192   : > { %v4288_v47 = vmul.f32 %v3412_v51, %v1242_v41  ;;  %v5122_v41 = vld [vmem:[#allocation40_spill] sm:$0xff]  ;;  %v5123_v51 = vld [vmem:[#allocation41_spill] sm:$0xff] }
 0x193   : > { %1416 = vmatpush1.bf16.msra.mxu0 %v4193_v9  ;;  %1457 = vmatpush1.bf16.msra.mxu1 %v4197_v46 }
 0x194   : > { %5103 = vst [vmem:[#allocation42_spill] sm:$0xff] %v4288_v47  ;;  %v1377_v42 = vpack.c.bf16 %v4288_v47, %v4288_v47  ;;  %1527 = vmatprep.subr.bf16.mxu0 %v4006_v20  ;;  %1568 = vmatprep.subr.bf16.mxu1 %v4012_v24 }
 0x196   : > { %1434 = vmatmul.mubr.bf16.vlgmr.msra.gmra.mxu0 %v1377_v42  ;;  %1475 = vmatmul.mubr.bf16.vlgmr.msra.gmra.mxu1 %v1377_v42  ;;  %v5124_v42 = vld [vmem:[#allocation45_spill] sm:$0xff] }
 0x197   : > { %1528 = vmatpush1.bf16.msra.mxu0 %v4008_v22  ;;  %1569 = vmatpush1.bf16.msra.mxu1 %v4014_v25  ;;  %v1252_v47 = vunpack.c.h.bf16 %v5124_v42 }
 0x198   : > { %1529 = vmatprep.subr.bf16.mxu0 %v4016_v26  ;;  %1570 = vmatprep.subr.bf16.mxu1 %v4019_v27  ;;  %v5104_v26 = vld [vmem:[#allocation22_spill] sm:$0xff]  ;;  %v5105_v27 = vld [vmem:[#allocation23_spill] sm:$0xff] }
 0x199   : > { %1559 = vmatprep.mubr.bf16.mxu0 %v5095_v8  ;;  %1600 = vmatprep.mubr.bf16.mxu1 %v5095_v8 }
 0x19b   : > { %1530 = vmatpush1.bf16.msra.mxu0 %v4021_v28  ;;  %1571 = vmatpush1.bf16.msra.mxu1 %v4025_v29  ;;  %v5107_v28 = vld [vmem:[#allocation25_spill] sm:$0xff]  ;;  %v5108_v29 = vld [vmem:[#allocation26_spill] sm:$0xff] }
 0x19c   : > { %1531 = vmatprep.subr.bf16.mxu0 %v4029_v30  ;;  %1572 = vmatprep.subr.bf16.mxu1 %v4032_v31 }
 0x19f   : > { %1532 = vmatpush1.bf16.msra.mxu0 %v4035_v32  ;;  %1573 = vmatpush1.bf16.msra.mxu1 %v4037_v33 }
 0x1a0   : > { %1533 = vmatprep.subr.bf16.mxu0 %v4041_v34  ;;  %1574 = vmatprep.subr.bf16.mxu1 %v4044_v35 }
 0x1a3   : > { %1534 = vmatpush1.bf16.msra.mxu0 %v5104_v26  ;;  %1575 = vmatpush1.bf16.msra.mxu1 %v5105_v27 }
 0x1a4   : > { %1535 = vmatprep.subr.bf16.mxu0 %v5106_v50  ;;  %1576 = vmatprep.subr.bf16.mxu1 %v5107_v28 }
 0x1a7   : > { %1536 = vmatpush1.bf16.msra.mxu0 %v5108_v29  ;;  %1577 = vmatpush1.bf16.msra.mxu1 %v5109_v57 }
 0x1a8   : > { %1537 = vmatprep.subr.bf16.mxu0 %v5110_v36  ;;  %1578 = vmatprep.subr.bf16.mxu1 %v5111_v49 }
 0x1ab   : > { %1538 = vmatpush1.bf16.msra.mxu0 %v5112_v59  ;;  %1579 = vmatpush1.bf16.msra.mxu1 %v5113_v54  ;;  %v1254_v54 = vcombine.high %v1252_v47, %v1252_v47 }
 0x1ac   : > { %1539 = vmatprep.subr.bf16.mxu0 %v5114_v37  ;;  %1580 = vmatprep.subr.bf16.mxu1 %v5115_v38  ;;  %v5125_v37 = vld [vmem:[#allocation46_spill] sm:$0xff] }
 0x1ad   : > { %v1261_v38 = vrot.slane %v1252_v47, %v5125_v37 }
 0x1af   : > { %1540 = vmatpush1.bf16.msra.mxu0 %v5116_v52  ;;  %1581 = vmatpush1.bf16.msra.mxu1 %v5117_v53  ;;  %v1268_v52 = vrot.slane %v1254_v54, %v5125_v37  ;;  %v1269_v53 = vcombine.high %v1261_v38, %v1261_v38 }
 0x1b0   : > { %1541 = vmatprep.subr.bf16.mxu0 %v5118_v55  ;;  %1582 = vmatprep.subr.bf16.mxu1 %v5119_v56 }
 0x1b3   : > { %1542 = vmatpush1.bf16.msra.mxu0 %v5120_v48  ;;  %1583 = vmatpush1.bf16.msra.mxu1 %v5121_v43  ;;  %v1270_v43 = vcombine.high %v1268_v52, %v1268_v52 }
 0x1b4   : > { %1653 = vmatprep.subr.bf16.mxu0 %v5122_v41  ;;  %1694 = vmatprep.subr.bf16.mxu1 %v5123_v51 }
 0x236   : > { %v1309_v59 = vpop.f32.mrf.mxu0  ;;  %v1350_v55 = vpop.f32.mrf.mxu1 }
 0x237   : > { %v1310_v49 = vadd.f32 %v1309_v59, %v1261_v38  ;;  %v1351_v47 = vadd.f32 %v1350_v55, %v1268_v52 }
 0x238   : > { %v1311_v56 = vpop.f32.mrf.mxu0  ;;  %v1352_v36 = vpop.f32.mrf.mxu1 }
 0x239   : > { %v1357_v48 = vmul.f32 0.5, %v1310_v49  ;;  %v1312_v57 = vadd.f32 %v1311_v56, %v1269_v53  ;;  %v1353_v50 = vadd.f32 %v1352_v36, %v1270_v43  ;;  %v1359_v54 = vmul.f32 0.5, %v1351_v47  ;;  %v5126_v53 = vld [vmem:[#allocation47_spill] sm:$0xff] }
 0x23a   : > { %v1313_v29 = vpop.f32.mrf.mxu0  ;;  %v1354_v41 = vpop.f32.mrf.mxu1  ;;  %v1378_v56 = vunpack.c.l.bf16 %v5126_v53 }
 0x23b   : > { %3413 = vtanh.f32 %v1357_v48  ;;  %v1358_v51 = vmul.f32 0.5, %v1312_v57  ;;  %v5127_v41 = vld [vmem:[#allocation48_spill] sm:$0xff] }
 0x23c   : > { %v1314_v28 = vpop.f32.mrf.mxu0  ;;  %v1355_v42 = vpop.f32.mrf.mxu1  ;;  %v1387_v36 = vrot.slane %v1378_v56, %v5125_v37 }
 0x23d   : > { %3415 = vtanh.f32 %v1358_v51 }
 0x23e   : > { %3417 = vtanh.f32 %v1353_v50  ;;  %v1380_v50 = vcombine.high %v1378_v56, %v1378_v56  ;;  %v1395_v52 = vcombine.high %v1387_v36, %v1387_v36 }
 0x23f   : > { %3419 = vtanh.f32 %v1359_v54 }
 0x248   : > { %v3414_v27 = vpop.eup %3413 }
 0x249   : > { %v1363_v26 = vmul.f32 0.5, %v3414_v27  ;;  %v1394_v27 = vrot.slane %v1380_v50, %v5125_v37 }
 0x24a   : > { %v3416_v35 = vpop.eup %3415 }
 0x24b   : > { %v1366_v59 = vadd.f32 0.5, %v1363_v26  ;;  %v1364_v38 = vmul.f32 0.5, %v3416_v35  ;;  %v3418_v29 = vpop.eup %3417 }
 0x24c   : > { %v3420_v43 = vpop.eup %3419 }
 0x24d   : > { %v1367_v49 = vadd.f32 0.5, %v1364_v38  ;;  %v1371_v57 = vmul.f32 %v3418_v29, %v1366_v59  ;;  %v1396_v38 = vcombine.high %v1394_v27, %v1394_v27  ;;  %v1365_v53 = vmul.f32 0.5, %v3420_v43 }
 0x24f   : > { %v1370_v48 = vmul.f32 %v1367_v49, %v5127_v41 }
 0x251   : > { %v4335_v28 = vadd.f32 %v1371_v57, %v1370_v48  ;;  %v1368_v57 = vadd.f32 0.5, %v1365_v53  ;;  %v4380_v53 = vld [vmem:[#allocation2 + $0xac] ss:$-152 sps:$4 sm:$0xff]  }
 0x253   : > { %5128 = vst [vmem:[#allocation43_spill] sm:$0xff] %v4335_v28  ;;  %3421 = vtanh.f32 %v4335_v28 }
 0x256   : > { %v1435_v26 = vpop.f32.mrf.mxu0  ;;  %v1476_v55 = vpop.f32.mrf.mxu1 }
 0x257   : > { %v1436_v35 = vadd.f32 %v1435_v26, %v1387_v36  ;;  %v1477_v36 = vadd.f32 %v1476_v55, %v1394_v27 }
 0x258   : > { %v1437_v51 = vpop.f32.mrf.mxu0  ;;  %v1478_v42 = vpop.f32.mrf.mxu1 }
 0x259   : > { %v1483_v47 = vmul.f32 0.5, %v1436_v35  ;;  %v1438_v54 = vadd.f32 %v1437_v51, %v1395_v52  ;;  %v1479_v48 = vadd.f32 %v1478_v42, %v1396_v38  ;;  %v1485_v52 = vmul.f32 0.5, %v1477_v36  ;;  %v5132_v36 = vld [vmem:[#allocation24_spill] sm:$0xff] }
 0x25a   : > { %v1439_v59 = vpop.f32.mrf.mxu0  ;;  %v1480_v49 = vpop.f32.mrf.mxu1 }
 0x25b   : > { %3423 = vtanh.f32 %v1483_v47  ;;  %v1484_v29 = vmul.f32 0.5, %v1438_v54 }
 0x25c   : > { %v1440_v56 = vpop.f32.mrf.mxu0  ;;  %v1481_v41 = vpop.f32.mrf.mxu1 }
 0x25d   : > { %3425 = vtanh.f32 %v1484_v29  ;;  %v4383_v29 = vld [vmem:[#allocation2 + $0xd4] ss:$-168 sps:$4 sm:$0xff]   ;;  %v4388_v56 = vld [vmem:[#allocation2 + $0xa8] ss:$-152 sps:$4 sm:$0xff]  }
 0x25e   : > { %3427 = vtanh.f32 %v1479_v48  ;;  %v4391_v41 = vld [vmem:[#allocation2 + $0xd0] ss:$-168 sps:$4 sm:$0xff]  }
 0x25f   : > { %3429 = vtanh.f32 %v1485_v52  ;;  %v5129_v48 = vld [vmem:[#allocation21_spill] sm:$0xff]  ;;  %v5134_v52 = vld [vmem:[#allocation26_spill] sm:$0xff] }
 0x260   : > { %v3422_v50 = vpop.eup %3421 }
 0x261   : > { %v1374_v28 = vmul.f32 %v3422_v50, %v1368_v57  ;;  %v5130_v57 = vld [vmem:[#allocation22_spill] sm:$0xff]  ;;  %v5131_v50 = vld [vmem:[#allocation23_spill] sm:$0xff] }
 0x263   : > { %v1503_v26 = vpack.c.bf16 %v1374_v28, %v1374_v28 }
 0x265   : > { %1560 = vmatmul.mubr.bf16.vlgmr.msra.gmra.mxu0 %v1503_v26  ;;  %1601 = vmatmul.mubr.bf16.vlgmr.msra.gmra.mxu1 %v1503_v26  ;;  %v5133_v26 = vld [vmem:[#allocation25_spill] sm:$0xff] }
 0x266   : > { %1654 = vmatpush1.bf16.msra.mxu0 %v4106_v62  ;;  %1695 = vmatpush1.bf16.msra.mxu1 %v4109_v63 }
 0x267   : > { %1655 = vmatprep.subr.bf16.mxu0 %v4113_v0  ;;  %1696 = vmatprep.subr.bf16.mxu1 %v4115_v1 }
 0x268   : > { %v3424_v35 = vpop.eup %3423  ;;  %1685 = vmatprep.mubr.bf16.mxu0 %v5095_v8  ;;  %1726 = vmatprep.mubr.bf16.mxu1 %v5095_v8 }
 0x269   : > { %v1489_v43 = vmul.f32 0.5, %v3424_v35  ;;  %v5140_v35 = vld [vmem:[#allocation32_spill] sm:$0xff] }
 0x26a   : > { %v3426_v51 = vpop.eup %3425  ;;  %1656 = vmatpush1.bf16.msra.mxu0 %v4118_v2  ;;  %1697 = vmatpush1.bf16.msra.mxu1 %v4121_v5 }
 0x26b   : > { %v1492_v28 = vadd.f32 0.5, %v1489_v43  ;;  %v1490_v62 = vmul.f32 0.5, %v3426_v51  ;;  %1657 = vmatprep.subr.bf16.mxu0 %v4125_v6  ;;  %1698 = vmatprep.subr.bf16.mxu1 %v4128_v7  ;;  %v3428_v27 = vpop.eup %3427  ;;  %v5141_v43 = vld [vmem:[#allocation33_spill] sm:$0xff]  ;;  %v5142_v51 = vld [vmem:[#allocation34_spill] sm:$0xff] }
 0x26d   : > { %v1493_v63 = vadd.f32 0.5, %v1490_v62  ;;  %v1497_v42 = vmul.f32 %v3428_v27, %v1492_v28  ;;  %v5143_v28 = vld [vmem:[#allocation35_spill] sm:$0xff]  ;;  %v5144_v62 = vld [vmem:[#allocation36_spill] sm:$0xff]  ;;  %v5146_v27 = vld [vmem:[#allocation38_spill] sm:$0xff] }
 0x26e   : > { %1658 = vmatpush1.bf16.msra.mxu0 %v4133_v10  ;;  %1699 = vmatpush1.bf16.msra.mxu1 %v4137_v11 }
 0x26f   : > { %v1496_v55 = vmul.f32 %v1493_v63, %v4269_v60  ;;  %1659 = vmatprep.subr.bf16.mxu0 %v4139_v12  ;;  %1700 = vmatprep.subr.bf16.mxu1 %v4142_v13  ;;  %v3430_v60 = vpop.eup %3429  ;;  %v5145_v63 = vld [vmem:[#allocation37_spill] sm:$0xff] }
 0x270   : > { %v1491_v47 = vmul.f32 0.5, %v3430_v60  ;;  %v5149_v60 = vld [vmem:[#allocation41_spill] sm:$0xff] }
 0x271   : > { %v4355_v2 = vadd.f32 %v1497_v42, %v1496_v55  ;;  %v5147_v55 = vld [vmem:[#allocation39_spill] sm:$0xff]  ;;  %v5148_v42 = vld [vmem:[#allocation40_spill] sm:$0xff] }
 0x272   : > { %1660 = vmatpush1.bf16.msra.mxu0 %v4145_v14  ;;  %1701 = vmatpush1.bf16.msra.mxu1 %v4149_v15  ;;  %v1494_v54 = vadd.f32 0.5, %v1491_v47  ;;  %v4421_v47 = vld [vmem:[%s3807_s21 + $0x8] sm:$0xff]  }
 0x273   : > { %3431 = vtanh.f32 %v4355_v2  ;;  %1661 = vmatprep.subr.bf16.mxu0 %v4151_v16  ;;  %1702 = vmatprep.subr.bf16.mxu1 %v4154_v17 }
 0x276   : > { %1662 = vmatpush1.bf16.msra.mxu0 %v4157_v18  ;;  %1703 = vmatpush1.bf16.msra.mxu1 %v4161_v19 }
 0x277   : > { %1663 = vmatprep.subr.bf16.mxu0 %v4163_v21  ;;  %1704 = vmatprep.subr.bf16.mxu1 %v4166_v44 }
 0x27a   : > { %1664 = vmatpush1.bf16.msra.mxu0 %v4169_v45  ;;  %1705 = vmatpush1.bf16.msra.mxu1 %v5100_v23 }
 0x27b   : > { %1665 = vmatprep.subr.bf16.mxu0 %v5101_v39  ;;  %1706 = vmatprep.subr.bf16.mxu1 %v4178_v58 }
 0x27e   : > { %1666 = vmatpush1.bf16.msra.mxu0 %v4181_v61  ;;  %1707 = vmatpush1.bf16.msra.mxu1 %v4185_v3 }
 0x27f   : > { %1667 = vmatprep.subr.bf16.mxu0 %v4187_v4  ;;  %1708 = vmatprep.subr.bf16.mxu1 %v5102_v40 }
 0x280   : > { %v3432_v38 = vpop.eup %3431 }
 0x281   : > { %v1500_v59 = vmul.f32 %v3432_v38, %v1494_v54  ;;  %v1504_v54 = vunpack.c.l.bf16 %v4421_v47 }
 0x282   : > { %1668 = vmatpush1.bf16.msra.mxu0 %v4193_v9  ;;  %1709 = vmatpush1.bf16.msra.mxu1 %v4197_v46 }
 0x283   : > { %v1629_v49 = vpack.c.bf16 %v1500_v59, %v1500_v59  ;;  %1779 = vmatprep.subr.bf16.mxu0 %v4006_v20  ;;  %1820 = vmatprep.subr.bf16.mxu1 %v4012_v24  ;;  %v1513_v38 = vrot.slane %v1504_v54, %v5125_v37  ;;  %v1506_v59 = vcombine.high %v1504_v54, %v1504_v54 }
 0x285   : > { %1686 = vmatmul.mubr.bf16.vlgmr.msra.gmra.mxu0 %v1629_v49  ;;  %1727 = vmatmul.mubr.bf16.vlgmr.msra.gmra.mxu1 %v1629_v49  ;;  %v1520_v49 = vrot.slane %v1506_v59, %v5125_v37 }
 0x286   : > { %1780 = vmatpush1.bf16.msra.mxu0 %v4008_v22  ;;  %1821 = vmatpush1.bf16.msra.mxu1 %v4014_v25 }
 0x287   : > { %1781 = vmatprep.subr.bf16.mxu0 %v4380_v53  ;;  %1822 = vmatprep.subr.bf16.mxu1 %v4383_v29 }
 0x288   : > { %1811 = vmatprep.mubr.bf16.mxu0 %v5095_v8  ;;  %1852 = vmatprep.mubr.bf16.mxu1 %v5095_v8 }
 0x28a   : > { %1782 = vmatpush1.bf16.msra.mxu0 %v4388_v56  ;;  %1823 = vmatpush1.bf16.msra.mxu1 %v4391_v41 }
 0x28b   : > { %1783 = vmatprep.subr.bf16.mxu0 %v4029_v30  ;;  %1824 = vmatprep.subr.bf16.mxu1 %v4032_v31  ;;  %v5135_v30 = vld [vmem:[#allocation27_spill] sm:$0xff]  ;;  %v5136_v31 = vld [vmem:[#allocation28_spill] sm:$0xff] }
 0x28e   : > { %1784 = vmatpush1.bf16.msra.mxu0 %v4035_v32  ;;  %1825 = vmatpush1.bf16.msra.mxu1 %v4037_v33  ;;  %v5137_v32 = vld [vmem:[#allocation29_spill] sm:$0xff]  ;;  %v5138_v33 = vld [vmem:[#allocation30_spill] sm:$0xff] }
 0x28f   : > { %1785 = vmatprep.subr.bf16.mxu0 %v4041_v34  ;;  %1826 = vmatprep.subr.bf16.mxu1 %v5129_v48  ;;  %v5139_v34 = vld [vmem:[#allocation31_spill] sm:$0xff]  ;;  %v1521_v48 = vcombine.high %v1513_v38, %v1513_v38 }
 0x292   : > { %1786 = vmatpush1.bf16.msra.mxu0 %v5130_v57  ;;  %1827 = vmatpush1.bf16.msra.mxu1 %v5131_v50 }
 0x293   : > { %1787 = vmatprep.subr.bf16.mxu0 %v5132_v36  ;;  %1828 = vmatprep.subr.bf16.mxu1 %v5133_v26 }
 0x296   : > { %1788 = vmatpush1.bf16.msra.mxu0 %v5134_v52  ;;  %1829 = vmatpush1.bf16.msra.mxu1 %v5135_v30 }
 0x297   : > { %1789 = vmatprep.subr.bf16.mxu0 %v5136_v31  ;;  %1830 = vmatprep.subr.bf16.mxu1 %v5137_v32  ;;  %v1522_v32 = vcombine.high %v1520_v49, %v1520_v49 }
 0x29a   : > { %1790 = vmatpush1.bf16.msra.mxu0 %v5138_v33  ;;  %1831 = vmatpush1.bf16.msra.mxu1 %v5139_v34 }
 0x29b   : > { %1791 = vmatprep.subr.bf16.mxu0 %v5140_v35  ;;  %1832 = vmatprep.subr.bf16.mxu1 %v5141_v43 }
 0x29e   : > { %1792 = vmatpush1.bf16.msra.mxu0 %v5142_v51  ;;  %1833 = vmatpush1.bf16.msra.mxu1 %v5143_v28 }
 0x29f   : > { %1793 = vmatprep.subr.bf16.mxu0 %v5144_v62  ;;  %1834 = vmatprep.subr.bf16.mxu1 %v5145_v63 }
 0x2a2   : > { %1794 = vmatpush1.bf16.msra.mxu0 %v5146_v27  ;;  %1835 = vmatpush1.bf16.msra.mxu1 %v5147_v55 }
 0x2a3   : > { %1905 = vmatprep.subr.bf16.mxu0 %v5148_v42  ;;  %1946 = vmatprep.subr.bf16.mxu1 %v5149_v60 }
 0x325   : > { %v1561_v57 = vpop.f32.mrf.mxu0  ;;  %v1602_v50 = vpop.f32.mrf.mxu1 }
 0x326   : > { %v1562_v36 = vadd.f32 %v1561_v57, %v1513_v38  ;;  %v1603_v42 = vadd.f32 %v1602_v50, %v1520_v49  ;;  %v4427_v57 = vld [vmem:[%s3809_s22 + $0x10] sm:$0xff]  }
 0x327   : > { %v1563_v26 = vpop.f32.mrf.mxu0  ;;  %v1604_v52 = vpop.f32.mrf.mxu1  ;;  %5150 = vst [vmem:[#allocation44_spill] sm:$0xff] %v4427_v57 }
 0x328   : > { %v1609_v30 = vmul.f32 0.5, %v1562_v36  ;;  %v1564_v31 = vadd.f32 %v1563_v26, %v1521_v48  ;;  %v1605_v55 = vadd.f32 %v1604_v52, %v1522_v32  ;;  %v1611_v60 = vmul.f32 0.5, %v1603_v42 }
 0x329   : > { %v1565_v33 = vpop.f32.mrf.mxu0  ;;  %v1606_v34 = vpop.f32.mrf.mxu1 }
 0x32a   : > { %3433 = vtanh.f32 %v1609_v30  ;;  %v1610_v62 = vmul.f32 0.5, %v1564_v31  ;;  %v1630_v33 = vunpack.c.h.bf16 %v4427_v57  ;;  %v5151_v31 = vld [vmem:[#allocation43_spill] sm:$0xff] }
 0x32b   : > { %v1566_v63 = vpop.f32.mrf.mxu0  ;;  %v1607_v27 = vpop.f32.mrf.mxu1 }
 0x32c   : > { %3435 = vtanh.f32 %v1610_v62  ;;  %v1639_v49 = vrot.slane %v1630_v33, %v5125_v37  ;;  %v1632_v50 = vcombine.high %v1630_v33, %v1630_v33 }
 0x32d   : > { %3437 = vtanh.f32 %v1605_v55 }
 0x32e   : > { %3439 = vtanh.f32 %v1611_v60  ;;  %v1646_v52 = vrot.slane %v1632_v50, %v5125_v37  ;;  %v1647_v32 = vcombine.high %v1639_v49, %v1639_v49 }
 0x337   : > { %v3434_v54 = vpop.eup %3433 }
 0x338   : > { %v1615_v59 = vmul.f32 0.5, %v3434_v54 }
 0x339   : > { %v3436_v38 = vpop.eup %3435 }
 0x33a   : > { %v1618_v36 = vadd.f32 0.5, %v1615_v59  ;;  %v1616_v48 = vmul.f32 0.5, %v3436_v38  ;;  %v3438_v30 = vpop.eup %3437 }
 0x33b   : > { %v3440_v60 = vpop.eup %3439 }
 0x33c   : > { %v1619_v26 = vadd.f32 0.5, %v1616_v48  ;;  %v1623_v63 = vmul.f32 %v3438_v30, %v1618_v36 }
 0x33e   : > { %v1622_v34 = vmul.f32 %v1619_v26, %v5151_v31  ;;  %v1648_v26 = vcombine.high %v1646_v52, %v1646_v52  ;;  %v1617_v31 = vmul.f32 0.5, %v3440_v60 }
 0x340   : > { %v4431_v62 = vadd.f32 %v1623_v63, %v1622_v34  ;;  %v1620_v50 = vadd.f32 0.5, %v1617_v31  ;;  %v4549_v31 = vld [vmem:[#allocation2] ss:$24 sps:$4 sm:$0xff]  }
 0x341   : > { %5167 = vst [vmem:[#allocation37_spill] sm:$0xff] %v4549_v31 }
 0x342   : > { %5152 = vst [vmem:[#allocation45_spill] sm:$0xff] %v4431_v62  ;;  %3441 = vtanh.f32 %v4431_v62 }
 0x345   : > { %v1687_v27 = vpop.f32.mrf.mxu0  ;;  %v1728_v55 = vpop.f32.mrf.mxu1 }
 0x346   : > { %v1688_v42 = vadd.f32 %v1687_v27, %v1639_v49  ;;  %v1729_v49 = vadd.f32 %v1728_v55, %v1646_v52 }
 0x347   : > { %v1689_v54 = vpop.f32.mrf.mxu0  ;;  %v1730_v59 = vpop.f32.mrf.mxu1 }
 0x348   : > { %v1735_v38 = vmul.f32 0.5, %v1688_v42  ;;  %v1690_v48 = vadd.f32 %v1689_v54, %v1647_v32  ;;  %v1731_v62 = vadd.f32 %v1730_v59, %v1648_v26  ;;  %v4436_v42 = vld [vmem:[#allocation3 + $0xb8] ss:$-144 sps:$4 sm:$0xff]   ;;  %v1737_v60 = vmul.f32 0.5, %v1729_v49  ;;  %v4540_v26 = vld [vmem:[#allocation2 + $0xb4] ss:$40 sps:$4 sm:$0xff]  }
 0x349   : > { %v1691_v36 = vpop.f32.mrf.mxu0  ;;  %v1732_v30 = vpop.f32.mrf.mxu1  ;;  %v4439_v32 = vld [vmem:[#allocation3] ss:$152 sps:$4 sm:$0xff]   ;;  %5164 = vst [vmem:[#allocation30_spill] sm:$0xff] %v4540_v26 }
 0x34a   : > { %3443 = vtanh.f32 %v1735_v38  ;;  %v1736_v34 = vmul.f32 0.5, %v1690_v48  ;;  %v4533_v48 = vld [vmem:[#allocation2 + $0x88] ss:$48 sps:$4 sm:$0xff]   ;;  %v4543_v36 = vld [vmem:[#allocation2 + $0x4] ss:$24 sps:$4 sm:$0xff]  }
 0x34b   : > { %v1692_v33 = vpop.f32.mrf.mxu0  ;;  %v1733_v63 = vpop.f32.mrf.mxu1  ;;  %5163 = vst [vmem:[#allocation29_spill] sm:$0xff] %v4533_v48  ;;  %5165 = vst [vmem:[#allocation31_spill] sm:$0xff] %v4543_v36  ;;  %v4546_v30 = vld [vmem:[#allocation2 + $0xb0] ss:$40 sps:$4 sm:$0xff]  }
 0x34c   : > { %3445 = vtanh.f32 %v1736_v34  ;;  %5166 = vst [vmem:[#allocation36_spill] sm:$0xff] %v4546_v30  ;;  %v4552_v34 = vld [vmem:[#allocation3 + $0xbc] ss:$-144 sps:$4 sm:$0xff]   ;;  %v1756_v63 = vunpack.c.h.bf16 %v4421_v47 }
 0x34d   : > { %3447 = vtanh.f32 %v1731_v62  ;;  %v4446_v62 = vld [vmem:[#allocation3 + $0x88] ss:$112 sps:$4 sm:$0xff]   ;;  %5168 = vst [vmem:[#allocation38_spill] sm:$0xff] %v4552_v34  ;;  %v4555_v33 = vld [vmem:[#allocation3 + $0x4] ss:$152 sps:$4 sm:$0xff]  }
 0x34e   : > { %3449 = vtanh.f32 %v1737_v60  ;;  %5169 = vst [vmem:[#allocation39_spill] sm:$0xff] %v4555_v33 }
 0x34f   : > { %v3442_v57 = vpop.eup %3441 }
 0x350   : > { %v1626_v37 = vmul.f32 %v3442_v57, %v1620_v50  ;;  %v5170_v50 = vld [vmem:[#allocation46_spill] sm:$0xff] }
 0x351   : > { %v1765_v49 = vrot.slane %v1756_v63, %v5170_v50 }
 0x352   : > { %v1755_v27 = vpack.c.bf16 %v1626_v37, %v1626_v37 }
 0x354   : > { %1812 = vmatmul.mubr.bf16.vlgmr.msra.gmra.mxu0 %v1755_v27  ;;  %1853 = vmatmul.mubr.bf16.vlgmr.msra.gmra.mxu1 %v1755_v27  ;;  %v1758_v27 = vcombine.high %v1756_v63, %v1756_v63 }
 0x355   : > { %1906 = vmatpush1.bf16.msra.mxu0 %v4436_v42  ;;  %1947 = vmatpush1.bf16.msra.mxu1 %v4439_v32 }
 0x356   : > { %1907 = vmatprep.subr.bf16.mxu0 %v4113_v0  ;;  %1948 = vmatprep.subr.bf16.mxu1 %v4115_v1  ;;  %v1772_v60 = vrot.slane %v1758_v27, %v5170_v50 }
 0x357   : > { %v3444_v54 = vpop.eup %3443  ;;  %1937 = vmatprep.mubr.bf16.mxu0 %v5095_v8  ;;  %1978 = vmatprep.mubr.bf16.mxu1 %v5095_v8 }
 0x358   : > { %v1741_v37 = vmul.f32 0.5, %v3444_v54  ;;  %v1773_v54 = vcombine.high %v1765_v49, %v1765_v49 }
 0x359   : > { %v3446_v57 = vpop.eup %3445  ;;  %1908 = vmatpush1.bf16.msra.mxu0 %v4446_v62  ;;  %1949 = vmatpush1.bf16.msra.mxu1 %v4121_v5 }
 0x35a   : > { %v1744_v52 = vadd.f32 0.5, %v1741_v37  ;;  %v1742_v55 = vmul.f32 0.5, %v3446_v57  ;;  %1909 = vmatprep.subr.bf16.mxu0 %v4125_v6  ;;  %1950 = vmatprep.subr.bf16.mxu1 %v4128_v7  ;;  %v3448_v1 = vpop.eup %3447 }
 0x35b   : > { %v3450_v6 = vpop.eup %3449 }
 0x35c   : > { %v1745_v0 = vadd.f32 0.5, %v1742_v55  ;;  %v1749_v38 = vmul.f32 %v3448_v1, %v1744_v52 }
 0x35d   : > { %1910 = vmatpush1.bf16.msra.mxu0 %v4133_v10  ;;  %1951 = vmatpush1.bf16.msra.mxu1 %v4137_v11  ;;  %v1743_v10 = vmul.f32 0.5, %v3450_v6 }
 0x35e   : > { %v1748_v59 = vmul.f32 %v1745_v0, %v4355_v2  ;;  %1911 = vmatprep.subr.bf16.mxu0 %v4139_v12  ;;  %1952 = vmatprep.subr.bf16.mxu1 %v4142_v13  ;;  %v4530_v2 = vld [vmem:[#allocation2 + $0x80] ss:$104 sps:$4 sm:$0xff]  }
 0x35f   : > { %v1746_v13 = vadd.f32 0.5, %v1743_v10  ;;  %5162 = vst [vmem:[#allocation28_spill] sm:$0xff] %v4530_v2 }
 0x360   : > { %v4457_v5 = vadd.f32 %v1749_v38, %v1748_v59  ;;  %v1774_v38 = vcombine.high %v1772_v60, %v1772_v60 }
 0x361   : > { %1912 = vmatpush1.bf16.msra.mxu0 %v4145_v14  ;;  %1953 = vmatpush1.bf16.msra.mxu1 %v4149_v15 }
 0x362   : > { %3451 = vtanh.f32 %v4457_v5  ;;  %1913 = vmatprep.subr.bf16.mxu0 %v4151_v16  ;;  %1954 = vmatprep.subr.bf16.mxu1 %v4154_v17 }
 0x365   : > { %1914 = vmatpush1.bf16.msra.mxu0 %v4157_v18  ;;  %1955 = vmatpush1.bf16.msra.mxu1 %v4161_v19  ;;  %v4488_v18 = vld [vmem:[#allocation2 + $0xe4] ss:$-112 sps:$4 sm:$0xff]  }
 0x366   : > { %1915 = vmatprep.subr.bf16.mxu0 %v4163_v21  ;;  %1956 = vmatprep.subr.bf16.mxu1 %v4166_v44  ;;  %v4491_v19 = vld [vmem:[#allocation2 + $0x94] ss:$48 sps:$4 sm:$0xff]   ;;  %v4494_v21 = vld [vmem:[#allocation2 + $0xe0] ss:$-112 sps:$4 sm:$0xff]  }
 0x367   : > { %v4497_v44 = vld [vmem:[#allocation2 + $0x90] ss:$48 sps:$4 sm:$0xff]  }
 0x369   : > { %1916 = vmatpush1.bf16.msra.mxu0 %v4169_v45  ;;  %1957 = vmatpush1.bf16.msra.mxu1 %v5100_v23  ;;  %v4500_v45 = vld [vmem:[#allocation2 + $0x3c] ss:$8 sps:$4 sm:$0xff]   ;;  %v4521_v23 = vld [vmem:[#allocation2 + $0xf0] ss:$-120 sps:$4 sm:$0xff]  }
 0x36a   : > { %1917 = vmatprep.subr.bf16.mxu0 %v5101_v39  ;;  %1958 = vmatprep.subr.bf16.mxu1 %v4178_v58  ;;  %v4506_v58 = vld [vmem:[#allocation2 + $0x38] ss:$8 sps:$4 sm:$0xff]   ;;  %5159 = vst [vmem:[#allocation25_spill] sm:$0xff] %v4521_v23  ;;  %v4524_v39 = vld [vmem:[#allocation2 + $0x84] ss:$104 sps:$4 sm:$0xff]  }
 0x36b   : > { %5154 = vst [vmem:[#allocation48_spill] sm:$0xff] %v4506_v58  ;;  %5160 = vst [vmem:[#allocation26_spill] sm:$0xff] %v4524_v39 }
 0x36d   : > { %1918 = vmatpush1.bf16.msra.mxu0 %v4181_v61  ;;  %1959 = vmatpush1.bf16.msra.mxu1 %v4185_v3  ;;  %v4509_v61 = vld [vmem:[#allocation2 + $0x58] ss:$112 sps:$4 sm:$0xff]   ;;  %v4512_v3 = vld [vmem:[#allocation2 + $0x64] ss:$-88 sps:$4 sm:$0xff]  }
 0x36e   : > { %1919 = vmatprep.subr.bf16.mxu0 %v4187_v4  ;;  %1960 = vmatprep.subr.bf16.mxu1 %v5102_v40  ;;  %5155 = vst [vmem:[#allocation21_spill] sm:$0xff] %v4509_v61  ;;  %5156 = vst [vmem:[#allocation22_spill] sm:$0xff] %v4512_v3  ;;  %v4515_v4 = vld [vmem:[#allocation2 + $0xf4] ss:$-120 sps:$4 sm:$0xff]  }
 0x36f   : > { %v3452_v15 = vpop.eup %3451  ;;  %5157 = vst [vmem:[#allocation23_spill] sm:$0xff] %v4515_v4  ;;  %v4527_v40 = vld [vmem:[#allocation2 + $0x8c] ss:$48 sps:$4 sm:$0xff]  }
 0x370   : > { %v1752_v16 = vmul.f32 %v3452_v15, %v1746_v13  ;;  %5161 = vst [vmem:[#allocation27_spill] sm:$0xff] %v4527_v40 }
 0x371   : > { %1920 = vmatpush1.bf16.msra.mxu0 %v4193_v9  ;;  %1961 = vmatpush1.bf16.msra.mxu1 %v4197_v46  ;;  %v4503_v46 = vld [vmem:[#allocation2 + $0x5c] ss:$112 sps:$4 sm:$0xff]   ;;  %v4518_v9 = vld [vmem:[#allocation2 + $0x60] ss:$-88 sps:$4 sm:$0xff]  }
 0x372   : > { %v1881_v17 = vpack.c.bf16 %v1752_v16, %v1752_v16  ;;  %2031 = vmatprep.subr.bf16.mxu0 %v4006_v20  ;;  %2072 = vmatprep.subr.bf16.mxu1 %v4012_v24  ;;  %5153 = vst [vmem:[#allocation47_spill] sm:$0xff] %v4503_v46  ;;  %5158 = vst [vmem:[#allocation24_spill] sm:$0xff] %v4518_v9 }
 0x374   : > { %1938 = vmatmul.mubr.bf16.vlgmr.msra.gmra.mxu0 %v1881_v17  ;;  %1979 = vmatmul.mubr.bf16.vlgmr.msra.gmra.mxu1 %v1881_v17 }
 0x375   : > { %2032 = vmatpush1.bf16.msra.mxu0 %v4008_v22  ;;  %2073 = vmatpush1.bf16.msra.mxu1 %v4014_v25 }
 0x376   : > { %2033 = vmatprep.subr.bf16.mxu0 %v4380_v53  ;;  %2074 = vmatprep.subr.bf16.mxu1 %v4383_v29 }
 0x377   : > { %2063 = vmatprep.mubr.bf16.mxu0 %v5095_v8  ;;  %2104 = vmatprep.mubr.bf16.mxu1 %v5095_v8 }
 0x379   : > { %2034 = vmatpush1.bf16.msra.mxu0 %v4388_v56  ;;  %2075 = vmatpush1.bf16.msra.mxu1 %v4391_v41 }
 0x37a   : > { %2035 = vmatprep.subr.bf16.mxu0 %v4488_v18  ;;  %2076 = vmatprep.subr.bf16.mxu1 %v4491_v19 }
 0x37d   : > { %2036 = vmatpush1.bf16.msra.mxu0 %v4494_v21  ;;  %2077 = vmatpush1.bf16.msra.mxu1 %v4497_v44 }
 0x37e   : > { %2037 = vmatprep.subr.bf16.mxu0 %v4500_v45  ;;  %2078 = vmatprep.subr.bf16.mxu1 %v4503_v46 }
 0x381   : > { %2038 = vmatpush1.bf16.msra.mxu0 %v4506_v58  ;;  %2079 = vmatpush1.bf16.msra.mxu1 %v4509_v61 }
 0x382   : > { %2039 = vmatprep.subr.bf16.mxu0 %v4512_v3  ;;  %2080 = vmatprep.subr.bf16.mxu1 %v4515_v4 }
 0x385   : > { %2040 = vmatpush1.bf16.msra.mxu0 %v4518_v9  ;;  %2081 = vmatpush1.bf16.msra.mxu1 %v4521_v23 }
 0x386   : > { %2041 = vmatprep.subr.bf16.mxu0 %v4524_v39  ;;  %2082 = vmatprep.subr.bf16.mxu1 %v4527_v40 }
 0x389   : > { %2042 = vmatpush1.bf16.msra.mxu0 %v4530_v2  ;;  %2083 = vmatpush1.bf16.msra.mxu1 %v4533_v48 }
 0x38a   : > { %2043 = vmatprep.subr.bf16.mxu0 %v5140_v35  ;;  %2084 = vmatprep.subr.bf16.mxu1 %v5141_v43 }
 0x38d   : > { %2044 = vmatpush1.bf16.msra.mxu0 %v5142_v51  ;;  %2085 = vmatpush1.bf16.msra.mxu1 %v5143_v28 }
 0x38e   : > { %2045 = vmatprep.subr.bf16.mxu0 %v4540_v26  ;;  %2086 = vmatprep.subr.bf16.mxu1 %v4543_v36 }
 0x391   : > { %2046 = vmatpush1.bf16.msra.mxu0 %v4546_v30  ;;  %2087 = vmatpush1.bf16.msra.mxu1 %v4549_v31 }
 0x392   : > { %2157 = vmatprep.subr.bf16.mxu0 %v4552_v34  ;;  %2198 = vmatprep.subr.bf16.mxu1 %v4555_v33 }
 0x414   : > { %v1813_v37 = vpop.f32.mrf.mxu0  ;;  %v1854_v57 = vpop.f32.mrf.mxu1 }
 0x415   : > { %v1814_v52 = vadd.f32 %v1813_v37, %v1765_v49  ;;  %v1855_v17 = vadd.f32 %v1854_v57, %v1772_v60 }
 0x416   : > { %v1815_v55 = vpop.f32.mrf.mxu0  ;;  %v1856_v0 = vpop.f32.mrf.mxu1 }
 0x417   : > { %v1861_v1 = vmul.f32 0.5, %v1814_v52  ;;  %v1816_v59 = vadd.f32 %v1815_v55, %v1773_v54  ;;  %v1857_v16 = vadd.f32 %v1856_v0, %v1774_v38  ;;  %v1863_v63 = vmul.f32 0.5, %v1855_v17  ;;  %v5171_v54 = vld [vmem:[#allocation44_spill] sm:$0xff] }
 0x418   : > { %v1817_v6 = vpop.f32.mrf.mxu0  ;;  %v1858_v10 = vpop.f32.mrf.mxu1  ;;  %v1882_v55 = vunpack.c.l.bf16 %v5171_v54 }
 0x419   : > { %3453 = vtanh.f32 %v1861_v1  ;;  %v1862_v13 = vmul.f32 0.5, %v1816_v59  ;;  %v5172_v10 = vld [vmem:[#allocation45_spill] sm:$0xff] }
 0x41a   : > { %v1818_v15 = vpop.f32.mrf.mxu0  ;;  %v1859_v47 = vpop.f32.mrf.mxu1  ;;  %v1891_v0 = vrot.slane %v1882_v55, %v5170_v50  ;;  %v1884_v38 = vcombine.high %v1882_v55, %v1882_v55 }
 0x41b   : > { %3455 = vtanh.f32 %v1862_v13 }
 0x41c   : > { %3457 = vtanh.f32 %v1857_v16  ;;  %v1898_v60 = vrot.slane %v1884_v38, %v5170_v50  ;;  %v1899_v57 = vcombine.high %v1891_v0, %v1891_v0 }
 0x41d   : > { %3459 = vtanh.f32 %v1863_v63 }
 0x426   : > { %v3454_v27 = vpop.eup %3453 }
 0x427   : > { %v1867_v33 = vmul.f32 0.5, %v3454_v27 }
 0x428   : > { %v3456_v34 = vpop.eup %3455 }
 0x429   : > { %v1870_v49 = vadd.f32 0.5, %v1867_v33  ;;  %v1868_v37 = vmul.f32 0.5, %v3456_v34  ;;  %v3458_v6 = vpop.eup %3457 }
 0x42a   : > { %v3460_v47 = vpop.eup %3459 }
 0x42b   : > { %v1871_v52 = vadd.f32 0.5, %v1868_v37  ;;  %v1875_v59 = vmul.f32 %v3458_v6, %v1870_v49  ;;  %v1900_v37 = vcombine.high %v1898_v60, %v1898_v60  ;;  %v1869_v54 = vmul.f32 0.5, %v3460_v47  ;;  %v4573_v47 = vld [vmem:[#allocation3 + $0x4c] ss:$120 sps:$4 sm:$0xff]  }
 0x42d   : > { %v1874_v1 = vmul.f32 %v1871_v52, %v5172_v10 }
 0x42f   : > { %v4563_v15 = vadd.f32 %v1875_v59, %v1874_v1  ;;  %v1872_v59 = vadd.f32 0.5, %v1869_v54 }
 0x431   : > { %5173 = vst [vmem:[#allocation40_spill] sm:$0xff] %v4563_v15  ;;  %3461 = vtanh.f32 %v4563_v15 }
 0x434   : > { %v1939_v33 = vpop.f32.mrf.mxu0  ;;  %v1980_v13 = vpop.f32.mrf.mxu1 }
 0x435   : > { %v1940_v34 = vadd.f32 %v1939_v33, %v1891_v0  ;;  %v1981_v0 = vadd.f32 %v1980_v13, %v1898_v60  ;;  %v4579_v13 = vld [vmem:[#allocation3 + $0x48] ss:$120 sps:$4 sm:$0xff]  }
 0x436   : > { %v1941_v16 = vpop.f32.mrf.mxu0  ;;  %v1982_v17 = vpop.f32.mrf.mxu1 }
 0x437   : > { %v1987_v63 = vmul.f32 0.5, %v1940_v34  ;;  %v1942_v27 = vadd.f32 %v1941_v16, %v1899_v57  ;;  %v1983_v1 = vadd.f32 %v1982_v17, %v1900_v37  ;;  %v1989_v57 = vmul.f32 0.5, %v1981_v0  ;;  %v4570_v34 = vld [vmem:[#allocation3 + $0x8c] ss:$112 sps:$4 sm:$0xff]   ;;  %v4611_v0 = vld [vmem:[#allocation3 + $0x60] ss:$8 sps:$4 sm:$0xff]  }
 0x438   : > { %v1943_v49 = vpop.f32.mrf.mxu0  ;;  %v1984_v52 = vpop.f32.mrf.mxu1 }
 0x439   : > { %3463 = vtanh.f32 %v1987_v63  ;;  %v1988_v6 = vmul.f32 0.5, %v1942_v27  ;;  %v4582_v27 = vld [vmem:[#allocation3 + $0xdc] ss:$-184 sps:$4 sm:$0xff]   ;;  %v4586_v52 = vld [vmem:[#allocation3 + $0xd8] ss:$-184 sps:$4 sm:$0xff]  }
 0x43a   : > { %v1944_v55 = vpop.f32.mrf.mxu0  ;;  %v1985_v10 = vpop.f32.mrf.mxu1 }
 0x43b   : > { %3465 = vtanh.f32 %v1988_v6  ;;  %v4592_v55 = vld [vmem:[#allocation3 + $0x74] ss:$48 sps:$4 sm:$0xff]  }
 0x43c   : > { %3467 = vtanh.f32 %v1983_v1  ;;  %v4598_v1 = vld [vmem:[#allocation3 + $0x70] ss:$48 sps:$4 sm:$0xff]  }
 0x43d   : > { %3469 = vtanh.f32 %v1989_v57  ;;  %v4617_v57 = vld [vmem:[#allocation3 + $0xb4] ss:$-112 sps:$4 sm:$0xff]  }
 0x43e   : > { %v3462_v38 = vpop.eup %3461 }
 0x43f   : > { %v1878_v15 = vmul.f32 %v3462_v38, %v1872_v59  ;;  %v4602_v59 = vld [vmem:[#allocation3 + $0xe4] ss:$-200 sps:$4 sm:$0xff]   ;;  %v4608_v38 = vld [vmem:[#allocation3 + $0xe0] ss:$-200 sps:$4 sm:$0xff]  }
 0x441   : > { %v2007_v33 = vpack.c.bf16 %v1878_v15, %v1878_v15 }
 0x443   : > { %2064 = vmatmul.mubr.bf16.vlgmr.msra.gmra.mxu0 %v2007_v33  ;;  %2105 = vmatmul.mubr.bf16.vlgmr.msra.gmra.mxu1 %v2007_v33  ;;  %v4614_v33 = vld [vmem:[#allocation3 + $0xd4] ss:$-152 sps:$4 sm:$0xff]  }
 0x444   : > { %2158 = vmatpush1.bf16.msra.mxu0 %v4436_v42  ;;  %2199 = vmatpush1.bf16.msra.mxu1 %v4439_v32 }
 0x445   : > { %2159 = vmatprep.subr.bf16.mxu0 %v4570_v34  ;;  %2200 = vmatprep.subr.bf16.mxu1 %v4573_v47 }
 0x446   : > { %v3464_v16 = vpop.eup %3463  ;;  %2189 = vmatprep.mubr.bf16.mxu0 %v5095_v8  ;;  %2230 = vmatprep.mubr.bf16.mxu1 %v5095_v8 }
 0x447   : > { %v1993_v15 = vmul.f32 0.5, %v3464_v16 }
 0x448   : > { %v3466_v60 = vpop.eup %3465  ;;  %2160 = vmatpush1.bf16.msra.mxu0 %v4446_v62  ;;  %2201 = vmatpush1.bf16.msra.mxu1 %v4579_v13 }
 0x449   : > { %v1996_v17 = vadd.f32 0.5, %v1993_v15  ;;  %v1994_v63 = vmul.f32 0.5, %v3466_v60  ;;  %2161 = vmatprep.subr.bf16.mxu0 %v4582_v27  ;;  %2202 = vmatprep.subr.bf16.mxu1 %v4128_v7  ;;  %v3468_v49 = vpop.eup %3467  ;;  %v4620_v15 = vld [vmem:[#allocation3 + $0xd0] ss:$-152 sps:$4 sm:$0xff]  }
 0x44a   : > { %v3470_v16 = vpop.eup %3469  ;;  %5174 = vst [vmem:[#allocation41_spill] sm:$0xff] %v4620_v15  ;;  %v4623_v60 = vld [vmem:[#allocation3 + $0xb0] ss:$-112 sps:$4 sm:$0xff]  }
 0x44b   : > { %v1997_v37 = vadd.f32 0.5, %v1994_v63  ;;  %v2001_v6 = vmul.f32 %v3468_v49, %v1996_v17  ;;  %5175 = vst [vmem:[#allocation43_spill] sm:$0xff] %v4623_v60  ;;  %v1995_v17 = vmul.f32 0.5, %v3470_v16  ;;  %v4626_v63 = vld [vmem:[#allocation3 + $0xc] ss:$80 sps:$4 sm:$0xff]  }
 0x44c   : > { %2162 = vmatpush1.bf16.msra.mxu0 %v4586_v52  ;;  %2203 = vmatpush1.bf16.msra.mxu1 %v4137_v11  ;;  %5176 = vst [vmem:[#allocation44_spill] sm:$0xff] %v4626_v63  ;;  %v4632_v49 = vld [vmem:[#allocation3 + $0x8] ss:$80 sps:$4 sm:$0xff]   ;;  %v4641_v16 = vld [vmem:[#allocation3 + $0xcc] ss:$-80 sps:$4 sm:$0xff]  }
 0x44d   : > { %v2000_v54 = vmul.f32 %v1997_v37, %v4457_v5  ;;  %2163 = vmatprep.subr.bf16.mxu0 %v4139_v12  ;;  %2204 = vmatprep.subr.bf16.mxu1 %v4592_v55  ;;  %v4605_v5 = vld [vmem:[#allocation3 + $0x64] ss:$8 sps:$4 sm:$0xff]   ;;  %5178 = vst [vmem:[#allocation49_spill] sm:$0xff] %v4632_v49 }
 0x44e   : > { %v4629_v37 = vld [vmem:[#allocation3 + $0x94] ss:$24 sps:$4 sm:$0xff]  }
 0x44f   : > { %v4595_v10 = vadd.f32 %v2001_v6, %v2000_v54  ;;  %5177 = vst [vmem:[#allocation45_spill] sm:$0xff] %v4629_v37  ;;  %v4635_v54 = vld [vmem:[#allocation3 + $0x90] ss:$24 sps:$4 sm:$0xff]   ;;  %v1998_v6 = vadd.f32 0.5, %v1995_v17  ;;  %v5181_v17 = vld [vmem:[#allocation39_spill] sm:$0xff] }
 0x450   : > { %2164 = vmatpush1.bf16.msra.mxu0 %v4145_v14  ;;  %2205 = vmatpush1.bf16.msra.mxu1 %v4598_v1  ;;  %5179 = vst [vmem:[#allocation50_spill] sm:$0xff] %v4635_v54 }
 0x451   : > { %3471 = vtanh.f32 %v4595_v10  ;;  %2165 = vmatprep.subr.bf16.mxu0 %v4602_v59  ;;  %2206 = vmatprep.subr.bf16.mxu1 %v4605_v5 }
 0x454   : > { %2166 = vmatpush1.bf16.msra.mxu0 %v4608_v38  ;;  %2207 = vmatpush1.bf16.msra.mxu1 %v4611_v0 }
 0x455   : > { %2167 = vmatprep.subr.bf16.mxu0 %v4614_v33  ;;  %2208 = vmatprep.subr.bf16.mxu1 %v4617_v57 }
 0x458   : > { %2168 = vmatpush1.bf16.msra.mxu0 %v4620_v15  ;;  %2209 = vmatpush1.bf16.msra.mxu1 %v4623_v60  ;;  %v4638_v15 = vld [vmem:[#allocation3 + $0x84] ss:$104 sps:$4 sm:$0xff]  }
 0x459   : > { %2169 = vmatprep.subr.bf16.mxu0 %v4626_v63  ;;  %2210 = vmatprep.subr.bf16.mxu1 %v4629_v37  ;;  %v4644_v37 = vld [vmem:[#allocation3 + $0x80] ss:$104 sps:$4 sm:$0xff]  }
 0x45c   : > { %2170 = vmatpush1.bf16.msra.mxu0 %v4632_v49  ;;  %2211 = vmatpush1.bf16.msra.mxu1 %v4635_v54  ;;  %v4647_v49 = vld [vmem:[#allocation3 + $0xc8] ss:$-80 sps:$4 sm:$0xff]  }
 0x45d   : > { %2171 = vmatprep.subr.bf16.mxu0 %v4638_v15  ;;  %2212 = vmatprep.subr.bf16.mxu1 %v4641_v16 }
 0x45e   : > { %v3472_v63 = vpop.eup %3471 }
 0x45f   : > { %v2004_v60 = vmul.f32 %v3472_v63, %v1998_v6  ;;  %v4687_v63 = vld [vmem:[%s3807_s21 + $0x10] sm:$0xff]  }
 0x460   : > { %2172 = vmatpush1.bf16.msra.mxu0 %v4644_v37  ;;  %2213 = vmatpush1.bf16.msra.mxu1 %v4647_v49  ;;  %5182 = vst [vmem:[#allocation51_spill] sm:$0xff] %v4687_v63 }
 0x461   : > { %v2133_v54 = vpack.c.bf16 %v2004_v60, %v2004_v60  ;;  %2283 = vmatprep.subr.bf16.mxu0 %v4006_v20  ;;  %2324 = vmatprep.subr.bf16.mxu1 %v4012_v24  ;;  %v5180_v60 = vld [vmem:[#allocation38_spill] sm:$0xff] }
 0x463   : > { %2190 = vmatmul.mubr.bf16.vlgmr.msra.gmra.mxu0 %v2133_v54  ;;  %2231 = vmatmul.mubr.bf16.vlgmr.msra.gmra.mxu1 %v2133_v54  ;;  %v2008_v54 = vunpack.c.l.bf16 %v4687_v63 }
 0x464   : > { %2284 = vmatpush1.bf16.msra.mxu0 %v4008_v22  ;;  %2325 = vmatpush1.bf16.msra.mxu1 %v4014_v25 }
 0x465   : > { %2285 = vmatprep.subr.bf16.mxu0 %v4380_v53  ;;  %2326 = vmatprep.subr.bf16.mxu1 %v4383_v29  ;;  %v2017_v6 = vrot.slane %v2008_v54, %v5170_v50 }
 0x466   : > { %2315 = vmatprep.mubr.bf16.mxu0 %v5095_v8  ;;  %2356 = vmatprep.mubr.bf16.mxu1 %v5095_v8 }
 0x468   : > { %2286 = vmatpush1.bf16.msra.mxu0 %v4388_v56  ;;  %2327 = vmatpush1.bf16.msra.mxu1 %v4391_v41 }
 0x469   : > { %2287 = vmatprep.subr.bf16.mxu0 %v4488_v18  ;;  %2328 = vmatprep.subr.bf16.mxu1 %v4491_v19 }
 0x46c   : > { %2288 = vmatpush1.bf16.msra.mxu0 %v4494_v21  ;;  %2329 = vmatpush1.bf16.msra.mxu1 %v4497_v44 }
 0x46d   : > { %2289 = vmatprep.subr.bf16.mxu0 %v4500_v45  ;;  %2330 = vmatprep.subr.bf16.mxu1 %v4503_v46 }
 0x470   : > { %2290 = vmatpush1.bf16.msra.mxu0 %v4506_v58  ;;  %2331 = vmatpush1.bf16.msra.mxu1 %v4509_v61 }
 0x471   : > { %2291 = vmatprep.subr.bf16.mxu0 %v4512_v3  ;;  %2332 = vmatprep.subr.bf16.mxu1 %v4515_v4 }
 0x474   : > { %2292 = vmatpush1.bf16.msra.mxu0 %v4518_v9  ;;  %2333 = vmatpush1.bf16.msra.mxu1 %v4521_v23 }
 0x475   : > { %2293 = vmatprep.subr.bf16.mxu0 %v4524_v39  ;;  %2334 = vmatprep.subr.bf16.mxu1 %v4527_v40 }
 0x478   : > { %2294 = vmatpush1.bf16.msra.mxu0 %v4530_v2  ;;  %2335 = vmatpush1.bf16.msra.mxu1 %v4533_v48 }
 0x479   : > { %2295 = vmatprep.subr.bf16.mxu0 %v5140_v35  ;;  %2336 = vmatprep.subr.bf16.mxu1 %v5141_v43 }
 0x47c   : > { %2296 = vmatpush1.bf16.msra.mxu0 %v5142_v51  ;;  %2337 = vmatpush1.bf16.msra.mxu1 %v5143_v28  ;;  %v2010_v51 = vcombine.high %v2008_v54, %v2008_v54 }
 0x47d   : > { %2297 = vmatprep.subr.bf16.mxu0 %v4540_v26  ;;  %2338 = vmatprep.subr.bf16.mxu1 %v4543_v36  ;;  %v2025_v26 = vcombine.high %v2017_v6, %v2017_v6 }
 0x47e   : > { %v2024_v28 = vrot.slane %v2010_v51, %v5170_v50 }
 0x480   : > { %2298 = vmatpush1.bf16.msra.mxu0 %v4546_v30  ;;  %2339 = vmatpush1.bf16.msra.mxu1 %v4549_v31 }
 0x481   : > { %2409 = vmatprep.subr.bf16.mxu0 %v5180_v60  ;;  %2450 = vmatprep.subr.bf16.mxu1 %v5181_v17  ;;  %v2026_v60 = vcombine.high %v2024_v28, %v2024_v28 }
 0x503   : > { %v2065_v43 = vpop.f32.mrf.mxu0  ;;  %v2106_v36 = vpop.f32.mrf.mxu1 }
 0x504   : > { %v2066_v35 = vadd.f32 %v2065_v43, %v2017_v6  ;;  %v2107_v51 = vadd.f32 %v2106_v36, %v2024_v28  ;;  %v4693_v6 = vld [vmem:[%s3809_s22 + $0x8] sm:$0xff]  }
 0x505   : > { %v2067_v30 = vpop.f32.mrf.mxu0  ;;  %v2108_v48 = vpop.f32.mrf.mxu1  ;;  %5183 = vst [vmem:[#allocation52_spill] sm:$0xff] %v4693_v6 }
 0x506   : > { %v2113_v31 = vmul.f32 0.5, %v2066_v35  ;;  %v2068_v2 = vadd.f32 %v2067_v30, %v2025_v26  ;;  %v2109_v54 = vadd.f32 %v2108_v48, %v2026_v60  ;;  %v2115_v9 = vmul.f32 0.5, %v2107_v51 }
 0x507   : > { %v2069_v17 = vpop.f32.mrf.mxu0  ;;  %v2110_v40 = vpop.f32.mrf.mxu1 }
 0x508   : > { %3473 = vtanh.f32 %v2113_v31  ;;  %v2114_v39 = vmul.f32 0.5, %v2068_v2  ;;  %v2134_v40 = vunpack.c.h.bf16 %v4693_v6  ;;  %v5184_v2 = vld [vmem:[#allocation40_spill] sm:$0xff] }
 0x509   : > { %v2070_v63 = vpop.f32.mrf.mxu0  ;;  %v2111_v23 = vpop.f32.mrf.mxu1 }
 0x50a   : > { %3475 = vtanh.f32 %v2114_v39  ;;  %v2143_v28 = vrot.slane %v2134_v40, %v5170_v50  ;;  %v2136_v48 = vcombine.high %v2134_v40, %v2134_v40 }
 0x50b   : > { %3477 = vtanh.f32 %v2109_v54 }
 0x50c   : > { %3479 = vtanh.f32 %v2115_v9  ;;  %v2151_v36 = vcombine.high %v2143_v28, %v2143_v28 }
 0x515   : > { %v3474_v4 = vpop.eup %3473 }
 0x516   : > { %v2119_v3 = vmul.f32 0.5, %v3474_v4  ;;  %v2150_v4 = vrot.slane %v2136_v48, %v5170_v50 }
 0x517   : > { %v3476_v43 = vpop.eup %3475 }
 0x518   : > { %v2122_v35 = vadd.f32 0.5, %v2119_v3  ;;  %v2120_v26 = vmul.f32 0.5, %v3476_v43  ;;  %v3478_v31 = vpop.eup %3477 }
 0x519   : > { %v3480_v63 = vpop.eup %3479 }
 0x51a   : > { %v2123_v30 = vadd.f32 0.5, %v2120_v26  ;;  %v2127_v23 = vmul.f32 %v3478_v31, %v2122_v35 }
 0x51c   : > { %v2126_v17 = vmul.f32 %v2123_v30, %v5184_v2  ;;  %v2152_v30 = vcombine.high %v2150_v4, %v2150_v4  ;;  %v2121_v2 = vmul.f32 0.5, %v3480_v63 }
 0x51e   : > { %v4697_v39 = vadd.f32 %v2127_v23, %v2126_v17  ;;  %v2124_v48 = vadd.f32 0.5, %v2121_v2  ;;  %v5189_v2 = vld [vmem:[#allocation45_spill] sm:$0xff] }
 0x520   : > { %5185 = vst [vmem:[#allocation40_spill] sm:$0xff] %v4697_v39  ;;  %3481 = vtanh.f32 %v4697_v39 }
 0x523   : > { %v2191_v3 = vpop.f32.mrf.mxu0  ;;  %v2232_v9 = vpop.f32.mrf.mxu1 }
 0x524   : > { %v2192_v60 = vadd.f32 %v2191_v3, %v2143_v28  ;;  %v2233_v28 = vadd.f32 %v2232_v9, %v2150_v4 }
 0x525   : > { %v2193_v54 = vpop.f32.mrf.mxu0  ;;  %v2234_v51 = vpop.f32.mrf.mxu1 }
 0x526   : > { %v2239_v43 = vmul.f32 0.5, %v2192_v60  ;;  %v2194_v26 = vadd.f32 %v2193_v54, %v2151_v36  ;;  %v2235_v39 = vadd.f32 %v2234_v51, %v2152_v30  ;;  %v2241_v36 = vmul.f32 0.5, %v2233_v28  ;;  %v5187_v30 = vld [vmem:[#allocation43_spill] sm:$0xff] }
 0x527   : > { %v2195_v35 = vpop.f32.mrf.mxu0  ;;  %v2236_v31 = vpop.f32.mrf.mxu1 }
 0x528   : > { %3483 = vtanh.f32 %v2239_v43  ;;  %v2240_v17 = vmul.f32 0.5, %v2194_v26  ;;  %v5186_v26 = vld [vmem:[#allocation41_spill] sm:$0xff]  ;;  %v5188_v31 = vld [vmem:[#allocation44_spill] sm:$0xff] }
 0x529   : > { %v2196_v40 = vpop.f32.mrf.mxu0  ;;  %v2237_v23 = vpop.f32.mrf.mxu1 }
 0x52a   : > { %3485 = vtanh.f32 %v2240_v17  ;;  %v5190_v17 = vld [vmem:[#allocation49_spill] sm:$0xff]  ;;  %v5191_v40 = vld [vmem:[#allocation50_spill] sm:$0xff] }
 0x52b   : > { %3487 = vtanh.f32 %v2235_v39 }
 0x52c   : > { %3489 = vtanh.f32 %v2241_v36  ;;  %v5196_v36 = vld [vmem:[#allocation26_spill] sm:$0xff] }
 0x52d   : > { %v3482_v6 = vpop.eup %3481 }
 0x52e   : > { %v2130_v50 = vmul.f32 %v3482_v6, %v2124_v48 }
 0x530   : > { %v2259_v3 = vpack.c.bf16 %v2130_v50, %v2130_v50 }
 0x532   : > { %2316 = vmatmul.mubr.bf16.vlgmr.msra.gmra.mxu0 %v2259_v3  ;;  %2357 = vmatmul.mubr.bf16.vlgmr.msra.gmra.mxu1 %v2259_v3 }
 0x533   : > { %2410 = vmatpush1.bf16.msra.mxu0 %v4436_v42  ;;  %2451 = vmatpush1.bf16.msra.mxu1 %v4439_v32 }
 0x534   : > { %2411 = vmatprep.subr.bf16.mxu0 %v4570_v34  ;;  %2452 = vmatprep.subr.bf16.mxu1 %v4573_v47 }
 0x535   : > { %v3484_v60 = vpop.eup %3483  ;;  %2441 = vmatprep.mubr.bf16.mxu0 %v5095_v8  ;;  %2482 = vmatprep.mubr.bf16.mxu1 %v5095_v8 }
 0x536   : > { %v2245_v39 = vmul.f32 0.5, %v3484_v60  ;;  %v5197_v60 = vld [vmem:[#allocation27_spill] sm:$0xff] }
 0x537   : > { %v3486_v6 = vpop.eup %3485  ;;  %2412 = vmatpush1.bf16.msra.mxu0 %v4446_v62  ;;  %2453 = vmatpush1.bf16.msra.mxu1 %v4579_v13 }
 0x538   : > { %v2248_v50 = vadd.f32 0.5, %v2245_v39  ;;  %v2246_v4 = vmul.f32 0.5, %v3486_v6  ;;  %2413 = vmatprep.subr.bf16.mxu0 %v4582_v27  ;;  %2454 = vmatprep.subr.bf16.mxu1 %v4128_v7  ;;  %v3488_v63 = vpop.eup %3487  ;;  %v5198_v39 = vld [vmem:[#allocation28_spill] sm:$0xff]  ;;  %v5199_v6 = vld [vmem:[#allocation29_spill] sm:$0xff] }
 0x53a   : > { %v2249_v9 = vadd.f32 0.5, %v2246_v4  ;;  %v2253_v51 = vmul.f32 %v3488_v63, %v2248_v50  ;;  %v5200_v50 = vld [vmem:[#allocation32_spill] sm:$0xff]  ;;  %v5201_v4 = vld [vmem:[#allocation33_spill] sm:$0xff]  ;;  %v5203_v63 = vld [vmem:[#allocation35_spill] sm:$0xff] }
 0x53b   : > { %2414 = vmatpush1.bf16.msra.mxu0 %v4586_v52  ;;  %2455 = vmatpush1.bf16.msra.mxu1 %v4137_v11 }
 0x53c   : > { %v2252_v54 = vmul.f32 %v2249_v9, %v4595_v10  ;;  %2415 = vmatprep.subr.bf16.mxu0 %v4139_v12  ;;  %2456 = vmatprep.subr.bf16.mxu1 %v4592_v55  ;;  %v3490_v10 = vpop.eup %3489  ;;  %v5202_v9 = vld [vmem:[#allocation34_spill] sm:$0xff] }
 0x53d   : > { %v2247_v35 = vmul.f32 0.5, %v3490_v10  ;;  %v5206_v10 = vld [vmem:[#allocation36_spill] sm:$0xff] }
 0x53e   : > { %v4717_v43 = vadd.f32 %v2253_v51, %v2252_v54  ;;  %v5204_v54 = vld [vmem:[#allocation30_spill] sm:$0xff]  ;;  %v5205_v51 = vld [vmem:[#allocation31_spill] sm:$0xff] }
 0x53f   : > { %2416 = vmatpush1.bf16.msra.mxu0 %v4145_v14  ;;  %2457 = vmatpush1.bf16.msra.mxu1 %v4598_v1  ;;  %v2250_v23 = vadd.f32 0.5, %v2247_v35  ;;  %v5207_v35 = vld [vmem:[#allocation37_spill] sm:$0xff] }
 0x540   : > { %3491 = vtanh.f32 %v4717_v43  ;;  %2417 = vmatprep.subr.bf16.mxu0 %v4602_v59  ;;  %2458 = vmatprep.subr.bf16.mxu1 %v4605_v5 }
 0x543   : > { %2418 = vmatpush1.bf16.msra.mxu0 %v4608_v38  ;;  %2459 = vmatpush1.bf16.msra.mxu1 %v4611_v0 }
 0x544   : > { %2419 = vmatprep.subr.bf16.mxu0 %v4614_v33  ;;  %2460 = vmatprep.subr.bf16.mxu1 %v4617_v57 }
 0x547   : > { %2420 = vmatpush1.bf16.msra.mxu0 %v5186_v26  ;;  %2461 = vmatpush1.bf16.msra.mxu1 %v5187_v30 }
 0x548   : > { %2421 = vmatprep.subr.bf16.mxu0 %v5188_v31  ;;  %2462 = vmatprep.subr.bf16.mxu1 %v5189_v2 }
 0x54b   : > { %2422 = vmatpush1.bf16.msra.mxu0 %v5190_v17  ;;  %2463 = vmatpush1.bf16.msra.mxu1 %v5191_v40 }
 0x54c   : > { %2423 = vmatprep.subr.bf16.mxu0 %v4638_v15  ;;  %2464 = vmatprep.subr.bf16.mxu1 %v4641_v16 }
 0x54d   : > { %v3492_v48 = vpop.eup %3491 }
 0x54e   : > { %v2256_v28 = vmul.f32 %v3492_v48, %v2250_v23  ;;  %v5208_v23 = vld [vmem:[#allocation38_spill] sm:$0xff]  ;;  %v5209_v48 = vld [vmem:[#allocation39_spill] sm:$0xff] }
 0x54f   : > { %2424 = vmatpush1.bf16.msra.mxu0 %v4644_v37  ;;  %2465 = vmatpush1.bf16.msra.mxu1 %v4647_v49 }
 0x550   : > { %v2385_v3 = vpack.c.bf16 %v2256_v28, %v2256_v28  ;;  %2535 = vmatprep.subr.bf16.mxu0 %v4006_v20  ;;  %2576 = vmatprep.subr.bf16.mxu1 %v4012_v24  ;;  %v5210_v28 = vld [vmem:[#allocation51_spill] sm:$0xff] }
 0x552   : > { %2442 = vmatmul.mubr.bf16.vlgmr.msra.gmra.mxu0 %v2385_v3  ;;  %2483 = vmatmul.mubr.bf16.vlgmr.msra.gmra.mxu1 %v2385_v3  ;;  %v2260_v3 = vunpack.c.h.bf16 %v5210_v28 }
 0x553   : > { %2536 = vmatpush1.bf16.msra.mxu0 %v4008_v22  ;;  %2577 = vmatpush1.bf16.msra.mxu1 %v4014_v25 }
 0x554   : > { %2537 = vmatprep.subr.bf16.mxu0 %v4380_v53  ;;  %2578 = vmatprep.subr.bf16.mxu1 %v4383_v29  ;;  %v5192_v53 = vld [vmem:[#allocation22_spill] sm:$0xff]  ;;  %v5193_v29 = vld [vmem:[#allocation23_spill] sm:$0xff] }
 0x555   : > { %2567 = vmatprep.mubr.bf16.mxu0 %v5095_v8  ;;  %2608 = vmatprep.mubr.bf16.mxu1 %v5095_v8 }
 0x557   : > { %2538 = vmatpush1.bf16.msra.mxu0 %v4388_v56  ;;  %2579 = vmatpush1.bf16.msra.mxu1 %v4391_v41  ;;  %v5194_v56 = vld [vmem:[#allocation24_spill] sm:$0xff]  ;;  %v5195_v41 = vld [vmem:[#allocation25_spill] sm:$0xff] }
 0x558   : > { %2539 = vmatprep.subr.bf16.mxu0 %v4488_v18  ;;  %2580 = vmatprep.subr.bf16.mxu1 %v4491_v19 }
 0x55b   : > { %2540 = vmatpush1.bf16.msra.mxu0 %v4494_v21  ;;  %2581 = vmatpush1.bf16.msra.mxu1 %v4497_v44 }
 0x55c   : > { %2541 = vmatprep.subr.bf16.mxu0 %v4500_v45  ;;  %2582 = vmatprep.subr.bf16.mxu1 %v4503_v46 }
 0x55f   : > { %2542 = vmatpush1.bf16.msra.mxu0 %v4506_v58  ;;  %2583 = vmatpush1.bf16.msra.mxu1 %v4509_v61 }
 0x560   : > { %2543 = vmatprep.subr.bf16.mxu0 %v5192_v53  ;;  %2584 = vmatprep.subr.bf16.mxu1 %v5193_v29 }
 0x563   : > { %2544 = vmatpush1.bf16.msra.mxu0 %v5194_v56  ;;  %2585 = vmatpush1.bf16.msra.mxu1 %v5195_v41 }
 0x564   : > { %2545 = vmatprep.subr.bf16.mxu0 %v5196_v36  ;;  %2586 = vmatprep.subr.bf16.mxu1 %v5197_v60 }
 0x567   : > { %2546 = vmatpush1.bf16.msra.mxu0 %v5198_v39  ;;  %2587 = vmatpush1.bf16.msra.mxu1 %v5199_v6  ;;  %v2262_v6 = vcombine.high %v2260_v3, %v2260_v3 }
 0x568   : > { %2547 = vmatprep.subr.bf16.mxu0 %v5200_v50  ;;  %2588 = vmatprep.subr.bf16.mxu1 %v5201_v4  ;;  %v5211_v50 = vld [vmem:[#allocation46_spill] sm:$0xff] }
 0x569   : > { %v2269_v4 = vrot.slane %v2260_v3, %v5211_v50 }
 0x56b   : > { %2548 = vmatpush1.bf16.msra.mxu0 %v5202_v9  ;;  %2589 = vmatpush1.bf16.msra.mxu1 %v5203_v63  ;;  %v2276_v9 = vrot.slane %v2262_v6, %v5211_v50  ;;  %v2277_v63 = vcombine.high %v2269_v4, %v2269_v4 }
 0x56c   : > { %2549 = vmatprep.subr.bf16.mxu0 %v5204_v54  ;;  %2590 = vmatprep.subr.bf16.mxu1 %v5205_v51 }
 0x56f   : > { %2550 = vmatpush1.bf16.msra.mxu0 %v5206_v10  ;;  %2591 = vmatpush1.bf16.msra.mxu1 %v5207_v35  ;;  %v2278_v35 = vcombine.high %v2276_v9, %v2276_v9 }
 0x570   : > { %2661 = vmatprep.subr.bf16.mxu0 %v5208_v23  ;;  %2702 = vmatprep.subr.bf16.mxu1 %v5209_v48 }
 0x5f2   : > { %v2317_v39 = vpop.f32.mrf.mxu0  ;;  %v2358_v54 = vpop.f32.mrf.mxu1 }
 0x5f3   : > { %v2318_v60 = vadd.f32 %v2317_v39, %v2269_v4  ;;  %v2359_v3 = vadd.f32 %v2358_v54, %v2276_v9 }
 0x5f4   : > { %v2319_v51 = vpop.f32.mrf.mxu0  ;;  %v2360_v36 = vpop.f32.mrf.mxu1 }
 0x5f5   : > { %v2365_v10 = vmul.f32 0.5, %v2318_v60  ;;  %v2320_v41 = vadd.f32 %v2319_v51, %v2277_v63  ;;  %v2361_v53 = vadd.f32 %v2360_v36, %v2278_v35  ;;  %v2367_v6 = vmul.f32 0.5, %v2359_v3  ;;  %v5212_v63 = vld [vmem:[#allocation52_spill] sm:$0xff] }
 0x5f6   : > { %v2321_v56 = vpop.f32.mrf.mxu0  ;;  %v2362_v23 = vpop.f32.mrf.mxu1  ;;  %v2386_v51 = vunpack.c.l.bf16 %v5212_v63 }
 0x5f7   : > { %3493 = vtanh.f32 %v2365_v10  ;;  %v2366_v48 = vmul.f32 0.5, %v2320_v41  ;;  %v5213_v23 = vld [vmem:[#allocation40_spill] sm:$0xff] }
 0x5f8   : > { %v2322_v29 = vpop.f32.mrf.mxu0  ;;  %v2363_v28 = vpop.f32.mrf.mxu1  ;;  %v2395_v36 = vrot.slane %v2386_v51, %v5211_v50 }
 0x5f9   : > { %3495 = vtanh.f32 %v2366_v48 }
 0x5fa   : > { %3497 = vtanh.f32 %v2361_v53  ;;  %v2388_v53 = vcombine.high %v2386_v51, %v2386_v51  ;;  %v2403_v9 = vcombine.high %v2395_v36, %v2395_v36 }
 0x5fb   : > { %3499 = vtanh.f32 %v2367_v6 }
 0x604   : > { %v3494_v61 = vpop.eup %3493 }
 0x605   : > { %v2371_v58 = vmul.f32 0.5, %v3494_v61  ;;  %v2402_v61 = vrot.slane %v2388_v53, %v5211_v50 }
 0x606   : > { %v3496_v46 = vpop.eup %3495 }
 0x607   : > { %v2374_v39 = vadd.f32 0.5, %v2371_v58  ;;  %v2372_v4 = vmul.f32 0.5, %v3496_v46  ;;  %v3498_v56 = vpop.eup %3497 }
 0x608   : > { %v3500_v35 = vpop.eup %3499 }
 0x609   : > { %v2375_v60 = vadd.f32 0.5, %v2372_v4  ;;  %v2379_v41 = vmul.f32 %v3498_v56, %v2374_v39  ;;  %v2404_v4 = vcombine.high %v2402_v61, %v2402_v61  ;;  %v2373_v63 = vmul.f32 0.5, %v3500_v35 }
 0x60b   : > { %v2378_v10 = vmul.f32 %v2375_v60, %v5213_v23 }
 0x60d   : > { %v4779_v29 = vadd.f32 %v2379_v41, %v2378_v10  ;;  %v2376_v41 = vadd.f32 0.5, %v2373_v63  ;;  %v3605_v63 = vld [vmem:[#allocation2 + $0xac] ss:$-152 sps:$4 sm:$0xff]  }
 0x60f   : > { %5214 = vst [vmem:[#allocation41_spill] sm:$0xff] %v4779_v29  ;;  %3501 = vtanh.f32 %v4779_v29 }
 0x612   : > { %v2443_v58 = vpop.f32.mrf.mxu0  ;;  %v2484_v54 = vpop.f32.mrf.mxu1 }
 0x613   : > { %v2444_v46 = vadd.f32 %v2443_v58, %v2395_v36  ;;  %v2485_v36 = vadd.f32 %v2484_v54, %v2402_v61 }
 0x614   : > { %v2445_v48 = vpop.f32.mrf.mxu0  ;;  %v2486_v28 = vpop.f32.mrf.mxu1 }
 0x615   : > { %v2491_v3 = vmul.f32 0.5, %v2444_v46  ;;  %v2446_v6 = vadd.f32 %v2445_v48, %v2403_v9  ;;  %v2487_v10 = vadd.f32 %v2486_v28, %v2404_v4  ;;  %v2493_v9 = vmul.f32 0.5, %v2485_v36  ;;  %v5227_v36 = vld [vmem:[#allocation33_spill] sm:$0xff] }
 0x616   : > { %v2447_v39 = vpop.f32.mrf.mxu0  ;;  %v2488_v60 = vpop.f32.mrf.mxu1 }
 0x617   : > { %3503 = vtanh.f32 %v2491_v3  ;;  %v2492_v56 = vmul.f32 0.5, %v2446_v6 }
 0x618   : > { %v2448_v51 = vpop.f32.mrf.mxu0  ;;  %v2489_v23 = vpop.f32.mrf.mxu1 }
 0x619   : > { %3505 = vtanh.f32 %v2492_v56  ;;  %v3606_v56 = vld [vmem:[#allocation2 + $0xd4] ss:$-168 sps:$4 sm:$0xff]   ;;  %v3607_v51 = vld [vmem:[#allocation2 + $0xa8] ss:$-152 sps:$4 sm:$0xff]  }
 0x61a   : > { %3507 = vtanh.f32 %v2487_v10  ;;  %v3608_v23 = vld [vmem:[#allocation2 + $0xd0] ss:$-168 sps:$4 sm:$0xff]   ;;  %v5219_v10 = vld [vmem:[#allocation23_spill] sm:$0xff] }
 0x61b   : > { %3509 = vtanh.f32 %v2493_v9  ;;  %v5229_v9 = vld [vmem:[#allocation35_spill] sm:$0xff] }
 0x61c   : > { %v3502_v53 = vpop.eup %3501 }
 0x61d   : > { %v2382_v29 = vmul.f32 %v3502_v53, %v2376_v41  ;;  %v5220_v41 = vld [vmem:[#allocation24_spill] sm:$0xff] }
 0x61e   : > { %v5226_v53 = vld [vmem:[#allocation32_spill] sm:$0xff] }
 0x61f   : > { %v2511_v58 = vpack.c.bf16 %v2382_v29, %v2382_v29 }
 0x621   : > { %2568 = vmatmul.mubr.bf16.vlgmr.msra.gmra.mxu0 %v2511_v58  ;;  %2609 = vmatmul.mubr.bf16.vlgmr.msra.gmra.mxu1 %v2511_v58  ;;  %v5228_v58 = vld [vmem:[#allocation34_spill] sm:$0xff] }
 0x622   : > { %2662 = vmatpush1.bf16.msra.mxu0 %v4436_v42  ;;  %2703 = vmatpush1.bf16.msra.mxu1 %v4439_v32 }
 0x623   : > { %2663 = vmatprep.subr.bf16.mxu0 %v4570_v34  ;;  %2704 = vmatprep.subr.bf16.mxu1 %v4573_v47 }
 0x624   : > { %v3504_v46 = vpop.eup %3503  ;;  %2693 = vmatprep.mubr.bf16.mxu0 %v5095_v8  ;;  %2734 = vmatprep.mubr.bf16.mxu1 %v5095_v8 }
 0x625   : > { %v2497_v35 = vmul.f32 0.5, %v3504_v46  ;;  %v5230_v46 = vld [vmem:[#allocation30_spill] sm:$0xff] }
 0x626   : > { %v3506_v48 = vpop.eup %3505  ;;  %2664 = vmatpush1.bf16.msra.mxu0 %v4446_v62  ;;  %2705 = vmatpush1.bf16.msra.mxu1 %v4579_v13 }
 0x627   : > { %v2500_v29 = vadd.f32 0.5, %v2497_v35  ;;  %v2498_v42 = vmul.f32 0.5, %v3506_v48  ;;  %2665 = vmatprep.subr.bf16.mxu0 %v4582_v27  ;;  %2706 = vmatprep.subr.bf16.mxu1 %v4128_v7  ;;  %v3508_v61 = vpop.eup %3507  ;;  %v5231_v35 = vld [vmem:[#allocation31_spill] sm:$0xff]  ;;  %v5232_v48 = vld [vmem:[#allocation36_spill] sm:$0xff] }
 0x629   : > { %v2501_v32 = vadd.f32 0.5, %v2498_v42  ;;  %v2505_v28 = vmul.f32 %v3508_v61, %v2500_v29  ;;  %v5233_v29 = vld [vmem:[#allocation37_spill] sm:$0xff]  ;;  %v5234_v42 = vld [vmem:[#allocation38_spill] sm:$0xff]  ;;  %v4853_v61 = vld [vmem:[%s3807_s21 + $0x18] sm:$0xff]  }
 0x62a   : > { %2666 = vmatpush1.bf16.msra.mxu0 %v4586_v52  ;;  %2707 = vmatpush1.bf16.msra.mxu1 %v4137_v11 }
 0x62b   : > { %v2504_v54 = vmul.f32 %v2501_v32, %v4717_v43  ;;  %2667 = vmatprep.subr.bf16.mxu0 %v4139_v12  ;;  %2708 = vmatprep.subr.bf16.mxu1 %v4592_v55  ;;  %v3510_v43 = vpop.eup %3509  ;;  %v5235_v32 = vld [vmem:[#allocation39_spill] sm:$0xff] }
 0x62c   : > { %v2499_v3 = vmul.f32 0.5, %v3510_v43 }
 0x62d   : > { %v4799_v62 = vadd.f32 %v2505_v28, %v2504_v54  ;;  %v2512_v54 = vunpack.c.l.bf16 %v4853_v61 }
 0x62e   : > { %2668 = vmatpush1.bf16.msra.mxu0 %v4145_v14  ;;  %2709 = vmatpush1.bf16.msra.mxu1 %v4598_v1  ;;  %v2502_v6 = vadd.f32 0.5, %v2499_v3 }
 0x62f   : > { %3511 = vtanh.f32 %v4799_v62  ;;  %2669 = vmatprep.subr.bf16.mxu0 %v4602_v59  ;;  %2710 = vmatprep.subr.bf16.mxu1 %v4605_v5  ;;  %v2521_v28 = vrot.slane %v2512_v54, %v5211_v50  ;;  %v2514_v43 = vcombine.high %v2512_v54, %v2512_v54 }
 0x631   : > { %v2528_v3 = vrot.slane %v2514_v43, %v5211_v50 }
 0x632   : > { %2670 = vmatpush1.bf16.msra.mxu0 %v4608_v38  ;;  %2711 = vmatpush1.bf16.msra.mxu1 %v4611_v0 }
 0x633   : > { %2671 = vmatprep.subr.bf16.mxu0 %v4614_v33  ;;  %2712 = vmatprep.subr.bf16.mxu1 %v4617_v57 }
 0x636   : > { %2672 = vmatpush1.bf16.msra.mxu0 %v5186_v26  ;;  %2713 = vmatpush1.bf16.msra.mxu1 %v5187_v30 }
 0x637   : > { %2673 = vmatprep.subr.bf16.mxu0 %v5188_v31  ;;  %2714 = vmatprep.subr.bf16.mxu1 %v5189_v2 }
 0x63a   : > { %2674 = vmatpush1.bf16.msra.mxu0 %v5190_v17  ;;  %2715 = vmatpush1.bf16.msra.mxu1 %v5191_v40 }
 0x63b   : > { %2675 = vmatprep.subr.bf16.mxu0 %v4638_v15  ;;  %2716 = vmatprep.subr.bf16.mxu1 %v4641_v16 }
 0x63c   : > { %v3512_v4 = vpop.eup %3511 }
 0x63d   : > { %v2508_v39 = vmul.f32 %v3512_v4, %v2502_v6  ;;  %v2529_v6 = vcombine.high %v2521_v28, %v2521_v28 }
 0x63e   : > { %2676 = vmatpush1.bf16.msra.mxu0 %v4644_v37  ;;  %2717 = vmatpush1.bf16.msra.mxu1 %v4647_v49 }
 0x63f   : > { %v2637_v60 = vpack.c.bf16 %v2508_v39, %v2508_v39  ;;  %2787 = vmatprep.subr.bf16.mxu0 %v4006_v20  ;;  %2828 = vmatprep.subr.bf16.mxu1 %v4012_v24  ;;  %v5215_v20 = vld [vmem:[#allocation47_spill] sm:$0xff]  ;;  %v5217_v24 = vld [vmem:[#allocation21_spill] sm:$0xff] }
 0x641   : > { %2694 = vmatmul.mubr.bf16.vlgmr.msra.gmra.mxu0 %v2637_v60  ;;  %2735 = vmatmul.mubr.bf16.vlgmr.msra.gmra.mxu1 %v2637_v60 }
 0x642   : > { %2788 = vmatpush1.bf16.msra.mxu0 %v4008_v22  ;;  %2829 = vmatpush1.bf16.msra.mxu1 %v4014_v25  ;;  %v5216_v22 = vld [vmem:[#allocation48_spill] sm:$0xff]  ;;  %v5218_v25 = vld [vmem:[#allocation22_spill] sm:$0xff] }
 0x643   : > { %2789 = vmatprep.subr.bf16.mxu0 %v3605_v63  ;;  %2830 = vmatprep.subr.bf16.mxu1 %v3606_v56 }
 0x644   : > { %2819 = vmatprep.mubr.bf16.mxu0 %v5095_v8  ;;  %2860 = vmatprep.mubr.bf16.mxu1 %v5095_v8 }
 0x646   : > { %2790 = vmatpush1.bf16.msra.mxu0 %v3607_v51  ;;  %2831 = vmatpush1.bf16.msra.mxu1 %v3608_v23 }
 0x647   : > { %2791 = vmatprep.subr.bf16.mxu0 %v4488_v18  ;;  %2832 = vmatprep.subr.bf16.mxu1 %v4491_v19  ;;  %v5221_v18 = vld [vmem:[#allocation25_spill] sm:$0xff]  ;;  %v5222_v19 = vld [vmem:[#allocation26_spill] sm:$0xff] }
 0x64a   : > { %2792 = vmatpush1.bf16.msra.mxu0 %v4494_v21  ;;  %2833 = vmatpush1.bf16.msra.mxu1 %v4497_v44  ;;  %v5223_v21 = vld [vmem:[#allocation27_spill] sm:$0xff]  ;;  %v5224_v44 = vld [vmem:[#allocation28_spill] sm:$0xff] }
 0x64b   : > { %2793 = vmatprep.subr.bf16.mxu0 %v4500_v45  ;;  %2834 = vmatprep.subr.bf16.mxu1 %v5215_v20  ;;  %v5225_v45 = vld [vmem:[#allocation29_spill] sm:$0xff]  ;;  %v2530_v20 = vcombine.high %v2528_v3, %v2528_v3 }
 0x64e   : > { %2794 = vmatpush1.bf16.msra.mxu0 %v5216_v22  ;;  %2835 = vmatpush1.bf16.msra.mxu1 %v5217_v24 }
 0x64f   : > { %2795 = vmatprep.subr.bf16.mxu0 %v5218_v25  ;;  %2836 = vmatprep.subr.bf16.mxu1 %v5219_v10 }
 0x652   : > { %2796 = vmatpush1.bf16.msra.mxu0 %v5220_v41  ;;  %2837 = vmatpush1.bf16.msra.mxu1 %v5221_v18 }
 0x653   : > { %2797 = vmatprep.subr.bf16.mxu0 %v5222_v19  ;;  %2838 = vmatprep.subr.bf16.mxu1 %v5223_v21 }
 0x656   : > { %2798 = vmatpush1.bf16.msra.mxu0 %v5224_v44  ;;  %2839 = vmatpush1.bf16.msra.mxu1 %v5225_v45 }
 0x657   : > { %2799 = vmatprep.subr.bf16.mxu0 %v5226_v53  ;;  %2840 = vmatprep.subr.bf16.mxu1 %v5227_v36  ;;  %v4859_v36 = vld [vmem:[%s3809_s22] sm:$0xff]  }
 0x65a   : > { %2800 = vmatpush1.bf16.msra.mxu0 %v5228_v58  ;;  %2841 = vmatpush1.bf16.msra.mxu1 %v5229_v9 }
 0x65b   : > { %2801 = vmatprep.subr.bf16.mxu0 %v5230_v46  ;;  %2842 = vmatprep.subr.bf16.mxu1 %v5231_v35  ;;  %v2638_v35 = vunpack.c.h.bf16 %v4859_v36 }
 0x65d   : > { %v2640_v43 = vcombine.high %v2638_v35, %v2638_v35 }
 0x65e   : > { %2802 = vmatpush1.bf16.msra.mxu0 %v5232_v48  ;;  %2843 = vmatpush1.bf16.msra.mxu1 %v5233_v29  ;;  %v5236_v29 = vld [vmem:[#allocation41_spill] sm:$0xff] }
 0x65f   : > { %2912 = vmatprep.subr.bf16.mxu0 %v5234_v42  ;;  %2953 = vmatprep.subr.bf16.mxu1 %v5235_v32 }
 0x6e1   : > { %v2569_v4 = vpop.f32.mrf.mxu0  ;;  %v2610_v39 = vpop.f32.mrf.mxu1 }
 0x6e2   : > { %v2570_v60 = vadd.f32 %v2569_v4, %v2521_v28  ;;  %v2611_v19 = vadd.f32 %v2610_v39, %v2528_v3  ;;  %v2647_v28 = vrot.slane %v2638_v35, %v5211_v50  ;;  %v2654_v3 = vrot.slane %v2640_v43, %v5211_v50  ;;  %v3610_v35 = vld [vmem:[#allocation3] ss:$152 sps:$4 sm:$0xff]  }
 0x6e3   : > { %v2571_v63 = vpop.f32.mrf.mxu0  ;;  %v2612_v56 = vpop.f32.mrf.mxu1 }
 0x6e4   : > { %v2617_v51 = vmul.f32 0.5, %v2570_v60  ;;  %v2572_v23 = vadd.f32 %v2571_v63, %v2529_v6  ;;  %v2613_v18 = vadd.f32 %v2612_v56, %v2530_v20  ;;  %v2619_v21 = vmul.f32 0.5, %v2611_v19 }
 0x6e5   : > { %v2573_v22 = vpop.f32.mrf.mxu0  ;;  %v2614_v24 = vpop.f32.mrf.mxu1  ;;  %v2655_v6 = vcombine.high %v2647_v28, %v2647_v28 }
 0x6e6   : > { %3513 = vtanh.f32 %v2617_v51  ;;  %v2618_v25 = vmul.f32 0.5, %v2572_v23  ;;  %v2656_v22 = vcombine.high %v2654_v3, %v2654_v3 }
 0x6e7   : > { %v2574_v10 = vpop.f32.mrf.mxu0  ;;  %v2615_v41 = vpop.f32.mrf.mxu1 }
 0x6e8   : > { %3515 = vtanh.f32 %v2618_v25 }
 0x6e9   : > { %3517 = vtanh.f32 %v2613_v18 }
 0x6ea   : > { %3519 = vtanh.f32 %v2619_v21 }
 0x6f3   : > { %v3514_v44 = vpop.eup %3513 }
 0x6f4   : > { %v2623_v45 = vmul.f32 0.5, %v3514_v44 }
 0x6f5   : > { %v3516_v53 = vpop.eup %3515 }
 0x6f6   : > { %v2626_v58 = vadd.f32 0.5, %v2623_v45  ;;  %v2624_v9 = vmul.f32 0.5, %v3516_v53  ;;  %v3518_v48 = vpop.eup %3517 }
 0x6f7   : > { %v3520_v63 = vpop.eup %3519 }
 0x6f8   : > { %v2627_v46 = vadd.f32 0.5, %v2624_v9  ;;  %v2631_v32 = vmul.f32 %v3518_v48, %v2626_v58  ;;  %v2625_v10 = vmul.f32 0.5, %v3520_v63 }
 0x6fa   : > { %v2630_v42 = vmul.f32 %v2627_v46, %v5236_v29  ;;  %v2628_v44 = vadd.f32 0.5, %v2625_v10  ;;  %v3609_v46 = vld [vmem:[#allocation3 + $0xb8] ss:$-144 sps:$4 sm:$0xff]  }
 0x6fc   : > { %v4863_v54 = vadd.f32 %v2631_v32, %v2630_v42 }
 0x6fe   : > { %3521 = vtanh.f32 %v4863_v54 }
 0x701   : > { %v2695_v4 = vpop.f32.mrf.mxu0  ;;  %v2736_v39 = vpop.f32.mrf.mxu1 }
 0x702   : > { %v2696_v60 = vadd.f32 %v2695_v4, %v2647_v28  ;;  %v2737_v58 = vadd.f32 %v2736_v39, %v2654_v3  ;;  %v3611_v28 = vld [vmem:[#allocation3 + $0x88] ss:$112 sps:$4 sm:$0xff]  }
 0x703   : > { %v2697_v56 = vpop.f32.mrf.mxu0  ;;  %v2738_v51 = vpop.f32.mrf.mxu1 }
 0x704   : > { %v2743_v23 = vmul.f32 0.5, %v2696_v60  ;;  %v2698_v20 = vadd.f32 %v2697_v56, %v2655_v6  ;;  %v2739_v21 = vadd.f32 %v2738_v51, %v2656_v22  ;;  %v2745_v48 = vmul.f32 0.5, %v2737_v58 }
 0x705   : > { %v2699_v24 = vpop.f32.mrf.mxu0  ;;  %v2740_v25 = vpop.f32.mrf.mxu1 }
 0x706   : > { %3523 = vtanh.f32 %v2743_v23  ;;  %v2744_v41 = vmul.f32 0.5, %v2698_v20  ;;  %v2889_v20 = vunpack.c.l.bf16 %v4859_v36 }
 0x707   : > { %v2700_v18 = vpop.f32.mrf.mxu0  ;;  %v2741_v19 = vpop.f32.mrf.mxu1 }
 0x708   : > { %3525 = vtanh.f32 %v2744_v41  ;;  %v2898_v41 = vrot.slane %v2889_v20, %v5211_v50  ;;  %v2891_v18 = vcombine.high %v2889_v20, %v2889_v20 }
 0x709   : > { %3527 = vtanh.f32 %v2739_v21 }
 0x70a   : > { %3529 = vtanh.f32 %v2745_v48  ;;  %v2905_v19 = vrot.slane %v2891_v18, %v5211_v50  ;;  %v2906_v21 = vcombine.high %v2898_v41, %v2898_v41 }
 0x70b   : > { %v3522_v45 = vpop.eup %3521 }
 0x70c   : > { %v2634_v53 = vmul.f32 %v3522_v45, %v2628_v44  ;;  %v2907_v48 = vcombine.high %v2905_v19, %v2905_v19 }
 0x70e   : > { %v2763_v9 = vpack.c.bf16 %v2634_v53, %v2634_v53 }
 0x710   : > { %2820 = vmatmul.mubr.bf16.vlgmr.msra.gmra.mxu0 %v2763_v9  ;;  %2861 = vmatmul.mubr.bf16.vlgmr.msra.gmra.mxu1 %v2763_v9 }
 0x711   : > { %2913 = vmatpush1.bf16.msra.mxu0 %v3609_v46  ;;  %2954 = vmatpush1.bf16.msra.mxu1 %v3610_v35 }
 0x712   : > { %2914 = vmatprep.subr.bf16.mxu0 %v4570_v34  ;;  %2955 = vmatprep.subr.bf16.mxu1 %v4573_v47 }
 0x713   : > { %v3524_v29 = vpop.eup %3523  ;;  %2944 = vmatprep.mubr.bf16.mxu0 %v5095_v8  ;;  %2985 = vmatprep.mubr.bf16.mxu1 %v5095_v8 }
 0x714   : > { %v2749_v42 = vmul.f32 0.5, %v3524_v29 }
 0x715   : > { %v3526_v32 = vpop.eup %3525  ;;  %2915 = vmatpush1.bf16.msra.mxu0 %v3611_v28  ;;  %2956 = vmatpush1.bf16.msra.mxu1 %v4579_v13 }
 0x716   : > { %v2752_v43 = vadd.f32 0.5, %v2749_v42  ;;  %v2750_v3 = vmul.f32 0.5, %v3526_v32  ;;  %2916 = vmatprep.subr.bf16.mxu0 %v4582_v27  ;;  %2957 = vmatprep.subr.bf16.mxu1 %v4128_v7  ;;  %v3528_v47 = vpop.eup %3527 }
 0x717   : > { %v3530_v7 = vpop.eup %3529 }
 0x718   : > { %v2753_v34 = vadd.f32 0.5, %v2750_v3  ;;  %v2757_v6 = vmul.f32 %v3528_v47, %v2752_v43 }
 0x719   : > { %2917 = vmatpush1.bf16.msra.mxu0 %v4586_v52  ;;  %2958 = vmatpush1.bf16.msra.mxu1 %v4137_v11  ;;  %v2751_v11 = vmul.f32 0.5, %v3530_v7 }
 0x71a   : > { %v2756_v8 = vmul.f32 %v2753_v34, %v4799_v62  ;;  %2918 = vmatprep.subr.bf16.mxu0 %v4139_v12  ;;  %2959 = vmatprep.subr.bf16.mxu1 %v4592_v55  ;;  %v2764_v55 = vunpack.c.h.bf16 %v4853_v61 }
 0x71b   : > { %v2754_v12 = vadd.f32 0.5, %v2751_v11 }
 0x71c   : > { %v4880_v13 = vadd.f32 %v2757_v6, %v2756_v8 }
 0x71d   : > { %2919 = vmatpush1.bf16.msra.mxu0 %v4145_v14  ;;  %2960 = vmatpush1.bf16.msra.mxu1 %v4598_v1  ;;  %v2773_v1 = vrot.slane %v2764_v55, %v5211_v50 }
 0x71e   : > { %3531 = vtanh.f32 %v4880_v13  ;;  %2920 = vmatprep.subr.bf16.mxu0 %v4602_v59  ;;  %2961 = vmatprep.subr.bf16.mxu1 %v4605_v5  ;;  %v2766_v59 = vcombine.high %v2764_v55, %v2764_v55 }
 0x720   : > { %v2780_v5 = vrot.slane %v2766_v59, %v5211_v50 }
 0x721   : > { %2921 = vmatpush1.bf16.msra.mxu0 %v4608_v38  ;;  %2962 = vmatpush1.bf16.msra.mxu1 %v4611_v0  ;;  %v2781_v38 = vcombine.high %v2773_v1, %v2773_v1 }
 0x722   : > { %2922 = vmatprep.subr.bf16.mxu0 %v4614_v33  ;;  %2963 = vmatprep.subr.bf16.mxu1 %v4617_v57 }
 0x725   : > { %2923 = vmatpush1.bf16.msra.mxu0 %v5186_v26  ;;  %2964 = vmatpush1.bf16.msra.mxu1 %v5187_v30  ;;  %v2782_v30 = vcombine.high %v2780_v5, %v2780_v5 }
 0x726   : > { %2924 = vmatprep.subr.bf16.mxu0 %v5188_v31  ;;  %2965 = vmatprep.subr.bf16.mxu1 %v5189_v2 }
 0x729   : > { %2925 = vmatpush1.bf16.msra.mxu0 %v5190_v17  ;;  %2966 = vmatpush1.bf16.msra.mxu1 %v5191_v40 }
 0x72a   : > { %2926 = vmatprep.subr.bf16.mxu0 %v4638_v15  ;;  %2967 = vmatprep.subr.bf16.mxu1 %v4641_v16 }
 0x72b   : > { %v3532_v14 = vpop.eup %3531 }
 0x72c   : > { %v2760_v27 = vmul.f32 %v3532_v14, %v2754_v12 }
 0x72d   : > { %2927 = vmatpush1.bf16.msra.mxu0 %v4644_v37  ;;  %2968 = vmatpush1.bf16.msra.mxu1 %v4647_v49 }
 0x72e   : > { %v2888_v52 = vpack.c.bf16 %v2760_v27, %v2760_v27 }
 0x730   : > { %2945 = vmatmul.mubr.bf16.vlgmr.msra.gmra.mxu0 %v2888_v52  ;;  %2986 = vmatmul.mubr.bf16.vlgmr.msra.gmra.mxu1 %v2888_v52 }
 0x7d0   : > { %v2821_v0 = vpop.f32.mrf.mxu0  ;;  %v2862_v33 = vpop.f32.mrf.mxu1 }
 0x7d1   : > { %v2822_v57 = vadd.f32 %v2821_v0, %v2773_v1  ;;  %v2863_v61 = vadd.f32 %v2862_v33, %v2780_v5 }
 0x7d2   : > { %v2823_v15 = vpop.f32.mrf.mxu0  ;;  %v2864_v16 = vpop.f32.mrf.mxu1 }
 0x7d3   : > { %v2869_v26 = vmul.f32 0.5, %v2822_v57  ;;  %v2824_v37 = vadd.f32 %v2823_v15, %v2781_v38  ;;  %v2865_v62 = vadd.f32 %v2864_v16, %v2782_v30  ;;  %v2871_v4 = vmul.f32 0.5, %v2863_v61 }
 0x7d4   : > { %v2825_v49 = vpop.f32.mrf.mxu0  ;;  %v2866_v31 = vpop.f32.mrf.mxu1 }
 0x7d5   : > { %3533 = vtanh.f32 %v2869_v26  ;;  %v2870_v2 = vmul.f32 0.5, %v2824_v37 }
 0x7d6   : > { %v2826_v17 = vpop.f32.mrf.mxu0  ;;  %v2867_v40 = vpop.f32.mrf.mxu1 }
 0x7d7   : > { %3535 = vtanh.f32 %v2870_v2 }
 0x7d8   : > { %3537 = vtanh.f32 %v2865_v62 }
 0x7d9   : > { %3539 = vtanh.f32 %v2871_v4 }
 0x7e2   : > { %v3534_v39 = vpop.eup %3533 }
 0x7e3   : > { %v2875_v60 = vmul.f32 0.5, %v3534_v39 }
 0x7e4   : > { %v3536_v63 = vpop.eup %3535 }
 0x7e5   : > { %v2878_v56 = vadd.f32 0.5, %v2875_v60  ;;  %v2876_v51 = vmul.f32 0.5, %v3536_v63  ;;  %v3538_v22 = vpop.eup %3537 }
 0x7e6   : > { %v3540_v58 = vpop.eup %3539 }
 0x7e7   : > { %v2879_v23 = vadd.f32 0.5, %v2876_v51  ;;  %v2883_v25 = vmul.f32 %v3538_v22, %v2878_v56  ;;  %v2877_v42 = vmul.f32 0.5, %v3540_v58 }
 0x7e9   : > { %v2882_v24 = vmul.f32 %v2879_v23, %v4863_v54  ;;  %v2880_v50 = vadd.f32 0.5, %v2877_v42 }
 0x7eb   : > { %v2884_v10 = vadd.f32 %v2883_v25, %v2882_v24 }
 0x7ed   : > { %3541 = vtanh.f32 %v2884_v10  ;;  %3013 = vst [vmem:[#allocation5] sm:$0x3] %v2884_v10 }
 0x7f0   : > { %v2946_v44 = vpop.f32.mrf.mxu0  ;;  %v2987_v45 = vpop.f32.mrf.mxu1 }
 0x7f1   : > { %v2947_v53 = vadd.f32 %v2946_v44, %v2898_v41  ;;  %v2988_v8 = vadd.f32 %v2987_v45, %v2905_v19 }
 0x7f2   : > { %v2948_v9 = vpop.f32.mrf.mxu0  ;;  %v2989_v46 = vpop.f32.mrf.mxu1 }
 0x7f3   : > { %v2994_v36 = vmul.f32 0.5, %v2947_v53  ;;  %v2949_v35 = vadd.f32 %v2948_v9, %v2906_v21  ;;  %v2990_v3 = vadd.f32 %v2989_v46, %v2907_v48  ;;  %v2996_v6 = vmul.f32 0.5, %v2988_v8 }
 0x7f4   : > { %v2950_v54 = vpop.f32.mrf.mxu0  ;;  %v2991_v29 = vpop.f32.mrf.mxu1 }
 0x7f5   : > { %3543 = vtanh.f32 %v2994_v36  ;;  %v2995_v32 = vmul.f32 0.5, %v2949_v35 }
 0x7f6   : > { %v2951_v28 = vpop.f32.mrf.mxu0  ;;  %v2992_v43 = vpop.f32.mrf.mxu1 }
 0x7f7   : > { %3545 = vtanh.f32 %v2995_v32 }
 0x7f8   : > { %3547 = vtanh.f32 %v2990_v3 }
 0x7f9   : > { %3549 = vtanh.f32 %v2996_v6 }
 0x7fa   : > { %v3542_v34 = vpop.eup %3541 }
 0x7fb   : > { %v2886_v47 = vmul.f32 %v3542_v34, %v2880_v50 }
 0x7fd   : > { %3012 = vst [vmem:[#allocation4] sm:$0x3] %v2886_v47 }
 0x802   : > { %v3544_v7 = vpop.eup %3543 }
 0x803   : > { %v3000_v11 = vmul.f32 0.5, %v3544_v7 }
 0x804   : > { %v3546_v12 = vpop.eup %3545 }
 0x805   : > { %v3003_v14 = vadd.f32 0.5, %v3000_v11  ;;  %v3001_v27 = vmul.f32 0.5, %v3546_v12  ;;  %v3548_v55 = vpop.eup %3547 }
 0x806   : > { %v3550_v38 = vpop.eup %3549 }
 0x807   : > { %v3004_v52 = vadd.f32 0.5, %v3001_v27  ;;  %v3008_v59 = vmul.f32 %v3548_v55, %v3003_v14  ;;  %v3002_v0 = vmul.f32 0.5, %v3550_v38 }
 0x809   : > { %v3007_v1 = vmul.f32 %v3004_v52, %v4880_v13  ;;  %v3005_v33 = vadd.f32 0.5, %v3002_v0 }
 0x80b   : > { %v3009_v5 = vadd.f32 %v3008_v59, %v3007_v1 }
 0x80d   : > { %3551 = vtanh.f32 %v3009_v5  ;;  %3015 = vst [vmem:[#allocation7] sm:$0x3] %v3009_v5 }
 0x819   : > { %3018 = sbr.rel (%p3175_p11) target bundleno = 2080 (0x820), region = 196 }
 0x81a   : > { %v3552_v57 = vpop.eup %3551 }
 0x81b   : > { %v3011_v15 = vmul.f32 %v3552_v57, %v3005_v33 }
 0x81d   : > { %3014 = vst [vmem:[#allocation6] sm:$0x3] %v3011_v15 }
 0x81e   : > { %v5237_v16 = vld [vmem:[#allocation42_spill] sm:$0xff] }
 0x81f   : > { %3019 = vst [vmem:[#allocation8] sm:$0x3] %v5237_v16 }
 0x820 PF: > { %p3255_p12 = scmp.ne.s32.totalorder %s3761_s5, 1 }
 0x821   : > { %s3049_s30 = sld [smem:[#allocation9]] (!%p3255_p12) }
 0x822   : > { %3023 = sbr.rel (%p3255_p12) target bundleno = 2258 (0x8d2), region = 200 }
 0x827   : > { %v3256_v13 = vld [vmem:[%s4954_s4] ss:$0 sm:$0xff]  ;;  %vm3033_vm0 = vcmask 1041408   ;;  %v3257_v26 = vld [vmem:[%s4954_s4 + $0x1] ss:$0 sm:$0xff]  ;;  %v3050_v40 = vstv %s3049_s30  ;;  %vm3056_vm1 = vcmask 1024  }
 0x828   : > { %3058 = vst [vmem:[#allocation12] sm:$0x3] %v2886_v47  ;;  %3060 = vst [vmem:[#allocation12 + $0x2] sm:$0x3] %v3011_v15  ;;  %v3032_v37 = vmul.f32 %v3256_v13, %v2886_v47  ;;  %v3037_v30 = vld [vmem:[#allocation8] sm:$0x3] }
 0x829   : > { %v3044_v49 = vmul.f32 %v3257_v26, %v3037_v30 }
 0x82a   : > { %v3034_v31 = vsel %vm3033_vm0, %v3032_v37, 0.0 }
 0x82b   : > { %3035 = vadd.xlane.f32.xlu0 %v3034_v31  ;;  %v3045_v2 = vsel %vm3033_vm0, %v3044_v49, 0.0 }
 0x82f   : > { %3046 = vadd.xlane.f32.xlu0 %v3045_v2 }
 0x8b4   : > { %v3036_v17 = vpop.xlane.xlu0 %3035 }
 0x8b8   : > { %v3047_v62 = vpop.xlane.xlu0 %3046 }
 0x8b9   : > { %v3048_v61 = vadd.f32 %v3047_v62, %v3036_v17 }
 0x8bb   : > { %v3051_v4 = vadd.f32 %v3050_v40, %v3048_v61 }
 0x8bd   : > { %v3052_v39 = vmul.f32 0.5, %v3051_v4 }
 0x8bf   : > { %3612 = vtanh.f32 %v3052_v39 }
 0x8cc   : > { %v3613_v60 = vpop.eup %3612 }
 0x8cd   : > { %v3054_v63 = vmul.f32 0.5, %v3613_v60 }
 0x8cf   : > { %v3055_v56 = vadd.f32 0.5, %v3054_v63 }
 0x8d1   : > { %3057 = vst.msk [vmem:[%s4956_s6] sm:$0x3] %vm3056_vm1, %v3055_v56 }
 0x8d2 PF: > { %p3267_p13 = scmp.eq.s32.totalorder %s3761_s5, 1  ;;  %s3689_s28 = smov [#allocation12]  }
 0x8d3   : > { %s3070_s9 = sshll.u32 %s3689_s28, 4  ;;  %s3071_s9 = int_to_ptr.vmem [resolvable:$true] %s3070_s9 }
 0x8d4   : > { %s3614_s10 = scalar_lea.vmem %s3071_s9, 64  ;;  %p3621_p3 = scmp.lt.s32.totalorder %s3071_s9, %s3071_s9 }
 0x8d5   : > { %p3615_p0 = scmp.ne.s32.totalorder %s3071_s9, %s3614_s10  ;;  %p3622_p4 = scmp.lt.s32.totalorder %s3614_s10, %s3614_s10 }
 0x8d7   : > { %p3616_p1 = pnand %p3615_p0, %p3267_p13  ;;  %p3623_p5 = por %p3622_p4, %p3621_p3 }
 0x8d9   : > { %p3617_p2 = pneg %p3616_p1 }
 0x8db   : > { %p3624_p6 = pnand %p3623_p5, %p3617_p2 }
 0x8dd   : > { %3627 = shalt.err (!%p3624_p6)
}
 0x8de   : > { %s3690_s13 = smov 32   ;;  %s3691_s14 = smov 2  }
 0x8df   : > { %3264 = dma.vmem_to_hbm [thread:$0]  (%p3267_p13), %s3071_s9, 64, %s4957_s7, [#allocation13], %s3690_s13, %s3690_s13, %s3691_s14  }
 0x8e0   : > { %3663 = dma.done.wait (%p3267_p13), [#allocation13], 64  }
 0x8e1   : > { %3665 = vsyncadd (%p3267_p13), [#allocation13], 4294967232 }
 0x8e2 PF: > { %p17_p7 = scmp.ge.s32.totalorder %s3764_s8, 4   ;;  %s5238_s26 = smov %s3672_s27 }
 0x8e3   : > { %s5239_s27 = smov %s3783_s16  ;;  %s5240_s28 = smov %s3680_s29 }
 0x8e4   : > { %s5241_s29 = smov %s3774_s12  ;;  %s5242_s30 = smov %s3764_s8 }
 0x8e5   :  { %19 = sbr.rel (!%p17_p7) target bundleno = 5 (0x5), region = 279 }
 0x8ea   :  { %3089 = vsyncpa [#allocation13], 1 }
 0x8eb   :  { %3091 = vsyncpa [#allocation13 + $0x1], 1 }

</bundles_post_ra>
